<compile_context>
chip_gen: v5e
topology: v5e:2x2
jax: 0.10.0
libtpu: 0.0.40
codegen_flags: <defaults>
</compile_context>

<pallas_src>
import functools

import jax
import jax.numpy as jnp
from jax.experimental import pallas as pl
from jax.experimental.pallas import tpu as pltpu

_LANE = 128
_TARGET_BLOCK_BYTES = 4 * 1024 * 1024   # 4 MiB / block, 8 MiB double-buffered
_MAX_SHARDS = 2                          # outer "parallel" axis (megacore)
_MIN_KERNEL_BYTES = 32 * 1024            # below this a fused XLA reduce wins


def _cdiv(a, b):
    return -(-a // b)


def _round_up(a, b):
    return _cdiv(a, b) * b


def _partial_sum_kernel(x_ref, o_ref, *, total_rows, tiles_per_shard,
                        block_rows, need_mask):
    """Accumulate a vreg-shaped (8, 128) f32 partial sum per shard into o_ref."""
    step = pl.program_id(1)

    @pl.when(step == 0)
    def _init():
        o_ref[...] = jnp.zeros_like(o_ref)

    def _accum(x):
        # Keep the running sum vreg-shaped: the hot loop is pure VPU adds;
        # the single cross-lane/sublane reduce happens once in the wrapper.
        o_ref[...] += jnp.sum(x.reshape(block_rows // 8, 8, _LANE), axis=0)

    if need_mask:
        # Only the very last tile of the grid can be partial.  Gate the mask
        # so every full tile stays on the cheap (load + add) path.
        row0 = (pl.program_id(0) * tiles_per_shard + step) * block_rows
        is_partial = row0 + block_rows > total_rows

        @pl.when(jnp.logical_not(is_partial))
        def _full():
            _accum(x_ref[...].astype(jnp.float32))

        @pl.when(is_partial)
        def _masked():
            x = x_ref[...].astype(jnp.float32)
            row_idx = row0 + jax.lax.broadcasted_iota(
                jnp.int32, (block_rows, _LANE), 0)
            # Rows at/after the real extent contribute zero (safe even if the
            # padded region of the edge block holds garbage/NaN bits).
            _accum(jnp.where(row_idx < total_rows, x, 0.0))
    else:
        _accum(x_ref[...].astype(jnp.float32))


def wasserstein_generator_loss(predict_fake):
    """-mean(predict_fake), accumulated and returned in float32."""
    n = predict_fake.size
    flat = jnp.ravel(predict_fake)

    itemsize = jnp.dtype(flat.dtype).itemsize
    if itemsize > 4:                       # no 64-bit vector path on TPU
        flat = flat.astype(jnp.float32)
        itemsize = 4

    rows = n // _LANE
    row_pack = 8 * max(1, 4 // itemsize)   # sublane packing: 8 f32 / 16 bf16 / 32 i8

    if n * itemsize < _MIN_KERNEL_BYTES or rows < row_pack:
        # Tiny input: a kernel launch + grid overhead loses to a fused reduce.
        return -(jnp.sum(flat.astype(jnp.float32)) / jnp.float32(n))

    # Full 128-lane rows stream through the kernel (bitcast-compatible reshape
    # -> no extra HBM copy when n % 128 == 0); the tiny tail is added in jnp.
    main = flat[: rows * _LANE].reshape(rows, _LANE)
    tail = flat[rows * _LANE:]

    # Dtype-scaled block: constant ~4 MiB of HBM traffic per grid step.
    max_block_rows = max(
        row_pack,
        (_TARGET_BLOCK_BYTES // (_LANE * itemsize)) // row_pack * row_pack)

    # Shard across TensorCores only when every shard gets >= 1 full block
    # (avoids degenerate / wasted tiles on small inputs).
    num_shards = _MAX_SHARDS if rows >= _MAX_SHARDS * max_block_rows else 1

    # Balanced tiling: tile count a multiple of num_shards, last tile as full
    # as possible -> no fully-masked tiles and no redundant clamped DMAs.
    tiles_needed = max(num_shards, _cdiv(rows, max_block_rows))
    num_tiles = _round_up(tiles_needed, num_shards)
    block_rows = min(max_block_rows,
                     _round_up(_cdiv(rows, num_tiles), row_pack))
    num_tiles = _cdiv(rows, block_rows)
    if num_tiles % num_shards != 0:        # rare corner: keep per-shard tiling exact
        num_shards = 1
    tiles_per_shard = num_tiles // num_shards
    need_mask = num_tiles * block_rows != rows

    kernel = functools.partial(
        _partial_sum_kernel,
        total_rows=rows,
        tiles_per_shard=tiles_per_shard,
        block_rows=block_rows,
        need_mask=need_mask,
    )

    partials = pl.pallas_call(
        kernel,
        out_shape=jax.ShapeDtypeStruct((num_shards * 8, _LANE), jnp.float32),
        grid_spec=pltpu.PrefetchScalarGridSpec(
            num_scalar_prefetch=0,
            grid=(num_shards, tiles_per_shard),
            in_specs=[pl.BlockSpec(
                (block_rows, _LANE),
                lambda c, i: (c * tiles_per_shard + i, 0))],
            out_specs=pl.BlockSpec((8, _LANE), lambda c, i: (c, 0)),
        ),
        compiler_params=pltpu.CompilerParams(
            # "parallel" lets the runtime shard the outer axis across v7x's
            # two TensorCores; it is a serial loop on v5e/v6e (harmless).
            dimension_semantics=("parallel", "arbitrary"),
            vmem_limit_bytes=32 * 1024 * 1024),
        cost_estimate=pl.CostEstimate(
            flops=n, transcendentals=0,
            bytes_accessed=n * itemsize + num_shards * 8 * _LANE * 4),
    )(main)

    total = jnp.sum(partials)
    if tail.size:
        total = total + jnp.sum(tail.astype(jnp.float32))
    return -(total / jnp.float32(n))


if __name__ == "__main__":
    k0, k1, k2 = jax.random.split(jax.random.PRNGKey(0), 3)

    # Small NCHW discriminator scores (routes through the jnp small-input path).
    x0 = jax.random.normal(k0, (2, 4, 16, 16), dtype=jnp.float32)
    l0 = wasserstein_generator_loss(x0)
    jax.block_until_ready(l0)
    r0 = -jnp.mean(x0)
    assert jnp.allclose(l0, r0, atol=1e-6, rtol=1e-5), (l0, r0)

    # Large input: 2-shard, exact-tiling kernel path (2 x 4 MiB blocks).
    x1 = jax.random.normal(k1, (64, 8, 64, 64), dtype=jnp.float32)
    l1 = wasserstein_generator_loss(x1)
    jax.block_until_ready(l1)
    r1 = -jnp.mean(x1)
    assert jnp.allclose(l1, r1, atol=1e-6, rtol=1e-5), (l1, r1)

    # Ragged shape + native bf16 (exercises the gated row mask + jnp tail).
    x2 = jax.random.normal(k2, (3, 5, 67, 41), dtype=jnp.bfloat16)
    l2 = wasserstein_generator_loss(x2)
    jax.block_until_ready(l2)
    r2 = -jnp.mean(x2.astype(jnp.float32))
    assert jnp.allclose(l2, r2, atol=1e-5, rtol=1e-5), (l2, r2)

    print("KERNEL_OK")
</pallas_src>

<mosaic_0001>
module attributes {stable_mosaic.version = 11 : i64} {
  func.func @_partial_sum_kernel(%arg0: i32, %arg1: i32, %arg2: memref<8192x128xf32, #tpu.memory_space<vmem>>, %arg3: memref<8x128xf32, #tpu.memory_space<vmem>>) attributes {dimension_semantics = [#tpu.dimension_semantics<parallel>, #tpu.dimension_semantics<arbitrary>], iteration_bounds = array<i64: 2, 1>, scalar_prefetch = 0 : i64, scratch_operands = 0 : i64, tpu.core_type = #tpu.core_type<tc>, window_params = [{transform_indices = @transform_0, window_bounds = array<i64: 8192, 128>}, {transform_indices = @transform_1, window_bounds = array<i64: 8, 128>}]} {
    %c0_i32 = arith.constant 0 : i32
    %0 = arith.cmpi eq, %arg1, %c0_i32 : i32
    %1 = arith.extui %0 : i1 to i32
    %c0_i32_0 = arith.constant 0 : i32
    %2 = arith.cmpi ne, %1, %c0_i32_0 : i32
    scf.if %2 {
      %cst_6 = arith.constant 0.000000e+00 : f32
      %9 = vector.broadcast %cst_6 : f32 to vector<8x128xf32>
      %c0_7 = arith.constant 0 : index
      %c0_8 = arith.constant 0 : index
      %10 = vector.load %arg3[%c0_7, %c0_8] : memref<8x128xf32, #tpu.memory_space<vmem>>, vector<8x128xf32>
      tpu.vector_store %arg3[%c0_7, %c0_8], %9 {strides = array<i32>} : memref<8x128xf32, #tpu.memory_space<vmem>>, vector<8x128xf32>,
    } else {
    }
    %c0 = arith.constant 0 : index
    %c0_1 = arith.constant 0 : index
    %3 = vector.load %arg2[%c0, %c0_1] : memref<8192x128xf32, #tpu.memory_space<vmem>>, vector<8192x128xf32>
    %c0_2 = arith.constant 0 : index
    %c0_3 = arith.constant 0 : index
    %4 = vector.load %arg3[%c0_2, %c0_3] : memref<8x128xf32, #tpu.memory_space<vmem>>, vector<8x128xf32>
    %5 = vector.shape_cast %3 : vector<8192x128xf32> to vector<1024x8x128xf32>
    %cst = arith.constant dense<0.000000e+00> : vector<8x128xf32>
    %6 = vector.multi_reduction <add>, %5, %cst [0] : vector<1024x8x128xf32> to vector<8x128xf32>
    %7 = arith.addf %4, %6 : vector<8x128xf32>
    %c0_4 = arith.constant 0 : index
    %c0_5 = arith.constant 0 : index
    %8 = vector.load %arg3[%c0_4, %c0_5] : memref<8x128xf32, #tpu.memory_space<vmem>>, vector<8x128xf32>
    tpu.vector_store %arg3[%c0_4, %c0_5], %7 {strides = array<i32>} : memref<8x128xf32, #tpu.memory_space<vmem>>, vector<8x128xf32>,
    return
  }
  func.func @transform_0(%arg0: i32, %arg1: i32) -> (i32, i32) {
    %c1_i32 = arith.constant 1 : i32
    %0 = arith.muli %arg0, %c1_i32 : i32
    %1 = arith.addi %0, %arg1 : i32
    %c0_i32 = arith.constant 0 : i32
    %c0_i32_0 = arith.constant 0 : i32
    return %1, %c0_i32 : i32, i32
  }
  func.func @transform_1(%arg0: i32, %arg1: i32) -> (i32, i32) {
    %c0_i32 = arith.constant 0 : i32
    %c0_i32_0 = arith.constant 0 : i32
    return %arg0, %c0_i32 : i32, i32
  }
}

</mosaic_0001>

<bundles_post_ra>
// kernel: tpu_custom_call.1
= control target key start
LH: loop header
LB: loop body
LE: loop exit
PB: predicated region body
PF: predicated region fallthrough
CT: control target
= control target key end

     0   :  { %6 = vsyncpa [#allocation3], 0  ;;  %s3657_s0 = inlined_call_operand.hbm [shape: f32[16384,128], index: 0, kind: input, shape index: {}]   ;;  %s3658_s1 = inlined_call_operand.hbm [shape: f32[16,128], index: 1, kind: output, shape index: {}]  }
   0x1   :  { %8 = vsyncpa [#allocation3 + $0x1], 0 }
   0x2   :  { %9 = vsyncpa [#allocation4], 0 }
   0x3   :  { %11 = vsyncpa [#allocation4 + $0x1], 0  ;;  %s2510_s6 = smov 0   ;;  %s2512_s7 = smov 0  }
   0x4   :  { %s2514_s8 = smov 0   ;;  %s2516_s9 = smov 0  }
   0x5   :  { %s2518_s10 = smov 0   ;;  %s2520_s11 = smov 0  }
   0x6 LB: > { %s2304_s12 = sadd.s32 4294967295, %s2496_s11   ;;  %s2305_s13 = sadd.s32 4294967294, %s2496_s11   ;;  %s2496_s11 = sphi %s2520_s11, %s17_s11   ;;  %s2492_s10 = sphi %s2518_s10, %s3667_s10   ;;  %s2488_s9 = sphi %s2516_s9, %s3666_s9   ;;  %s2484_s8 = sphi %s2514_s8, %s3665_s8   ;;  %s2480_s7 = sphi %s2512_s7, %s3664_s7   ;;  %s2476_s6 = sphi %s2510_s6, %s3663_s6  }
   0x7   : > { %s29_s14 = sadd.s32 1, %s2492_s10  ;;  %s38_s15 = sadd.s32 1, %s2484_s8 }
   0x8   : > { %p31_p0 = scmp.ge.s32.totalorder %s29_s14, 2  ;;  %p45_p1 = scmp.ne.s32.totalorder %s2484_s8, %s2480_s7 }
   0x9   : > { %p46_p2 = scmp.eq.s32.totalorder %s2496_s11, 0  ;;  %p51_p3 = scmp.ne.s32.totalorder %s2480_s7, %s2476_s6 }
   0xa   : > { %s3669_s14 = smov (%p31_p0, %s29_s14), 0  ;;  %p52_p5 = scmp.eq.s32.totalorder %s2304_s12, 0 }
   0xb   : > { %p2551_p4 = por %p46_p2, %p45_p1  ;;  %s35_s17 = ssub.s32 %s2492_s10, %s3669_s14 }
   0xc   : > { %p75_p6 = scmp.eq.s32.totalorder %s2304_s12, 1  ;;  %p36_p7 = scmp.eq.s32.totalorder %s35_s17, 0 }
   0xd   : > { %p2557_p8 = por %p52_p5, %p51_p3  ;;  %p81_p10 = scmp.eq.s32.totalorder %s2305_s13, 1 }
   0xe   : > { %p2561_p9 = por %p75_p6, %p45_p1  ;;  %p2307_p12 = scmp.ge.s32.totalorder %s2496_s11, 2 }
   0xf   : > { %s2566_s20 = scalar_select %p36_p7, %s2484_s8, %s38_s15  }
  0x10   : > { %p2568_p11 = por %p81_p10, %p51_p3  ;;  %p2331_p13 = scmp.lt.s32.totalorder %s2496_s11, 2 }
  0x11   : > { %s101_s22 = sand.u32 1, %s2484_s8   ;;  %s2318_s24 = sshll.u32 %s2492_s10, 13 }
  0x12   : > { %s2308_s23 = sshll.u32 %s101_s22, 13  ;;  %s111_s27 = scalar_lea.hbm %s3657_s0, %s2318_s24 }
  0x13   : > { %s105_s28 = scalar_lea.vmem [#allocation2], %s2308_s23  ;;  %s112_s30 = sshll.u32 %s111_s27, 4  ;;  %s113_s30 = int_to_ptr.hbm [resolvable:$true] %s112_s30 }
  0x14   : > { %s114_s29 = sshll.u32 %s105_s28, 4  ;;  %p2324_p0 = pnand %p2331_p13, %p2551_p4  ;;  %s115_s29 = int_to_ptr.vmem [resolvable:$true] %s114_s29 }
  0x15   : > { %p2311_p1 = scmp.ge.s32.totalorder %s2496_s11, 1  ;;  %s102_s2 = scalar_lea.sflag [#allocation3], %s101_s22 }
  0x16   : > { %s2498_s3 = smov 128   ;;  %s2499_s4 = smov 8  }
  0x17   : > { %2326 = dma.hbm_to_vmem [thread:$0]  (!%p2324_p0), %s113_s30, 131072, %s115_s29, %s102_s2, %s2498_s3, %s2498_s3, %s2499_s4  }
  0x18   : > { %p122_p2 = scmp.lt.s32.totalorder %s2496_s11, 3 }
  0x1a   : > { %p123_p3 = pnand %p2311_p1, %p122_p2 }
  0x1b   : > { %s2584_s5 = sand.u32 (!%p123_p3), 1, %s2480_s7  }
  0x1c   : > { %126 = sbr.rel (%p123_p3) target bundleno = 2084 (0x824), region = 24  ;;  %s2312_s12 = sshll.u32 (!%p123_p3), %s2584_s5, 13 }
  0x1d   : > { %s129_s13 = scalar_lea.sflag (!%p123_p3), [#allocation3], %s2584_s5  ;;  %s2588_s15 = scalar_lea.vmem (!%p123_p3), [#allocation2], %s2312_s12 }
  0x21   : > { %2467 = dma.done.wait (%p2557_p8), %s129_s13, 131072  }
  0x22   : > { %2469 = vsyncadd (%p2557_p8), %s129_s13, 4294836224  ;;  %v159_v0 = vld [vmem:[%s2588_s15] sm:$0xff]  ;;  %v160_v1 = vld [vmem:[%s2588_s15 + $0x8] sm:$0xff]  ;;  %s2313_s16 = sshll.u32 %s2584_s5, 3  ;;  %s2315_s17 = sshll.u32 %s2488_s9, 3 }
  0x23   : > { %v161_v2 = vld [vmem:[%s2588_s15 + $0x10] sm:$0xff]  ;;  %v1184_v3 = vadd.f32 %v160_v1, %v159_v0  ;;  %v162_v4 = vld [vmem:[%s2588_s15 + $0x18] sm:$0xff]  ;;  %v163_v6 = vld [vmem:[%s2588_s15 + $0x20] sm:$0xff]  ;;  %s2220_s23 = scalar_lea.hbm %s3658_s1, %s2315_s17  ;;  %s151_s24 = scalar_lea.vmem [#allocation5], %s2313_s16 }
  0x24   : > { %v164_v8 = vld [vmem:[%s2588_s15 + $0x28] sm:$0xff]  ;;  %v165_v10 = vld [vmem:[%s2588_s15 + $0x30] sm:$0xff]  ;;  %v166_v12 = vld [vmem:[%s2588_s15 + $0x38] sm:$0xff]  ;;  %s2222_s25 = sshll.u32 %s151_s24, 4  ;;  %s2224_s26 = sshll.u32 %s2220_s23, 4  ;;  %s2223_s25 = int_to_ptr.vmem [resolvable:$true] %s2222_s25  ;;  %s2225_s26 = int_to_ptr.hbm [resolvable:$true] %s2224_s26 }
  0x25   : > { %v1185_v5 = vadd.f32 %v1184_v3, %v161_v2  ;;  %v167_v14 = vld [vmem:[%s2588_s15 + $0x40] sm:$0xff]  ;;  %v168_v16 = vld [vmem:[%s2588_s15 + $0x48] sm:$0xff]  ;;  %v169_v18 = vld [vmem:[%s2588_s15 + $0x50] sm:$0xff]  ;;  %s2210_s27 = scalar_lea.sflag [#allocation4], %s2584_s5  ;;  %s2428_s28 = sshra.s32 %s2225_s26, 4  ;;  %s2429_s28 = int_to_ptr.hbm [resolvable:$true] %s2428_s28 }
  0x26   : > { %v170_v20 = vld [vmem:[%s2588_s15 + $0x58] sm:$0xff]  ;;  %v171_v22 = vld [vmem:[%s2588_s15 + $0x60] sm:$0xff]  ;;  %v172_v24 = vld [vmem:[%s2588_s15 + $0x68] sm:$0xff]  ;;  %s2430_s9 = scalar_lea.hbm %s2429_s28, 8  ;;  %s2434_s2 = scalar_lea.hbm %s3658_s1, 16 }
  0x27   : > { %v1186_v7 = vadd.f32 %v1185_v5, %v162_v4  ;;  %v173_v26 = vld [vmem:[%s2588_s15 + $0x70] sm:$0xff]  ;;  %v174_v28 = vld [vmem:[%s2588_s15 + $0x78] sm:$0xff]  ;;  %v175_v30 = vld [vmem:[%s2588_s15 + $0x80] sm:$0xff]  ;;  %p2431_p4 = scmp.ne.s32.totalorder %s2429_s28, %s2430_s9  ;;  %p2435_p7 = scmp.lt.s32.totalorder %s2429_s28, %s3658_s1 }
  0x28   : > { %v176_v32 = vld [vmem:[%s2588_s15 + $0x88] sm:$0xff]  ;;  %v177_v34 = vld [vmem:[%s2588_s15 + $0x90] sm:$0xff]  ;;  %v178_v36 = vld [vmem:[%s2588_s15 + $0x98] sm:$0xff]  ;;  %p2436_p8 = scmp.lt.s32.totalorder %s2434_s2, %s2430_s9 }
  0x29   : > { %v1187_v9 = vadd.f32 %v1186_v7, %v163_v6  ;;  %v179_v38 = vld [vmem:[%s2588_s15 + $0xa0] sm:$0xff]  ;;  %v180_v40 = vld [vmem:[%s2588_s15 + $0xa8] sm:$0xff]  ;;  %v181_v42 = vld [vmem:[%s2588_s15 + $0xb0] sm:$0xff]  ;;  %p2432_p5 = pnand %p2431_p4, %p2561_p9 }
  0x2a   : > { %v182_v44 = vld [vmem:[%s2588_s15 + $0xb8] sm:$0xff]  ;;  %v183_v46 = vld [vmem:[%s2588_s15 + $0xc0] sm:$0xff]  ;;  %v184_v48 = vld [vmem:[%s2588_s15 + $0xc8] sm:$0xff]  ;;  %p2437_p10 = por %p2436_p8, %p2435_p7 }
  0x2b   : > { %v1188_v11 = vadd.f32 %v1187_v9, %v164_v8  ;;  %v185_v50 = vld [vmem:[%s2588_s15 + $0xd0] sm:$0xff]  ;;  %v186_v52 = vld [vmem:[%s2588_s15 + $0xd8] sm:$0xff]  ;;  %v187_v54 = vld [vmem:[%s2588_s15 + $0xe0] sm:$0xff]  ;;  %p2433_p6 = pneg %p2432_p5 }
  0x2c   : > { %v188_v56 = vld [vmem:[%s2588_s15 + $0xe8] sm:$0xff]  ;;  %v189_v58 = vld [vmem:[%s2588_s15 + $0xf0] sm:$0xff]  ;;  %v190_v60 = vld [vmem:[%s2588_s15 + $0xf8] sm:$0xff] }
  0x2d   : > { %v1189_v13 = vadd.f32 %v1188_v11, %v165_v10  ;;  %v191_v62 = vld [vmem:[%s2588_s15 + $0x100] sm:$0xff]  ;;  %v192_v0 = vld [vmem:[%s2588_s15 + $0x108] sm:$0xff]  ;;  %v193_v2 = vld [vmem:[%s2588_s15 + $0x110] sm:$0xff]  ;;  %p2438_p13 = pnand %p2437_p10, %p2433_p6 }
  0x2e   : > { %v194_v4 = vld [vmem:[%s2588_s15 + $0x118] sm:$0xff]  ;;  %v195_v6 = vld [vmem:[%s2588_s15 + $0x120] sm:$0xff]  ;;  %v196_v8 = vld [vmem:[%s2588_s15 + $0x128] sm:$0xff] }
  0x2f   : > { %v1190_v15 = vadd.f32 %v1189_v13, %v166_v12  ;;  %v197_v10 = vld [vmem:[%s2588_s15 + $0x130] sm:$0xff]  ;;  %v198_v12 = vld [vmem:[%s2588_s15 + $0x138] sm:$0xff] }
  0x31   : > { %v1191_v17 = vadd.f32 %v1190_v15, %v167_v14  ;;  %v199_v14 = vld [vmem:[%s2588_s15 + $0x140] sm:$0xff] }
  0x33   : > { %v1192_v19 = vadd.f32 %v1191_v17, %v168_v16  ;;  %v200_v16 = vld [vmem:[%s2588_s15 + $0x148] sm:$0xff] }
  0x35   : > { %v1193_v21 = vadd.f32 %v1192_v19, %v169_v18  ;;  %v201_v18 = vld [vmem:[%s2588_s15 + $0x150] sm:$0xff] }
  0x37   : > { %v1194_v23 = vadd.f32 %v1193_v21, %v170_v20  ;;  %v202_v20 = vld [vmem:[%s2588_s15 + $0x158] sm:$0xff] }
  0x39   : > { %v1195_v25 = vadd.f32 %v1194_v23, %v171_v22  ;;  %v203_v22 = vld [vmem:[%s2588_s15 + $0x160] sm:$0xff] }
  0x3b   : > { %v1196_v27 = vadd.f32 %v1195_v25, %v172_v24  ;;  %v204_v24 = vld [vmem:[%s2588_s15 + $0x168] sm:$0xff] }
  0x3d   : > { %v1197_v29 = vadd.f32 %v1196_v27, %v173_v26  ;;  %v205_v26 = vld [vmem:[%s2588_s15 + $0x170] sm:$0xff] }
  0x3f   : > { %v1198_v31 = vadd.f32 %v1197_v29, %v174_v28  ;;  %v206_v28 = vld [vmem:[%s2588_s15 + $0x178] sm:$0xff] }
  0x41   : > { %v1199_v33 = vadd.f32 %v1198_v31, %v175_v30  ;;  %v207_v30 = vld [vmem:[%s2588_s15 + $0x180] sm:$0xff] }
  0x43   : > { %v1200_v35 = vadd.f32 %v1199_v33, %v176_v32  ;;  %v208_v32 = vld [vmem:[%s2588_s15 + $0x188] sm:$0xff] }
  0x45   : > { %v1201_v37 = vadd.f32 %v1200_v35, %v177_v34  ;;  %v209_v34 = vld [vmem:[%s2588_s15 + $0x190] sm:$0xff] }
  0x47   : > { %v1202_v39 = vadd.f32 %v1201_v37, %v178_v36  ;;  %v210_v36 = vld [vmem:[%s2588_s15 + $0x198] sm:$0xff] }
  0x49   : > { %v1203_v41 = vadd.f32 %v1202_v39, %v179_v38  ;;  %v211_v38 = vld [vmem:[%s2588_s15 + $0x1a0] sm:$0xff] }
  0x4b   : > { %v1204_v43 = vadd.f32 %v1203_v41, %v180_v40  ;;  %v212_v40 = vld [vmem:[%s2588_s15 + $0x1a8] sm:$0xff] }
  0x4d   : > { %v1205_v45 = vadd.f32 %v1204_v43, %v181_v42  ;;  %v213_v42 = vld [vmem:[%s2588_s15 + $0x1b0] sm:$0xff] }
  0x4f   : > { %v1206_v47 = vadd.f32 %v1205_v45, %v182_v44  ;;  %v214_v44 = vld [vmem:[%s2588_s15 + $0x1b8] sm:$0xff] }
  0x51   : > { %v1207_v49 = vadd.f32 %v1206_v47, %v183_v46  ;;  %v215_v46 = vld [vmem:[%s2588_s15 + $0x1c0] sm:$0xff] }
  0x53   : > { %v1208_v51 = vadd.f32 %v1207_v49, %v184_v48  ;;  %v216_v48 = vld [vmem:[%s2588_s15 + $0x1c8] sm:$0xff] }
  0x55   : > { %v1209_v53 = vadd.f32 %v1208_v51, %v185_v50  ;;  %v217_v50 = vld [vmem:[%s2588_s15 + $0x1d0] sm:$0xff] }
  0x57   : > { %v1210_v55 = vadd.f32 %v1209_v53, %v186_v52  ;;  %v218_v52 = vld [vmem:[%s2588_s15 + $0x1d8] sm:$0xff] }
  0x59   : > { %v1211_v57 = vadd.f32 %v1210_v55, %v187_v54  ;;  %v219_v54 = vld [vmem:[%s2588_s15 + $0x1e0] sm:$0xff] }
  0x5b   : > { %v1212_v59 = vadd.f32 %v1211_v57, %v188_v56  ;;  %v220_v56 = vld [vmem:[%s2588_s15 + $0x1e8] sm:$0xff] }
  0x5d   : > { %v1213_v61 = vadd.f32 %v1212_v59, %v189_v58  ;;  %v221_v58 = vld [vmem:[%s2588_s15 + $0x1f0] sm:$0xff] }
  0x5f   : > { %v1214_v63 = vadd.f32 %v1213_v61, %v190_v60  ;;  %v222_v60 = vld [vmem:[%s2588_s15 + $0x1f8] sm:$0xff] }
  0x61   : > { %v1215_v1 = vadd.f32 %v1214_v63, %v191_v62  ;;  %v223_v62 = vld [vmem:[%s2588_s15 + $0x200] sm:$0xff] }
  0x63   : > { %v1216_v3 = vadd.f32 %v1215_v1, %v192_v0  ;;  %v224_v0 = vld [vmem:[%s2588_s15 + $0x208] sm:$0xff] }
  0x65   : > { %v1217_v5 = vadd.f32 %v1216_v3, %v193_v2  ;;  %v225_v2 = vld [vmem:[%s2588_s15 + $0x210] sm:$0xff] }
  0x67   : > { %v1218_v7 = vadd.f32 %v1217_v5, %v194_v4  ;;  %v226_v4 = vld [vmem:[%s2588_s15 + $0x218] sm:$0xff] }
  0x69   : > { %v1219_v9 = vadd.f32 %v1218_v7, %v195_v6  ;;  %v227_v6 = vld [vmem:[%s2588_s15 + $0x220] sm:$0xff] }
  0x6b   : > { %v1220_v11 = vadd.f32 %v1219_v9, %v196_v8  ;;  %v228_v8 = vld [vmem:[%s2588_s15 + $0x228] sm:$0xff] }
  0x6d   : > { %v1221_v13 = vadd.f32 %v1220_v11, %v197_v10  ;;  %v229_v10 = vld [vmem:[%s2588_s15 + $0x230] sm:$0xff] }
  0x6f   : > { %v1222_v15 = vadd.f32 %v1221_v13, %v198_v12  ;;  %v230_v12 = vld [vmem:[%s2588_s15 + $0x238] sm:$0xff] }
  0x71   : > { %v1223_v17 = vadd.f32 %v1222_v15, %v199_v14  ;;  %v231_v14 = vld [vmem:[%s2588_s15 + $0x240] sm:$0xff] }
  0x73   : > { %v1224_v19 = vadd.f32 %v1223_v17, %v200_v16  ;;  %v232_v16 = vld [vmem:[%s2588_s15 + $0x248] sm:$0xff] }
  0x75   : > { %v1225_v21 = vadd.f32 %v1224_v19, %v201_v18  ;;  %v233_v18 = vld [vmem:[%s2588_s15 + $0x250] sm:$0xff] }
  0x77   : > { %v1226_v23 = vadd.f32 %v1225_v21, %v202_v20  ;;  %v234_v20 = vld [vmem:[%s2588_s15 + $0x258] sm:$0xff] }
  0x79   : > { %v1227_v25 = vadd.f32 %v1226_v23, %v203_v22  ;;  %v235_v22 = vld [vmem:[%s2588_s15 + $0x260] sm:$0xff] }
  0x7b   : > { %v1228_v27 = vadd.f32 %v1227_v25, %v204_v24  ;;  %v236_v24 = vld [vmem:[%s2588_s15 + $0x268] sm:$0xff] }
  0x7d   : > { %v1229_v29 = vadd.f32 %v1228_v27, %v205_v26  ;;  %v237_v26 = vld [vmem:[%s2588_s15 + $0x270] sm:$0xff] }
  0x7f   : > { %v1230_v31 = vadd.f32 %v1229_v29, %v206_v28  ;;  %v238_v28 = vld [vmem:[%s2588_s15 + $0x278] sm:$0xff] }
  0x81   : > { %v1231_v33 = vadd.f32 %v1230_v31, %v207_v30  ;;  %v239_v30 = vld [vmem:[%s2588_s15 + $0x280] sm:$0xff] }
  0x83   : > { %v1232_v35 = vadd.f32 %v1231_v33, %v208_v32  ;;  %v240_v32 = vld [vmem:[%s2588_s15 + $0x288] sm:$0xff] }
  0x85   : > { %v1233_v37 = vadd.f32 %v1232_v35, %v209_v34  ;;  %v241_v34 = vld [vmem:[%s2588_s15 + $0x290] sm:$0xff] }
  0x87   : > { %v1234_v39 = vadd.f32 %v1233_v37, %v210_v36  ;;  %v242_v36 = vld [vmem:[%s2588_s15 + $0x298] sm:$0xff] }
  0x89   : > { %v1235_v41 = vadd.f32 %v1234_v39, %v211_v38  ;;  %v243_v38 = vld [vmem:[%s2588_s15 + $0x2a0] sm:$0xff] }
  0x8b   : > { %v1236_v43 = vadd.f32 %v1235_v41, %v212_v40  ;;  %v244_v40 = vld [vmem:[%s2588_s15 + $0x2a8] sm:$0xff] }
  0x8d   : > { %v1237_v45 = vadd.f32 %v1236_v43, %v213_v42  ;;  %v245_v42 = vld [vmem:[%s2588_s15 + $0x2b0] sm:$0xff] }
  0x8f   : > { %v1238_v47 = vadd.f32 %v1237_v45, %v214_v44  ;;  %v246_v44 = vld [vmem:[%s2588_s15 + $0x2b8] sm:$0xff] }
  0x91   : > { %v1239_v49 = vadd.f32 %v1238_v47, %v215_v46  ;;  %v247_v46 = vld [vmem:[%s2588_s15 + $0x2c0] sm:$0xff] }
  0x93   : > { %v1240_v51 = vadd.f32 %v1239_v49, %v216_v48  ;;  %v248_v48 = vld [vmem:[%s2588_s15 + $0x2c8] sm:$0xff] }
  0x95   : > { %v1241_v53 = vadd.f32 %v1240_v51, %v217_v50  ;;  %v249_v50 = vld [vmem:[%s2588_s15 + $0x2d0] sm:$0xff] }
  0x97   : > { %v1242_v55 = vadd.f32 %v1241_v53, %v218_v52  ;;  %v250_v52 = vld [vmem:[%s2588_s15 + $0x2d8] sm:$0xff] }
  0x99   : > { %v1243_v57 = vadd.f32 %v1242_v55, %v219_v54  ;;  %v251_v54 = vld [vmem:[%s2588_s15 + $0x2e0] sm:$0xff] }
  0x9b   : > { %v1244_v59 = vadd.f32 %v1243_v57, %v220_v56  ;;  %v252_v56 = vld [vmem:[%s2588_s15 + $0x2e8] sm:$0xff] }
  0x9d   : > { %v1245_v61 = vadd.f32 %v1244_v59, %v221_v58  ;;  %v253_v58 = vld [vmem:[%s2588_s15 + $0x2f0] sm:$0xff] }
  0x9f   : > { %v1246_v63 = vadd.f32 %v1245_v61, %v222_v60  ;;  %v254_v60 = vld [vmem:[%s2588_s15 + $0x2f8] sm:$0xff] }
  0xa1   : > { %v1247_v1 = vadd.f32 %v1246_v63, %v223_v62  ;;  %v255_v62 = vld [vmem:[%s2588_s15 + $0x300] sm:$0xff] }
  0xa3   : > { %v1248_v3 = vadd.f32 %v1247_v1, %v224_v0  ;;  %v256_v0 = vld [vmem:[%s2588_s15 + $0x308] sm:$0xff] }
  0xa5   : > { %v1249_v5 = vadd.f32 %v1248_v3, %v225_v2  ;;  %v257_v2 = vld [vmem:[%s2588_s15 + $0x310] sm:$0xff] }
  0xa7   : > { %v1250_v7 = vadd.f32 %v1249_v5, %v226_v4  ;;  %v258_v4 = vld [vmem:[%s2588_s15 + $0x318] sm:$0xff] }
  0xa9   : > { %v1251_v9 = vadd.f32 %v1250_v7, %v227_v6  ;;  %v259_v6 = vld [vmem:[%s2588_s15 + $0x320] sm:$0xff] }
  0xab   : > { %v1252_v11 = vadd.f32 %v1251_v9, %v228_v8  ;;  %v260_v8 = vld [vmem:[%s2588_s15 + $0x328] sm:$0xff] }
  0xad   : > { %v1253_v13 = vadd.f32 %v1252_v11, %v229_v10  ;;  %v261_v10 = vld [vmem:[%s2588_s15 + $0x330] sm:$0xff] }
  0xaf   : > { %v1254_v15 = vadd.f32 %v1253_v13, %v230_v12  ;;  %v262_v12 = vld [vmem:[%s2588_s15 + $0x338] sm:$0xff] }
  0xb1   : > { %v1255_v17 = vadd.f32 %v1254_v15, %v231_v14  ;;  %v263_v14 = vld [vmem:[%s2588_s15 + $0x340] sm:$0xff] }
  0xb3   : > { %v1256_v19 = vadd.f32 %v1255_v17, %v232_v16  ;;  %v264_v16 = vld [vmem:[%s2588_s15 + $0x348] sm:$0xff] }
  0xb5   : > { %v1257_v21 = vadd.f32 %v1256_v19, %v233_v18  ;;  %v265_v18 = vld [vmem:[%s2588_s15 + $0x350] sm:$0xff] }
  0xb7   : > { %v1258_v23 = vadd.f32 %v1257_v21, %v234_v20  ;;  %v266_v20 = vld [vmem:[%s2588_s15 + $0x358] sm:$0xff] }
  0xb9   : > { %v1259_v25 = vadd.f32 %v1258_v23, %v235_v22  ;;  %v267_v22 = vld [vmem:[%s2588_s15 + $0x360] sm:$0xff] }
  0xbb   : > { %v1260_v27 = vadd.f32 %v1259_v25, %v236_v24  ;;  %v268_v24 = vld [vmem:[%s2588_s15 + $0x368] sm:$0xff] }
  0xbd   : > { %v1261_v29 = vadd.f32 %v1260_v27, %v237_v26  ;;  %v269_v26 = vld [vmem:[%s2588_s15 + $0x370] sm:$0xff] }
  0xbf   : > { %v1262_v31 = vadd.f32 %v1261_v29, %v238_v28  ;;  %v270_v28 = vld [vmem:[%s2588_s15 + $0x378] sm:$0xff] }
  0xc1   : > { %v1263_v33 = vadd.f32 %v1262_v31, %v239_v30  ;;  %v271_v30 = vld [vmem:[%s2588_s15 + $0x380] sm:$0xff] }
  0xc3   : > { %v1264_v35 = vadd.f32 %v1263_v33, %v240_v32  ;;  %v272_v32 = vld [vmem:[%s2588_s15 + $0x388] sm:$0xff] }
  0xc5   : > { %v1265_v37 = vadd.f32 %v1264_v35, %v241_v34  ;;  %v273_v34 = vld [vmem:[%s2588_s15 + $0x390] sm:$0xff] }
  0xc7   : > { %v1266_v39 = vadd.f32 %v1265_v37, %v242_v36  ;;  %v274_v36 = vld [vmem:[%s2588_s15 + $0x398] sm:$0xff] }
  0xc9   : > { %v1267_v41 = vadd.f32 %v1266_v39, %v243_v38  ;;  %v275_v38 = vld [vmem:[%s2588_s15 + $0x3a0] sm:$0xff] }
  0xcb   : > { %v1268_v43 = vadd.f32 %v1267_v41, %v244_v40  ;;  %v276_v40 = vld [vmem:[%s2588_s15 + $0x3a8] sm:$0xff] }
  0xcd   : > { %v1269_v45 = vadd.f32 %v1268_v43, %v245_v42  ;;  %v277_v42 = vld [vmem:[%s2588_s15 + $0x3b0] sm:$0xff] }
  0xcf   : > { %v1270_v47 = vadd.f32 %v1269_v45, %v246_v44  ;;  %v278_v44 = vld [vmem:[%s2588_s15 + $0x3b8] sm:$0xff] }
  0xd1   : > { %v1271_v49 = vadd.f32 %v1270_v47, %v247_v46  ;;  %v279_v46 = vld [vmem:[%s2588_s15 + $0x3c0] sm:$0xff] }
  0xd3   : > { %v1272_v51 = vadd.f32 %v1271_v49, %v248_v48  ;;  %v280_v48 = vld [vmem:[%s2588_s15 + $0x3c8] sm:$0xff] }
  0xd5   : > { %v1273_v53 = vadd.f32 %v1272_v51, %v249_v50  ;;  %v281_v50 = vld [vmem:[%s2588_s15 + $0x3d0] sm:$0xff] }
  0xd7   : > { %v1274_v55 = vadd.f32 %v1273_v53, %v250_v52  ;;  %v282_v52 = vld [vmem:[%s2588_s15 + $0x3d8] sm:$0xff] }
  0xd9   : > { %v1275_v57 = vadd.f32 %v1274_v55, %v251_v54  ;;  %v283_v54 = vld [vmem:[%s2588_s15 + $0x3e0] sm:$0xff] }
  0xdb   : > { %v1276_v59 = vadd.f32 %v1275_v57, %v252_v56  ;;  %v284_v56 = vld [vmem:[%s2588_s15 + $0x3e8] sm:$0xff] }
  0xdd   : > { %v1277_v61 = vadd.f32 %v1276_v59, %v253_v58  ;;  %v285_v58 = vld [vmem:[%s2588_s15 + $0x3f0] sm:$0xff] }
  0xdf   : > { %v1278_v63 = vadd.f32 %v1277_v61, %v254_v60  ;;  %v286_v60 = vld [vmem:[%s2588_s15 + $0x3f8] sm:$0xff] }
  0xe1   : > { %v1279_v1 = vadd.f32 %v1278_v63, %v255_v62  ;;  %v287_v62 = vld [vmem:[%s2588_s15 + $0x400] sm:$0xff] }
  0xe3   : > { %v1280_v3 = vadd.f32 %v1279_v1, %v256_v0  ;;  %v288_v0 = vld [vmem:[%s2588_s15 + $0x408] sm:$0xff] }
  0xe5   : > { %v1281_v5 = vadd.f32 %v1280_v3, %v257_v2  ;;  %v289_v2 = vld [vmem:[%s2588_s15 + $0x410] sm:$0xff] }
  0xe7   : > { %v1282_v7 = vadd.f32 %v1281_v5, %v258_v4  ;;  %v290_v4 = vld [vmem:[%s2588_s15 + $0x418] sm:$0xff] }
  0xe9   : > { %v1283_v9 = vadd.f32 %v1282_v7, %v259_v6  ;;  %v291_v6 = vld [vmem:[%s2588_s15 + $0x420] sm:$0xff] }
  0xeb   : > { %v1284_v11 = vadd.f32 %v1283_v9, %v260_v8  ;;  %v292_v8 = vld [vmem:[%s2588_s15 + $0x428] sm:$0xff] }
  0xed   : > { %v1285_v13 = vadd.f32 %v1284_v11, %v261_v10  ;;  %v293_v10 = vld [vmem:[%s2588_s15 + $0x430] sm:$0xff] }
  0xef   : > { %v1286_v15 = vadd.f32 %v1285_v13, %v262_v12  ;;  %v294_v12 = vld [vmem:[%s2588_s15 + $0x438] sm:$0xff] }
  0xf1   : > { %v1287_v17 = vadd.f32 %v1286_v15, %v263_v14  ;;  %v295_v14 = vld [vmem:[%s2588_s15 + $0x440] sm:$0xff] }
  0xf3   : > { %v1288_v19 = vadd.f32 %v1287_v17, %v264_v16  ;;  %v296_v16 = vld [vmem:[%s2588_s15 + $0x448] sm:$0xff] }
  0xf5   : > { %v1289_v21 = vadd.f32 %v1288_v19, %v265_v18  ;;  %v297_v18 = vld [vmem:[%s2588_s15 + $0x450] sm:$0xff] }
  0xf7   : > { %v1290_v23 = vadd.f32 %v1289_v21, %v266_v20  ;;  %v298_v20 = vld [vmem:[%s2588_s15 + $0x458] sm:$0xff] }
  0xf9   : > { %v1291_v25 = vadd.f32 %v1290_v23, %v267_v22  ;;  %v299_v22 = vld [vmem:[%s2588_s15 + $0x460] sm:$0xff] }
  0xfb   : > { %v1292_v27 = vadd.f32 %v1291_v25, %v268_v24  ;;  %v300_v24 = vld [vmem:[%s2588_s15 + $0x468] sm:$0xff] }
  0xfd   : > { %v1293_v29 = vadd.f32 %v1292_v27, %v269_v26  ;;  %v301_v26 = vld [vmem:[%s2588_s15 + $0x470] sm:$0xff] }
  0xff   : > { %v1294_v31 = vadd.f32 %v1293_v29, %v270_v28  ;;  %v302_v28 = vld [vmem:[%s2588_s15 + $0x478] sm:$0xff] }
 0x101   : > { %v1295_v33 = vadd.f32 %v1294_v31, %v271_v30  ;;  %v303_v30 = vld [vmem:[%s2588_s15 + $0x480] sm:$0xff] }
 0x103   : > { %v1296_v35 = vadd.f32 %v1295_v33, %v272_v32  ;;  %v304_v32 = vld [vmem:[%s2588_s15 + $0x488] sm:$0xff] }
 0x105   : > { %v1297_v37 = vadd.f32 %v1296_v35, %v273_v34  ;;  %v305_v34 = vld [vmem:[%s2588_s15 + $0x490] sm:$0xff] }
 0x107   : > { %v1298_v39 = vadd.f32 %v1297_v37, %v274_v36  ;;  %v306_v36 = vld [vmem:[%s2588_s15 + $0x498] sm:$0xff] }
 0x109   : > { %v1299_v41 = vadd.f32 %v1298_v39, %v275_v38  ;;  %v307_v38 = vld [vmem:[%s2588_s15 + $0x4a0] sm:$0xff] }
 0x10b   : > { %v1300_v43 = vadd.f32 %v1299_v41, %v276_v40  ;;  %v308_v40 = vld [vmem:[%s2588_s15 + $0x4a8] sm:$0xff] }
 0x10d   : > { %v1301_v45 = vadd.f32 %v1300_v43, %v277_v42  ;;  %v309_v42 = vld [vmem:[%s2588_s15 + $0x4b0] sm:$0xff] }
 0x10f   : > { %v1302_v47 = vadd.f32 %v1301_v45, %v278_v44  ;;  %v310_v44 = vld [vmem:[%s2588_s15 + $0x4b8] sm:$0xff] }
 0x111   : > { %v1303_v49 = vadd.f32 %v1302_v47, %v279_v46  ;;  %v311_v46 = vld [vmem:[%s2588_s15 + $0x4c0] sm:$0xff] }
 0x113   : > { %v1304_v51 = vadd.f32 %v1303_v49, %v280_v48  ;;  %v312_v48 = vld [vmem:[%s2588_s15 + $0x4c8] sm:$0xff] }
 0x115   : > { %v1305_v53 = vadd.f32 %v1304_v51, %v281_v50  ;;  %v313_v50 = vld [vmem:[%s2588_s15 + $0x4d0] sm:$0xff] }
 0x117   : > { %v1306_v55 = vadd.f32 %v1305_v53, %v282_v52  ;;  %v314_v52 = vld [vmem:[%s2588_s15 + $0x4d8] sm:$0xff] }
 0x119   : > { %v1307_v57 = vadd.f32 %v1306_v55, %v283_v54  ;;  %v315_v54 = vld [vmem:[%s2588_s15 + $0x4e0] sm:$0xff] }
 0x11b   : > { %v1308_v59 = vadd.f32 %v1307_v57, %v284_v56  ;;  %v316_v56 = vld [vmem:[%s2588_s15 + $0x4e8] sm:$0xff] }
 0x11d   : > { %v1309_v61 = vadd.f32 %v1308_v59, %v285_v58  ;;  %v317_v58 = vld [vmem:[%s2588_s15 + $0x4f0] sm:$0xff] }
 0x11f   : > { %v1310_v63 = vadd.f32 %v1309_v61, %v286_v60  ;;  %v318_v60 = vld [vmem:[%s2588_s15 + $0x4f8] sm:$0xff] }
 0x121   : > { %v1311_v1 = vadd.f32 %v1310_v63, %v287_v62  ;;  %v319_v62 = vld [vmem:[%s2588_s15 + $0x500] sm:$0xff] }
 0x123   : > { %v1312_v3 = vadd.f32 %v1311_v1, %v288_v0  ;;  %v320_v0 = vld [vmem:[%s2588_s15 + $0x508] sm:$0xff] }
 0x125   : > { %v1313_v5 = vadd.f32 %v1312_v3, %v289_v2  ;;  %v321_v2 = vld [vmem:[%s2588_s15 + $0x510] sm:$0xff] }
 0x127   : > { %v1314_v7 = vadd.f32 %v1313_v5, %v290_v4  ;;  %v322_v4 = vld [vmem:[%s2588_s15 + $0x518] sm:$0xff] }
 0x129   : > { %v1315_v9 = vadd.f32 %v1314_v7, %v291_v6  ;;  %v323_v6 = vld [vmem:[%s2588_s15 + $0x520] sm:$0xff] }
 0x12b   : > { %v1316_v11 = vadd.f32 %v1315_v9, %v292_v8  ;;  %v324_v8 = vld [vmem:[%s2588_s15 + $0x528] sm:$0xff] }
 0x12d   : > { %v1317_v13 = vadd.f32 %v1316_v11, %v293_v10  ;;  %v325_v10 = vld [vmem:[%s2588_s15 + $0x530] sm:$0xff] }
 0x12f   : > { %v1318_v15 = vadd.f32 %v1317_v13, %v294_v12  ;;  %v326_v12 = vld [vmem:[%s2588_s15 + $0x538] sm:$0xff] }
 0x131   : > { %v1319_v17 = vadd.f32 %v1318_v15, %v295_v14  ;;  %v327_v14 = vld [vmem:[%s2588_s15 + $0x540] sm:$0xff] }
 0x133   : > { %v1320_v19 = vadd.f32 %v1319_v17, %v296_v16  ;;  %v328_v16 = vld [vmem:[%s2588_s15 + $0x548] sm:$0xff] }
 0x135   : > { %v1321_v21 = vadd.f32 %v1320_v19, %v297_v18  ;;  %v329_v18 = vld [vmem:[%s2588_s15 + $0x550] sm:$0xff] }
 0x137   : > { %v1322_v23 = vadd.f32 %v1321_v21, %v298_v20  ;;  %v330_v20 = vld [vmem:[%s2588_s15 + $0x558] sm:$0xff] }
 0x139   : > { %v1323_v25 = vadd.f32 %v1322_v23, %v299_v22  ;;  %v331_v22 = vld [vmem:[%s2588_s15 + $0x560] sm:$0xff] }
 0x13b   : > { %v1324_v27 = vadd.f32 %v1323_v25, %v300_v24  ;;  %v332_v24 = vld [vmem:[%s2588_s15 + $0x568] sm:$0xff] }
 0x13d   : > { %v1325_v29 = vadd.f32 %v1324_v27, %v301_v26  ;;  %v333_v26 = vld [vmem:[%s2588_s15 + $0x570] sm:$0xff] }
 0x13f   : > { %v1326_v31 = vadd.f32 %v1325_v29, %v302_v28  ;;  %v334_v28 = vld [vmem:[%s2588_s15 + $0x578] sm:$0xff] }
 0x141   : > { %v1327_v33 = vadd.f32 %v1326_v31, %v303_v30  ;;  %v335_v30 = vld [vmem:[%s2588_s15 + $0x580] sm:$0xff] }
 0x143   : > { %v1328_v35 = vadd.f32 %v1327_v33, %v304_v32  ;;  %v336_v32 = vld [vmem:[%s2588_s15 + $0x588] sm:$0xff] }
 0x145   : > { %v1329_v37 = vadd.f32 %v1328_v35, %v305_v34  ;;  %v337_v34 = vld [vmem:[%s2588_s15 + $0x590] sm:$0xff] }
 0x147   : > { %v1330_v39 = vadd.f32 %v1329_v37, %v306_v36  ;;  %v338_v36 = vld [vmem:[%s2588_s15 + $0x598] sm:$0xff] }
 0x149   : > { %v1331_v41 = vadd.f32 %v1330_v39, %v307_v38  ;;  %v339_v38 = vld [vmem:[%s2588_s15 + $0x5a0] sm:$0xff] }
 0x14b   : > { %v1332_v43 = vadd.f32 %v1331_v41, %v308_v40  ;;  %v340_v40 = vld [vmem:[%s2588_s15 + $0x5a8] sm:$0xff] }
 0x14d   : > { %v1333_v45 = vadd.f32 %v1332_v43, %v309_v42  ;;  %v341_v42 = vld [vmem:[%s2588_s15 + $0x5b0] sm:$0xff] }
 0x14f   : > { %v1334_v47 = vadd.f32 %v1333_v45, %v310_v44  ;;  %v342_v44 = vld [vmem:[%s2588_s15 + $0x5b8] sm:$0xff] }
 0x151   : > { %v1335_v49 = vadd.f32 %v1334_v47, %v311_v46  ;;  %v343_v46 = vld [vmem:[%s2588_s15 + $0x5c0] sm:$0xff] }
 0x153   : > { %v1336_v51 = vadd.f32 %v1335_v49, %v312_v48  ;;  %v344_v48 = vld [vmem:[%s2588_s15 + $0x5c8] sm:$0xff] }
 0x155   : > { %v1337_v53 = vadd.f32 %v1336_v51, %v313_v50  ;;  %v345_v50 = vld [vmem:[%s2588_s15 + $0x5d0] sm:$0xff] }
 0x157   : > { %v1338_v55 = vadd.f32 %v1337_v53, %v314_v52  ;;  %v346_v52 = vld [vmem:[%s2588_s15 + $0x5d8] sm:$0xff] }
 0x159   : > { %v1339_v57 = vadd.f32 %v1338_v55, %v315_v54  ;;  %v347_v54 = vld [vmem:[%s2588_s15 + $0x5e0] sm:$0xff] }
 0x15b   : > { %v1340_v59 = vadd.f32 %v1339_v57, %v316_v56  ;;  %v348_v56 = vld [vmem:[%s2588_s15 + $0x5e8] sm:$0xff] }
 0x15d   : > { %v1341_v61 = vadd.f32 %v1340_v59, %v317_v58  ;;  %v349_v58 = vld [vmem:[%s2588_s15 + $0x5f0] sm:$0xff] }
 0x15f   : > { %v1342_v63 = vadd.f32 %v1341_v61, %v318_v60  ;;  %v350_v60 = vld [vmem:[%s2588_s15 + $0x5f8] sm:$0xff] }
 0x161   : > { %v1343_v1 = vadd.f32 %v1342_v63, %v319_v62  ;;  %v351_v62 = vld [vmem:[%s2588_s15 + $0x600] sm:$0xff] }
 0x163   : > { %v1344_v3 = vadd.f32 %v1343_v1, %v320_v0  ;;  %v352_v0 = vld [vmem:[%s2588_s15 + $0x608] sm:$0xff] }
 0x165   : > { %v1345_v5 = vadd.f32 %v1344_v3, %v321_v2  ;;  %v353_v2 = vld [vmem:[%s2588_s15 + $0x610] sm:$0xff] }
 0x167   : > { %v1346_v7 = vadd.f32 %v1345_v5, %v322_v4  ;;  %v354_v4 = vld [vmem:[%s2588_s15 + $0x618] sm:$0xff] }
 0x169   : > { %v1347_v9 = vadd.f32 %v1346_v7, %v323_v6  ;;  %v355_v6 = vld [vmem:[%s2588_s15 + $0x620] sm:$0xff] }
 0x16b   : > { %v1348_v11 = vadd.f32 %v1347_v9, %v324_v8  ;;  %v356_v8 = vld [vmem:[%s2588_s15 + $0x628] sm:$0xff] }
 0x16d   : > { %v1349_v13 = vadd.f32 %v1348_v11, %v325_v10  ;;  %v357_v10 = vld [vmem:[%s2588_s15 + $0x630] sm:$0xff] }
 0x16f   : > { %v1350_v15 = vadd.f32 %v1349_v13, %v326_v12  ;;  %v358_v12 = vld [vmem:[%s2588_s15 + $0x638] sm:$0xff] }
 0x171   : > { %v1351_v17 = vadd.f32 %v1350_v15, %v327_v14  ;;  %v359_v14 = vld [vmem:[%s2588_s15 + $0x640] sm:$0xff] }
 0x173   : > { %v1352_v19 = vadd.f32 %v1351_v17, %v328_v16  ;;  %v360_v16 = vld [vmem:[%s2588_s15 + $0x648] sm:$0xff] }
 0x175   : > { %v1353_v21 = vadd.f32 %v1352_v19, %v329_v18  ;;  %v361_v18 = vld [vmem:[%s2588_s15 + $0x650] sm:$0xff] }
 0x177   : > { %v1354_v23 = vadd.f32 %v1353_v21, %v330_v20  ;;  %v362_v20 = vld [vmem:[%s2588_s15 + $0x658] sm:$0xff] }
 0x179   : > { %v1355_v25 = vadd.f32 %v1354_v23, %v331_v22  ;;  %v363_v22 = vld [vmem:[%s2588_s15 + $0x660] sm:$0xff] }
 0x17b   : > { %v1356_v27 = vadd.f32 %v1355_v25, %v332_v24  ;;  %v364_v24 = vld [vmem:[%s2588_s15 + $0x668] sm:$0xff] }
 0x17d   : > { %v1357_v29 = vadd.f32 %v1356_v27, %v333_v26  ;;  %v365_v26 = vld [vmem:[%s2588_s15 + $0x670] sm:$0xff] }
 0x17f   : > { %v1358_v31 = vadd.f32 %v1357_v29, %v334_v28  ;;  %v366_v28 = vld [vmem:[%s2588_s15 + $0x678] sm:$0xff] }
 0x181   : > { %v1359_v33 = vadd.f32 %v1358_v31, %v335_v30  ;;  %v367_v30 = vld [vmem:[%s2588_s15 + $0x680] sm:$0xff] }
 0x183   : > { %v1360_v35 = vadd.f32 %v1359_v33, %v336_v32  ;;  %v368_v32 = vld [vmem:[%s2588_s15 + $0x688] sm:$0xff] }
 0x185   : > { %v1361_v37 = vadd.f32 %v1360_v35, %v337_v34  ;;  %v369_v34 = vld [vmem:[%s2588_s15 + $0x690] sm:$0xff] }
 0x187   : > { %v1362_v39 = vadd.f32 %v1361_v37, %v338_v36  ;;  %v370_v36 = vld [vmem:[%s2588_s15 + $0x698] sm:$0xff] }
 0x189   : > { %v1363_v41 = vadd.f32 %v1362_v39, %v339_v38  ;;  %v371_v38 = vld [vmem:[%s2588_s15 + $0x6a0] sm:$0xff] }
 0x18b   : > { %v1364_v43 = vadd.f32 %v1363_v41, %v340_v40  ;;  %v372_v40 = vld [vmem:[%s2588_s15 + $0x6a8] sm:$0xff] }
 0x18d   : > { %v1365_v45 = vadd.f32 %v1364_v43, %v341_v42  ;;  %v373_v42 = vld [vmem:[%s2588_s15 + $0x6b0] sm:$0xff] }
 0x18f   : > { %v1366_v47 = vadd.f32 %v1365_v45, %v342_v44  ;;  %v374_v44 = vld [vmem:[%s2588_s15 + $0x6b8] sm:$0xff] }
 0x191   : > { %v1367_v49 = vadd.f32 %v1366_v47, %v343_v46  ;;  %v375_v46 = vld [vmem:[%s2588_s15 + $0x6c0] sm:$0xff] }
 0x193   : > { %v1368_v51 = vadd.f32 %v1367_v49, %v344_v48  ;;  %v376_v48 = vld [vmem:[%s2588_s15 + $0x6c8] sm:$0xff] }
 0x195   : > { %v1369_v53 = vadd.f32 %v1368_v51, %v345_v50  ;;  %v377_v50 = vld [vmem:[%s2588_s15 + $0x6d0] sm:$0xff] }
 0x197   : > { %v1370_v55 = vadd.f32 %v1369_v53, %v346_v52  ;;  %v378_v52 = vld [vmem:[%s2588_s15 + $0x6d8] sm:$0xff] }
 0x199   : > { %v1371_v57 = vadd.f32 %v1370_v55, %v347_v54  ;;  %v379_v54 = vld [vmem:[%s2588_s15 + $0x6e0] sm:$0xff] }
 0x19b   : > { %v1372_v59 = vadd.f32 %v1371_v57, %v348_v56  ;;  %v380_v56 = vld [vmem:[%s2588_s15 + $0x6e8] sm:$0xff] }
 0x19d   : > { %v1373_v61 = vadd.f32 %v1372_v59, %v349_v58  ;;  %v381_v58 = vld [vmem:[%s2588_s15 + $0x6f0] sm:$0xff] }
 0x19f   : > { %v1374_v63 = vadd.f32 %v1373_v61, %v350_v60  ;;  %v382_v60 = vld [vmem:[%s2588_s15 + $0x6f8] sm:$0xff] }
 0x1a1   : > { %v1375_v1 = vadd.f32 %v1374_v63, %v351_v62  ;;  %v383_v62 = vld [vmem:[%s2588_s15 + $0x700] sm:$0xff] }
 0x1a3   : > { %v1376_v3 = vadd.f32 %v1375_v1, %v352_v0  ;;  %v384_v0 = vld [vmem:[%s2588_s15 + $0x708] sm:$0xff] }
 0x1a5   : > { %v1377_v5 = vadd.f32 %v1376_v3, %v353_v2  ;;  %v385_v2 = vld [vmem:[%s2588_s15 + $0x710] sm:$0xff] }
 0x1a7   : > { %v1378_v7 = vadd.f32 %v1377_v5, %v354_v4  ;;  %v386_v4 = vld [vmem:[%s2588_s15 + $0x718] sm:$0xff] }
 0x1a9   : > { %v1379_v9 = vadd.f32 %v1378_v7, %v355_v6  ;;  %v387_v6 = vld [vmem:[%s2588_s15 + $0x720] sm:$0xff] }
 0x1ab   : > { %v1380_v11 = vadd.f32 %v1379_v9, %v356_v8  ;;  %v388_v8 = vld [vmem:[%s2588_s15 + $0x728] sm:$0xff] }
 0x1ad   : > { %v1381_v13 = vadd.f32 %v1380_v11, %v357_v10  ;;  %v389_v10 = vld [vmem:[%s2588_s15 + $0x730] sm:$0xff] }
 0x1af   : > { %v1382_v15 = vadd.f32 %v1381_v13, %v358_v12  ;;  %v390_v12 = vld [vmem:[%s2588_s15 + $0x738] sm:$0xff] }
 0x1b1   : > { %v1383_v17 = vadd.f32 %v1382_v15, %v359_v14  ;;  %v391_v14 = vld [vmem:[%s2588_s15 + $0x740] sm:$0xff] }
 0x1b3   : > { %v1384_v19 = vadd.f32 %v1383_v17, %v360_v16  ;;  %v392_v16 = vld [vmem:[%s2588_s15 + $0x748] sm:$0xff] }
 0x1b5   : > { %v1385_v21 = vadd.f32 %v1384_v19, %v361_v18  ;;  %v393_v18 = vld [vmem:[%s2588_s15 + $0x750] sm:$0xff] }
 0x1b7   : > { %v1386_v23 = vadd.f32 %v1385_v21, %v362_v20  ;;  %v394_v20 = vld [vmem:[%s2588_s15 + $0x758] sm:$0xff] }
 0x1b9   : > { %v1387_v25 = vadd.f32 %v1386_v23, %v363_v22  ;;  %v395_v22 = vld [vmem:[%s2588_s15 + $0x760] sm:$0xff] }
 0x1bb   : > { %v1388_v27 = vadd.f32 %v1387_v25, %v364_v24  ;;  %v396_v24 = vld [vmem:[%s2588_s15 + $0x768] sm:$0xff] }
 0x1bd   : > { %v1389_v29 = vadd.f32 %v1388_v27, %v365_v26  ;;  %v397_v26 = vld [vmem:[%s2588_s15 + $0x770] sm:$0xff] }
 0x1bf   : > { %v1390_v31 = vadd.f32 %v1389_v29, %v366_v28  ;;  %v398_v28 = vld [vmem:[%s2588_s15 + $0x778] sm:$0xff] }
 0x1c1   : > { %v1391_v33 = vadd.f32 %v1390_v31, %v367_v30  ;;  %v399_v30 = vld [vmem:[%s2588_s15 + $0x780] sm:$0xff] }
 0x1c3   : > { %v1392_v35 = vadd.f32 %v1391_v33, %v368_v32  ;;  %v400_v32 = vld [vmem:[%s2588_s15 + $0x788] sm:$0xff] }
 0x1c5   : > { %v1393_v37 = vadd.f32 %v1392_v35, %v369_v34  ;;  %v401_v34 = vld [vmem:[%s2588_s15 + $0x790] sm:$0xff] }
 0x1c7   : > { %v1394_v39 = vadd.f32 %v1393_v37, %v370_v36  ;;  %v402_v36 = vld [vmem:[%s2588_s15 + $0x798] sm:$0xff] }
 0x1c9   : > { %v1395_v41 = vadd.f32 %v1394_v39, %v371_v38  ;;  %v403_v38 = vld [vmem:[%s2588_s15 + $0x7a0] sm:$0xff] }
 0x1cb   : > { %v1396_v43 = vadd.f32 %v1395_v41, %v372_v40  ;;  %v404_v40 = vld [vmem:[%s2588_s15 + $0x7a8] sm:$0xff] }
 0x1cd   : > { %v1397_v45 = vadd.f32 %v1396_v43, %v373_v42  ;;  %v405_v42 = vld [vmem:[%s2588_s15 + $0x7b0] sm:$0xff] }
 0x1cf   : > { %v1398_v47 = vadd.f32 %v1397_v45, %v374_v44  ;;  %v406_v44 = vld [vmem:[%s2588_s15 + $0x7b8] sm:$0xff] }
 0x1d1   : > { %v1399_v49 = vadd.f32 %v1398_v47, %v375_v46  ;;  %v407_v46 = vld [vmem:[%s2588_s15 + $0x7c0] sm:$0xff] }
 0x1d3   : > { %v1400_v51 = vadd.f32 %v1399_v49, %v376_v48  ;;  %v408_v48 = vld [vmem:[%s2588_s15 + $0x7c8] sm:$0xff] }
 0x1d5   : > { %v1401_v53 = vadd.f32 %v1400_v51, %v377_v50  ;;  %v409_v50 = vld [vmem:[%s2588_s15 + $0x7d0] sm:$0xff] }
 0x1d7   : > { %v1402_v55 = vadd.f32 %v1401_v53, %v378_v52  ;;  %v410_v52 = vld [vmem:[%s2588_s15 + $0x7d8] sm:$0xff] }
 0x1d9   : > { %v1403_v57 = vadd.f32 %v1402_v55, %v379_v54  ;;  %v411_v54 = vld [vmem:[%s2588_s15 + $0x7e0] sm:$0xff] }
 0x1db   : > { %v1404_v59 = vadd.f32 %v1403_v57, %v380_v56  ;;  %v412_v56 = vld [vmem:[%s2588_s15 + $0x7e8] sm:$0xff] }
 0x1dd   : > { %v1405_v61 = vadd.f32 %v1404_v59, %v381_v58  ;;  %v413_v58 = vld [vmem:[%s2588_s15 + $0x7f0] sm:$0xff] }
 0x1df   : > { %v1406_v63 = vadd.f32 %v1405_v61, %v382_v60  ;;  %v414_v60 = vld [vmem:[%s2588_s15 + $0x7f8] sm:$0xff] }
 0x1e1   : > { %v1407_v1 = vadd.f32 %v1406_v63, %v383_v62  ;;  %v415_v62 = vld [vmem:[%s2588_s15 + $0x800] sm:$0xff] }
 0x1e3   : > { %v1408_v3 = vadd.f32 %v1407_v1, %v384_v0  ;;  %v416_v0 = vld [vmem:[%s2588_s15 + $0x808] sm:$0xff] }
 0x1e5   : > { %v1409_v5 = vadd.f32 %v1408_v3, %v385_v2  ;;  %v417_v2 = vld [vmem:[%s2588_s15 + $0x810] sm:$0xff] }
 0x1e7   : > { %v1410_v7 = vadd.f32 %v1409_v5, %v386_v4  ;;  %v418_v4 = vld [vmem:[%s2588_s15 + $0x818] sm:$0xff] }
 0x1e9   : > { %v1411_v9 = vadd.f32 %v1410_v7, %v387_v6  ;;  %v419_v6 = vld [vmem:[%s2588_s15 + $0x820] sm:$0xff] }
 0x1eb   : > { %v1412_v11 = vadd.f32 %v1411_v9, %v388_v8  ;;  %v420_v8 = vld [vmem:[%s2588_s15 + $0x828] sm:$0xff] }
 0x1ed   : > { %v1413_v13 = vadd.f32 %v1412_v11, %v389_v10  ;;  %v421_v10 = vld [vmem:[%s2588_s15 + $0x830] sm:$0xff] }
 0x1ef   : > { %v1414_v15 = vadd.f32 %v1413_v13, %v390_v12  ;;  %v422_v12 = vld [vmem:[%s2588_s15 + $0x838] sm:$0xff] }
 0x1f1   : > { %v1415_v17 = vadd.f32 %v1414_v15, %v391_v14  ;;  %v423_v14 = vld [vmem:[%s2588_s15 + $0x840] sm:$0xff] }
 0x1f3   : > { %v1416_v19 = vadd.f32 %v1415_v17, %v392_v16  ;;  %v424_v16 = vld [vmem:[%s2588_s15 + $0x848] sm:$0xff] }
 0x1f5   : > { %v1417_v21 = vadd.f32 %v1416_v19, %v393_v18  ;;  %v425_v18 = vld [vmem:[%s2588_s15 + $0x850] sm:$0xff] }
 0x1f7   : > { %v1418_v23 = vadd.f32 %v1417_v21, %v394_v20  ;;  %v426_v20 = vld [vmem:[%s2588_s15 + $0x858] sm:$0xff] }
 0x1f9   : > { %v1419_v25 = vadd.f32 %v1418_v23, %v395_v22  ;;  %v427_v22 = vld [vmem:[%s2588_s15 + $0x860] sm:$0xff] }
 0x1fb   : > { %v1420_v27 = vadd.f32 %v1419_v25, %v396_v24  ;;  %v428_v24 = vld [vmem:[%s2588_s15 + $0x868] sm:$0xff] }
 0x1fd   : > { %v1421_v29 = vadd.f32 %v1420_v27, %v397_v26  ;;  %v429_v26 = vld [vmem:[%s2588_s15 + $0x870] sm:$0xff] }
 0x1ff   : > { %v1422_v31 = vadd.f32 %v1421_v29, %v398_v28  ;;  %v430_v28 = vld [vmem:[%s2588_s15 + $0x878] sm:$0xff] }
 0x201   : > { %v1423_v33 = vadd.f32 %v1422_v31, %v399_v30  ;;  %v431_v30 = vld [vmem:[%s2588_s15 + $0x880] sm:$0xff] }
 0x203   : > { %v1424_v35 = vadd.f32 %v1423_v33, %v400_v32  ;;  %v432_v32 = vld [vmem:[%s2588_s15 + $0x888] sm:$0xff] }
 0x205   : > { %v1425_v37 = vadd.f32 %v1424_v35, %v401_v34  ;;  %v433_v34 = vld [vmem:[%s2588_s15 + $0x890] sm:$0xff] }
 0x207   : > { %v1426_v39 = vadd.f32 %v1425_v37, %v402_v36  ;;  %v434_v36 = vld [vmem:[%s2588_s15 + $0x898] sm:$0xff] }
 0x209   : > { %v1427_v41 = vadd.f32 %v1426_v39, %v403_v38  ;;  %v435_v38 = vld [vmem:[%s2588_s15 + $0x8a0] sm:$0xff] }
 0x20b   : > { %v1428_v43 = vadd.f32 %v1427_v41, %v404_v40  ;;  %v436_v40 = vld [vmem:[%s2588_s15 + $0x8a8] sm:$0xff] }
 0x20d   : > { %v1429_v45 = vadd.f32 %v1428_v43, %v405_v42  ;;  %v437_v42 = vld [vmem:[%s2588_s15 + $0x8b0] sm:$0xff] }
 0x20f   : > { %v1430_v47 = vadd.f32 %v1429_v45, %v406_v44  ;;  %v438_v44 = vld [vmem:[%s2588_s15 + $0x8b8] sm:$0xff] }
 0x211   : > { %v1431_v49 = vadd.f32 %v1430_v47, %v407_v46  ;;  %v439_v46 = vld [vmem:[%s2588_s15 + $0x8c0] sm:$0xff] }
 0x213   : > { %v1432_v51 = vadd.f32 %v1431_v49, %v408_v48  ;;  %v440_v48 = vld [vmem:[%s2588_s15 + $0x8c8] sm:$0xff] }
 0x215   : > { %v1433_v53 = vadd.f32 %v1432_v51, %v409_v50  ;;  %v441_v50 = vld [vmem:[%s2588_s15 + $0x8d0] sm:$0xff] }
 0x217   : > { %v1434_v55 = vadd.f32 %v1433_v53, %v410_v52  ;;  %v442_v52 = vld [vmem:[%s2588_s15 + $0x8d8] sm:$0xff] }
 0x219   : > { %v1435_v57 = vadd.f32 %v1434_v55, %v411_v54  ;;  %v443_v54 = vld [vmem:[%s2588_s15 + $0x8e0] sm:$0xff] }
 0x21b   : > { %v1436_v59 = vadd.f32 %v1435_v57, %v412_v56  ;;  %v444_v56 = vld [vmem:[%s2588_s15 + $0x8e8] sm:$0xff] }
 0x21d   : > { %v1437_v61 = vadd.f32 %v1436_v59, %v413_v58  ;;  %v445_v58 = vld [vmem:[%s2588_s15 + $0x8f0] sm:$0xff] }
 0x21f   : > { %v1438_v63 = vadd.f32 %v1437_v61, %v414_v60  ;;  %v446_v60 = vld [vmem:[%s2588_s15 + $0x8f8] sm:$0xff] }
 0x221   : > { %v1439_v1 = vadd.f32 %v1438_v63, %v415_v62  ;;  %v447_v62 = vld [vmem:[%s2588_s15 + $0x900] sm:$0xff] }
 0x223   : > { %v1440_v3 = vadd.f32 %v1439_v1, %v416_v0  ;;  %v448_v0 = vld [vmem:[%s2588_s15 + $0x908] sm:$0xff] }
 0x225   : > { %v1441_v5 = vadd.f32 %v1440_v3, %v417_v2  ;;  %v449_v2 = vld [vmem:[%s2588_s15 + $0x910] sm:$0xff] }
 0x227   : > { %v1442_v7 = vadd.f32 %v1441_v5, %v418_v4  ;;  %v450_v4 = vld [vmem:[%s2588_s15 + $0x918] sm:$0xff] }
 0x229   : > { %v1443_v9 = vadd.f32 %v1442_v7, %v419_v6  ;;  %v451_v6 = vld [vmem:[%s2588_s15 + $0x920] sm:$0xff] }
 0x22b   : > { %v1444_v11 = vadd.f32 %v1443_v9, %v420_v8  ;;  %v452_v8 = vld [vmem:[%s2588_s15 + $0x928] sm:$0xff] }
 0x22d   : > { %v1445_v13 = vadd.f32 %v1444_v11, %v421_v10  ;;  %v453_v10 = vld [vmem:[%s2588_s15 + $0x930] sm:$0xff] }
 0x22f   : > { %v1446_v15 = vadd.f32 %v1445_v13, %v422_v12  ;;  %v454_v12 = vld [vmem:[%s2588_s15 + $0x938] sm:$0xff] }
 0x231   : > { %v1447_v17 = vadd.f32 %v1446_v15, %v423_v14  ;;  %v455_v14 = vld [vmem:[%s2588_s15 + $0x940] sm:$0xff] }
 0x233   : > { %v1448_v19 = vadd.f32 %v1447_v17, %v424_v16  ;;  %v456_v16 = vld [vmem:[%s2588_s15 + $0x948] sm:$0xff] }
 0x235   : > { %v1449_v21 = vadd.f32 %v1448_v19, %v425_v18  ;;  %v457_v18 = vld [vmem:[%s2588_s15 + $0x950] sm:$0xff] }
 0x237   : > { %v1450_v23 = vadd.f32 %v1449_v21, %v426_v20  ;;  %v458_v20 = vld [vmem:[%s2588_s15 + $0x958] sm:$0xff] }
 0x239   : > { %v1451_v25 = vadd.f32 %v1450_v23, %v427_v22  ;;  %v459_v22 = vld [vmem:[%s2588_s15 + $0x960] sm:$0xff] }
 0x23b   : > { %v1452_v27 = vadd.f32 %v1451_v25, %v428_v24  ;;  %v460_v24 = vld [vmem:[%s2588_s15 + $0x968] sm:$0xff] }
 0x23d   : > { %v1453_v29 = vadd.f32 %v1452_v27, %v429_v26  ;;  %v461_v26 = vld [vmem:[%s2588_s15 + $0x970] sm:$0xff] }
 0x23f   : > { %v1454_v31 = vadd.f32 %v1453_v29, %v430_v28  ;;  %v462_v28 = vld [vmem:[%s2588_s15 + $0x978] sm:$0xff] }
 0x241   : > { %v1455_v33 = vadd.f32 %v1454_v31, %v431_v30  ;;  %v463_v30 = vld [vmem:[%s2588_s15 + $0x980] sm:$0xff] }
 0x243   : > { %v1456_v35 = vadd.f32 %v1455_v33, %v432_v32  ;;  %v464_v32 = vld [vmem:[%s2588_s15 + $0x988] sm:$0xff] }
 0x245   : > { %v1457_v37 = vadd.f32 %v1456_v35, %v433_v34  ;;  %v465_v34 = vld [vmem:[%s2588_s15 + $0x990] sm:$0xff] }
 0x247   : > { %v1458_v39 = vadd.f32 %v1457_v37, %v434_v36  ;;  %v466_v36 = vld [vmem:[%s2588_s15 + $0x998] sm:$0xff] }
 0x249   : > { %v1459_v41 = vadd.f32 %v1458_v39, %v435_v38  ;;  %v467_v38 = vld [vmem:[%s2588_s15 + $0x9a0] sm:$0xff] }
 0x24b   : > { %v1460_v43 = vadd.f32 %v1459_v41, %v436_v40  ;;  %v468_v40 = vld [vmem:[%s2588_s15 + $0x9a8] sm:$0xff] }
 0x24d   : > { %v1461_v45 = vadd.f32 %v1460_v43, %v437_v42  ;;  %v469_v42 = vld [vmem:[%s2588_s15 + $0x9b0] sm:$0xff] }
 0x24f   : > { %v1462_v47 = vadd.f32 %v1461_v45, %v438_v44  ;;  %v470_v44 = vld [vmem:[%s2588_s15 + $0x9b8] sm:$0xff] }
 0x251   : > { %v1463_v49 = vadd.f32 %v1462_v47, %v439_v46  ;;  %v471_v46 = vld [vmem:[%s2588_s15 + $0x9c0] sm:$0xff] }
 0x253   : > { %v1464_v51 = vadd.f32 %v1463_v49, %v440_v48  ;;  %v472_v48 = vld [vmem:[%s2588_s15 + $0x9c8] sm:$0xff] }
 0x255   : > { %v1465_v53 = vadd.f32 %v1464_v51, %v441_v50  ;;  %v473_v50 = vld [vmem:[%s2588_s15 + $0x9d0] sm:$0xff] }
 0x257   : > { %v1466_v55 = vadd.f32 %v1465_v53, %v442_v52  ;;  %v474_v52 = vld [vmem:[%s2588_s15 + $0x9d8] sm:$0xff] }
 0x259   : > { %v1467_v57 = vadd.f32 %v1466_v55, %v443_v54  ;;  %v475_v54 = vld [vmem:[%s2588_s15 + $0x9e0] sm:$0xff] }
 0x25b   : > { %v1468_v59 = vadd.f32 %v1467_v57, %v444_v56  ;;  %v476_v56 = vld [vmem:[%s2588_s15 + $0x9e8] sm:$0xff] }
 0x25d   : > { %v1469_v61 = vadd.f32 %v1468_v59, %v445_v58  ;;  %v477_v58 = vld [vmem:[%s2588_s15 + $0x9f0] sm:$0xff] }
 0x25f   : > { %v1470_v63 = vadd.f32 %v1469_v61, %v446_v60  ;;  %v478_v60 = vld [vmem:[%s2588_s15 + $0x9f8] sm:$0xff] }
 0x261   : > { %v1471_v1 = vadd.f32 %v1470_v63, %v447_v62  ;;  %v479_v62 = vld [vmem:[%s2588_s15 + $0xa00] sm:$0xff] }
 0x263   : > { %v1472_v3 = vadd.f32 %v1471_v1, %v448_v0  ;;  %v480_v0 = vld [vmem:[%s2588_s15 + $0xa08] sm:$0xff] }
 0x265   : > { %v1473_v5 = vadd.f32 %v1472_v3, %v449_v2  ;;  %v481_v2 = vld [vmem:[%s2588_s15 + $0xa10] sm:$0xff] }
 0x267   : > { %v1474_v7 = vadd.f32 %v1473_v5, %v450_v4  ;;  %v482_v4 = vld [vmem:[%s2588_s15 + $0xa18] sm:$0xff] }
 0x269   : > { %v1475_v9 = vadd.f32 %v1474_v7, %v451_v6  ;;  %v483_v6 = vld [vmem:[%s2588_s15 + $0xa20] sm:$0xff] }
 0x26b   : > { %v1476_v11 = vadd.f32 %v1475_v9, %v452_v8  ;;  %v484_v8 = vld [vmem:[%s2588_s15 + $0xa28] sm:$0xff] }
 0x26d   : > { %v1477_v13 = vadd.f32 %v1476_v11, %v453_v10  ;;  %v485_v10 = vld [vmem:[%s2588_s15 + $0xa30] sm:$0xff] }
 0x26f   : > { %v1478_v15 = vadd.f32 %v1477_v13, %v454_v12  ;;  %v486_v12 = vld [vmem:[%s2588_s15 + $0xa38] sm:$0xff] }
 0x271   : > { %v1479_v17 = vadd.f32 %v1478_v15, %v455_v14  ;;  %v487_v14 = vld [vmem:[%s2588_s15 + $0xa40] sm:$0xff] }
 0x273   : > { %v1480_v19 = vadd.f32 %v1479_v17, %v456_v16  ;;  %v488_v16 = vld [vmem:[%s2588_s15 + $0xa48] sm:$0xff] }
 0x275   : > { %v1481_v21 = vadd.f32 %v1480_v19, %v457_v18  ;;  %v489_v18 = vld [vmem:[%s2588_s15 + $0xa50] sm:$0xff] }
 0x277   : > { %v1482_v23 = vadd.f32 %v1481_v21, %v458_v20  ;;  %v490_v20 = vld [vmem:[%s2588_s15 + $0xa58] sm:$0xff] }
 0x279   : > { %v1483_v25 = vadd.f32 %v1482_v23, %v459_v22  ;;  %v491_v22 = vld [vmem:[%s2588_s15 + $0xa60] sm:$0xff] }
 0x27b   : > { %v1484_v27 = vadd.f32 %v1483_v25, %v460_v24  ;;  %v492_v24 = vld [vmem:[%s2588_s15 + $0xa68] sm:$0xff] }
 0x27d   : > { %v1485_v29 = vadd.f32 %v1484_v27, %v461_v26  ;;  %v493_v26 = vld [vmem:[%s2588_s15 + $0xa70] sm:$0xff] }
 0x27f   : > { %v1486_v31 = vadd.f32 %v1485_v29, %v462_v28  ;;  %v494_v28 = vld [vmem:[%s2588_s15 + $0xa78] sm:$0xff] }
 0x281   : > { %v1487_v33 = vadd.f32 %v1486_v31, %v463_v30  ;;  %v495_v30 = vld [vmem:[%s2588_s15 + $0xa80] sm:$0xff] }
 0x283   : > { %v1488_v35 = vadd.f32 %v1487_v33, %v464_v32  ;;  %v496_v32 = vld [vmem:[%s2588_s15 + $0xa88] sm:$0xff] }
 0x285   : > { %v1489_v37 = vadd.f32 %v1488_v35, %v465_v34  ;;  %v497_v34 = vld [vmem:[%s2588_s15 + $0xa90] sm:$0xff] }
 0x287   : > { %v1490_v39 = vadd.f32 %v1489_v37, %v466_v36  ;;  %v498_v36 = vld [vmem:[%s2588_s15 + $0xa98] sm:$0xff] }
 0x289   : > { %v1491_v41 = vadd.f32 %v1490_v39, %v467_v38  ;;  %v499_v38 = vld [vmem:[%s2588_s15 + $0xaa0] sm:$0xff] }
 0x28b   : > { %v1492_v43 = vadd.f32 %v1491_v41, %v468_v40  ;;  %v500_v40 = vld [vmem:[%s2588_s15 + $0xaa8] sm:$0xff] }
 0x28d   : > { %v1493_v45 = vadd.f32 %v1492_v43, %v469_v42  ;;  %v501_v42 = vld [vmem:[%s2588_s15 + $0xab0] sm:$0xff] }
 0x28f   : > { %v1494_v47 = vadd.f32 %v1493_v45, %v470_v44  ;;  %v502_v44 = vld [vmem:[%s2588_s15 + $0xab8] sm:$0xff] }
 0x291   : > { %v1495_v49 = vadd.f32 %v1494_v47, %v471_v46  ;;  %v503_v46 = vld [vmem:[%s2588_s15 + $0xac0] sm:$0xff] }
 0x293   : > { %v1496_v51 = vadd.f32 %v1495_v49, %v472_v48  ;;  %v504_v48 = vld [vmem:[%s2588_s15 + $0xac8] sm:$0xff] }
 0x295   : > { %v1497_v53 = vadd.f32 %v1496_v51, %v473_v50  ;;  %v505_v50 = vld [vmem:[%s2588_s15 + $0xad0] sm:$0xff] }
 0x297   : > { %v1498_v55 = vadd.f32 %v1497_v53, %v474_v52  ;;  %v506_v52 = vld [vmem:[%s2588_s15 + $0xad8] sm:$0xff] }
 0x299   : > { %v1499_v57 = vadd.f32 %v1498_v55, %v475_v54  ;;  %v507_v54 = vld [vmem:[%s2588_s15 + $0xae0] sm:$0xff] }
 0x29b   : > { %v1500_v59 = vadd.f32 %v1499_v57, %v476_v56  ;;  %v508_v56 = vld [vmem:[%s2588_s15 + $0xae8] sm:$0xff] }
 0x29d   : > { %v1501_v61 = vadd.f32 %v1500_v59, %v477_v58  ;;  %v509_v58 = vld [vmem:[%s2588_s15 + $0xaf0] sm:$0xff] }
 0x29f   : > { %v1502_v63 = vadd.f32 %v1501_v61, %v478_v60  ;;  %v510_v60 = vld [vmem:[%s2588_s15 + $0xaf8] sm:$0xff] }
 0x2a1   : > { %v1503_v1 = vadd.f32 %v1502_v63, %v479_v62  ;;  %v511_v62 = vld [vmem:[%s2588_s15 + $0xb00] sm:$0xff] }
 0x2a3   : > { %v1504_v3 = vadd.f32 %v1503_v1, %v480_v0  ;;  %v512_v0 = vld [vmem:[%s2588_s15 + $0xb08] sm:$0xff] }
 0x2a5   : > { %v1505_v5 = vadd.f32 %v1504_v3, %v481_v2  ;;  %v513_v2 = vld [vmem:[%s2588_s15 + $0xb10] sm:$0xff] }
 0x2a7   : > { %v1506_v7 = vadd.f32 %v1505_v5, %v482_v4  ;;  %v514_v4 = vld [vmem:[%s2588_s15 + $0xb18] sm:$0xff] }
 0x2a9   : > { %v1507_v9 = vadd.f32 %v1506_v7, %v483_v6  ;;  %v515_v6 = vld [vmem:[%s2588_s15 + $0xb20] sm:$0xff] }
 0x2ab   : > { %v1508_v11 = vadd.f32 %v1507_v9, %v484_v8  ;;  %v516_v8 = vld [vmem:[%s2588_s15 + $0xb28] sm:$0xff] }
 0x2ad   : > { %v1509_v13 = vadd.f32 %v1508_v11, %v485_v10  ;;  %v517_v10 = vld [vmem:[%s2588_s15 + $0xb30] sm:$0xff] }
 0x2af   : > { %v1510_v15 = vadd.f32 %v1509_v13, %v486_v12  ;;  %v518_v12 = vld [vmem:[%s2588_s15 + $0xb38] sm:$0xff] }
 0x2b1   : > { %v1511_v17 = vadd.f32 %v1510_v15, %v487_v14  ;;  %v519_v14 = vld [vmem:[%s2588_s15 + $0xb40] sm:$0xff] }
 0x2b3   : > { %v1512_v19 = vadd.f32 %v1511_v17, %v488_v16  ;;  %v520_v16 = vld [vmem:[%s2588_s15 + $0xb48] sm:$0xff] }
 0x2b5   : > { %v1513_v21 = vadd.f32 %v1512_v19, %v489_v18  ;;  %v521_v18 = vld [vmem:[%s2588_s15 + $0xb50] sm:$0xff] }
 0x2b7   : > { %v1514_v23 = vadd.f32 %v1513_v21, %v490_v20  ;;  %v522_v20 = vld [vmem:[%s2588_s15 + $0xb58] sm:$0xff] }
 0x2b9   : > { %v1515_v25 = vadd.f32 %v1514_v23, %v491_v22  ;;  %v523_v22 = vld [vmem:[%s2588_s15 + $0xb60] sm:$0xff] }
 0x2bb   : > { %v1516_v27 = vadd.f32 %v1515_v25, %v492_v24  ;;  %v524_v24 = vld [vmem:[%s2588_s15 + $0xb68] sm:$0xff] }
 0x2bd   : > { %v1517_v29 = vadd.f32 %v1516_v27, %v493_v26  ;;  %v525_v26 = vld [vmem:[%s2588_s15 + $0xb70] sm:$0xff] }
 0x2bf   : > { %v1518_v31 = vadd.f32 %v1517_v29, %v494_v28  ;;  %v526_v28 = vld [vmem:[%s2588_s15 + $0xb78] sm:$0xff] }
 0x2c1   : > { %v1519_v33 = vadd.f32 %v1518_v31, %v495_v30  ;;  %v527_v30 = vld [vmem:[%s2588_s15 + $0xb80] sm:$0xff] }
 0x2c3   : > { %v1520_v35 = vadd.f32 %v1519_v33, %v496_v32  ;;  %v528_v32 = vld [vmem:[%s2588_s15 + $0xb88] sm:$0xff] }
 0x2c5   : > { %v1521_v37 = vadd.f32 %v1520_v35, %v497_v34  ;;  %v529_v34 = vld [vmem:[%s2588_s15 + $0xb90] sm:$0xff] }
 0x2c7   : > { %v1522_v39 = vadd.f32 %v1521_v37, %v498_v36  ;;  %v530_v36 = vld [vmem:[%s2588_s15 + $0xb98] sm:$0xff] }
 0x2c9   : > { %v1523_v41 = vadd.f32 %v1522_v39, %v499_v38  ;;  %v531_v38 = vld [vmem:[%s2588_s15 + $0xba0] sm:$0xff] }
 0x2cb   : > { %v1524_v43 = vadd.f32 %v1523_v41, %v500_v40  ;;  %v532_v40 = vld [vmem:[%s2588_s15 + $0xba8] sm:$0xff] }
 0x2cd   : > { %v1525_v45 = vadd.f32 %v1524_v43, %v501_v42  ;;  %v533_v42 = vld [vmem:[%s2588_s15 + $0xbb0] sm:$0xff] }
 0x2cf   : > { %v1526_v47 = vadd.f32 %v1525_v45, %v502_v44  ;;  %v534_v44 = vld [vmem:[%s2588_s15 + $0xbb8] sm:$0xff] }
 0x2d1   : > { %v1527_v49 = vadd.f32 %v1526_v47, %v503_v46  ;;  %v535_v46 = vld [vmem:[%s2588_s15 + $0xbc0] sm:$0xff] }
 0x2d3   : > { %v1528_v51 = vadd.f32 %v1527_v49, %v504_v48  ;;  %v536_v48 = vld [vmem:[%s2588_s15 + $0xbc8] sm:$0xff] }
 0x2d5   : > { %v1529_v53 = vadd.f32 %v1528_v51, %v505_v50  ;;  %v537_v50 = vld [vmem:[%s2588_s15 + $0xbd0] sm:$0xff] }
 0x2d7   : > { %v1530_v55 = vadd.f32 %v1529_v53, %v506_v52  ;;  %v538_v52 = vld [vmem:[%s2588_s15 + $0xbd8] sm:$0xff] }
 0x2d9   : > { %v1531_v57 = vadd.f32 %v1530_v55, %v507_v54  ;;  %v539_v54 = vld [vmem:[%s2588_s15 + $0xbe0] sm:$0xff] }
 0x2db   : > { %v1532_v59 = vadd.f32 %v1531_v57, %v508_v56  ;;  %v540_v56 = vld [vmem:[%s2588_s15 + $0xbe8] sm:$0xff] }
 0x2dd   : > { %v1533_v61 = vadd.f32 %v1532_v59, %v509_v58  ;;  %v541_v58 = vld [vmem:[%s2588_s15 + $0xbf0] sm:$0xff] }
 0x2df   : > { %v1534_v63 = vadd.f32 %v1533_v61, %v510_v60  ;;  %v542_v60 = vld [vmem:[%s2588_s15 + $0xbf8] sm:$0xff] }
 0x2e1   : > { %v1535_v1 = vadd.f32 %v1534_v63, %v511_v62  ;;  %v543_v62 = vld [vmem:[%s2588_s15 + $0xc00] sm:$0xff] }
 0x2e3   : > { %v1536_v3 = vadd.f32 %v1535_v1, %v512_v0  ;;  %v544_v0 = vld [vmem:[%s2588_s15 + $0xc08] sm:$0xff] }
 0x2e5   : > { %v1537_v5 = vadd.f32 %v1536_v3, %v513_v2  ;;  %v545_v2 = vld [vmem:[%s2588_s15 + $0xc10] sm:$0xff] }
 0x2e7   : > { %v1538_v7 = vadd.f32 %v1537_v5, %v514_v4  ;;  %v546_v4 = vld [vmem:[%s2588_s15 + $0xc18] sm:$0xff] }
 0x2e9   : > { %v1539_v9 = vadd.f32 %v1538_v7, %v515_v6  ;;  %v547_v6 = vld [vmem:[%s2588_s15 + $0xc20] sm:$0xff] }
 0x2eb   : > { %v1540_v11 = vadd.f32 %v1539_v9, %v516_v8  ;;  %v548_v8 = vld [vmem:[%s2588_s15 + $0xc28] sm:$0xff] }
 0x2ed   : > { %v1541_v13 = vadd.f32 %v1540_v11, %v517_v10  ;;  %v549_v10 = vld [vmem:[%s2588_s15 + $0xc30] sm:$0xff] }
 0x2ef   : > { %v1542_v15 = vadd.f32 %v1541_v13, %v518_v12  ;;  %v550_v12 = vld [vmem:[%s2588_s15 + $0xc38] sm:$0xff] }
 0x2f1   : > { %v1543_v17 = vadd.f32 %v1542_v15, %v519_v14  ;;  %v551_v14 = vld [vmem:[%s2588_s15 + $0xc40] sm:$0xff] }
 0x2f3   : > { %v1544_v19 = vadd.f32 %v1543_v17, %v520_v16  ;;  %v552_v16 = vld [vmem:[%s2588_s15 + $0xc48] sm:$0xff] }
 0x2f5   : > { %v1545_v21 = vadd.f32 %v1544_v19, %v521_v18  ;;  %v553_v18 = vld [vmem:[%s2588_s15 + $0xc50] sm:$0xff] }
 0x2f7   : > { %v1546_v23 = vadd.f32 %v1545_v21, %v522_v20  ;;  %v554_v20 = vld [vmem:[%s2588_s15 + $0xc58] sm:$0xff] }
 0x2f9   : > { %v1547_v25 = vadd.f32 %v1546_v23, %v523_v22  ;;  %v555_v22 = vld [vmem:[%s2588_s15 + $0xc60] sm:$0xff] }
 0x2fb   : > { %v1548_v27 = vadd.f32 %v1547_v25, %v524_v24  ;;  %v556_v24 = vld [vmem:[%s2588_s15 + $0xc68] sm:$0xff] }
 0x2fd   : > { %v1549_v29 = vadd.f32 %v1548_v27, %v525_v26  ;;  %v557_v26 = vld [vmem:[%s2588_s15 + $0xc70] sm:$0xff] }
 0x2ff   : > { %v1550_v31 = vadd.f32 %v1549_v29, %v526_v28  ;;  %v558_v28 = vld [vmem:[%s2588_s15 + $0xc78] sm:$0xff] }
 0x301   : > { %v1551_v33 = vadd.f32 %v1550_v31, %v527_v30  ;;  %v559_v30 = vld [vmem:[%s2588_s15 + $0xc80] sm:$0xff] }
 0x303   : > { %v1552_v35 = vadd.f32 %v1551_v33, %v528_v32  ;;  %v560_v32 = vld [vmem:[%s2588_s15 + $0xc88] sm:$0xff] }
 0x305   : > { %v1553_v37 = vadd.f32 %v1552_v35, %v529_v34  ;;  %v561_v34 = vld [vmem:[%s2588_s15 + $0xc90] sm:$0xff] }
 0x307   : > { %v1554_v39 = vadd.f32 %v1553_v37, %v530_v36  ;;  %v562_v36 = vld [vmem:[%s2588_s15 + $0xc98] sm:$0xff] }
 0x309   : > { %v1555_v41 = vadd.f32 %v1554_v39, %v531_v38  ;;  %v563_v38 = vld [vmem:[%s2588_s15 + $0xca0] sm:$0xff] }
 0x30b   : > { %v1556_v43 = vadd.f32 %v1555_v41, %v532_v40  ;;  %v564_v40 = vld [vmem:[%s2588_s15 + $0xca8] sm:$0xff] }
 0x30d   : > { %v1557_v45 = vadd.f32 %v1556_v43, %v533_v42  ;;  %v565_v42 = vld [vmem:[%s2588_s15 + $0xcb0] sm:$0xff] }
 0x30f   : > { %v1558_v47 = vadd.f32 %v1557_v45, %v534_v44  ;;  %v566_v44 = vld [vmem:[%s2588_s15 + $0xcb8] sm:$0xff] }
 0x311   : > { %v1559_v49 = vadd.f32 %v1558_v47, %v535_v46  ;;  %v567_v46 = vld [vmem:[%s2588_s15 + $0xcc0] sm:$0xff] }
 0x313   : > { %v1560_v51 = vadd.f32 %v1559_v49, %v536_v48  ;;  %v568_v48 = vld [vmem:[%s2588_s15 + $0xcc8] sm:$0xff] }
 0x315   : > { %v1561_v53 = vadd.f32 %v1560_v51, %v537_v50  ;;  %v569_v50 = vld [vmem:[%s2588_s15 + $0xcd0] sm:$0xff] }
 0x317   : > { %v1562_v55 = vadd.f32 %v1561_v53, %v538_v52  ;;  %v570_v52 = vld [vmem:[%s2588_s15 + $0xcd8] sm:$0xff] }
 0x319   : > { %v1563_v57 = vadd.f32 %v1562_v55, %v539_v54  ;;  %v571_v54 = vld [vmem:[%s2588_s15 + $0xce0] sm:$0xff] }
 0x31b   : > { %v1564_v59 = vadd.f32 %v1563_v57, %v540_v56  ;;  %v572_v56 = vld [vmem:[%s2588_s15 + $0xce8] sm:$0xff] }
 0x31d   : > { %v1565_v61 = vadd.f32 %v1564_v59, %v541_v58  ;;  %v573_v58 = vld [vmem:[%s2588_s15 + $0xcf0] sm:$0xff] }
 0x31f   : > { %v1566_v63 = vadd.f32 %v1565_v61, %v542_v60  ;;  %v574_v60 = vld [vmem:[%s2588_s15 + $0xcf8] sm:$0xff] }
 0x321   : > { %v1567_v1 = vadd.f32 %v1566_v63, %v543_v62  ;;  %v575_v62 = vld [vmem:[%s2588_s15 + $0xd00] sm:$0xff] }
 0x323   : > { %v1568_v3 = vadd.f32 %v1567_v1, %v544_v0  ;;  %v576_v0 = vld [vmem:[%s2588_s15 + $0xd08] sm:$0xff] }
 0x325   : > { %v1569_v5 = vadd.f32 %v1568_v3, %v545_v2  ;;  %v577_v2 = vld [vmem:[%s2588_s15 + $0xd10] sm:$0xff] }
 0x327   : > { %v1570_v7 = vadd.f32 %v1569_v5, %v546_v4  ;;  %v578_v4 = vld [vmem:[%s2588_s15 + $0xd18] sm:$0xff] }
 0x329   : > { %v1571_v9 = vadd.f32 %v1570_v7, %v547_v6  ;;  %v579_v6 = vld [vmem:[%s2588_s15 + $0xd20] sm:$0xff] }
 0x32b   : > { %v1572_v11 = vadd.f32 %v1571_v9, %v548_v8  ;;  %v580_v8 = vld [vmem:[%s2588_s15 + $0xd28] sm:$0xff] }
 0x32d   : > { %v1573_v13 = vadd.f32 %v1572_v11, %v549_v10  ;;  %v581_v10 = vld [vmem:[%s2588_s15 + $0xd30] sm:$0xff] }
 0x32f   : > { %v1574_v15 = vadd.f32 %v1573_v13, %v550_v12  ;;  %v582_v12 = vld [vmem:[%s2588_s15 + $0xd38] sm:$0xff] }
 0x331   : > { %v1575_v17 = vadd.f32 %v1574_v15, %v551_v14  ;;  %v583_v14 = vld [vmem:[%s2588_s15 + $0xd40] sm:$0xff] }
 0x333   : > { %v1576_v19 = vadd.f32 %v1575_v17, %v552_v16  ;;  %v584_v16 = vld [vmem:[%s2588_s15 + $0xd48] sm:$0xff] }
 0x335   : > { %v1577_v21 = vadd.f32 %v1576_v19, %v553_v18  ;;  %v585_v18 = vld [vmem:[%s2588_s15 + $0xd50] sm:$0xff] }
 0x337   : > { %v1578_v23 = vadd.f32 %v1577_v21, %v554_v20  ;;  %v586_v20 = vld [vmem:[%s2588_s15 + $0xd58] sm:$0xff] }
 0x339   : > { %v1579_v25 = vadd.f32 %v1578_v23, %v555_v22  ;;  %v587_v22 = vld [vmem:[%s2588_s15 + $0xd60] sm:$0xff] }
 0x33b   : > { %v1580_v27 = vadd.f32 %v1579_v25, %v556_v24  ;;  %v588_v24 = vld [vmem:[%s2588_s15 + $0xd68] sm:$0xff] }
 0x33d   : > { %v1581_v29 = vadd.f32 %v1580_v27, %v557_v26  ;;  %v589_v26 = vld [vmem:[%s2588_s15 + $0xd70] sm:$0xff] }
 0x33f   : > { %v1582_v31 = vadd.f32 %v1581_v29, %v558_v28  ;;  %v590_v28 = vld [vmem:[%s2588_s15 + $0xd78] sm:$0xff] }
 0x341   : > { %v1583_v33 = vadd.f32 %v1582_v31, %v559_v30  ;;  %v591_v30 = vld [vmem:[%s2588_s15 + $0xd80] sm:$0xff] }
 0x343   : > { %v1584_v35 = vadd.f32 %v1583_v33, %v560_v32  ;;  %v592_v32 = vld [vmem:[%s2588_s15 + $0xd88] sm:$0xff] }
 0x345   : > { %v1585_v37 = vadd.f32 %v1584_v35, %v561_v34  ;;  %v593_v34 = vld [vmem:[%s2588_s15 + $0xd90] sm:$0xff] }
 0x347   : > { %v1586_v39 = vadd.f32 %v1585_v37, %v562_v36  ;;  %v594_v36 = vld [vmem:[%s2588_s15 + $0xd98] sm:$0xff] }
 0x349   : > { %v1587_v41 = vadd.f32 %v1586_v39, %v563_v38  ;;  %v595_v38 = vld [vmem:[%s2588_s15 + $0xda0] sm:$0xff] }
 0x34b   : > { %v1588_v43 = vadd.f32 %v1587_v41, %v564_v40  ;;  %v596_v40 = vld [vmem:[%s2588_s15 + $0xda8] sm:$0xff] }
 0x34d   : > { %v1589_v45 = vadd.f32 %v1588_v43, %v565_v42  ;;  %v597_v42 = vld [vmem:[%s2588_s15 + $0xdb0] sm:$0xff] }
 0x34f   : > { %v1590_v47 = vadd.f32 %v1589_v45, %v566_v44  ;;  %v598_v44 = vld [vmem:[%s2588_s15 + $0xdb8] sm:$0xff] }
 0x351   : > { %v1591_v49 = vadd.f32 %v1590_v47, %v567_v46  ;;  %v599_v46 = vld [vmem:[%s2588_s15 + $0xdc0] sm:$0xff] }
 0x353   : > { %v1592_v51 = vadd.f32 %v1591_v49, %v568_v48  ;;  %v600_v48 = vld [vmem:[%s2588_s15 + $0xdc8] sm:$0xff] }
 0x355   : > { %v1593_v53 = vadd.f32 %v1592_v51, %v569_v50  ;;  %v601_v50 = vld [vmem:[%s2588_s15 + $0xdd0] sm:$0xff] }
 0x357   : > { %v1594_v55 = vadd.f32 %v1593_v53, %v570_v52  ;;  %v602_v52 = vld [vmem:[%s2588_s15 + $0xdd8] sm:$0xff] }
 0x359   : > { %v1595_v57 = vadd.f32 %v1594_v55, %v571_v54  ;;  %v603_v54 = vld [vmem:[%s2588_s15 + $0xde0] sm:$0xff] }
 0x35b   : > { %v1596_v59 = vadd.f32 %v1595_v57, %v572_v56  ;;  %v604_v56 = vld [vmem:[%s2588_s15 + $0xde8] sm:$0xff] }
 0x35d   : > { %v1597_v61 = vadd.f32 %v1596_v59, %v573_v58  ;;  %v605_v58 = vld [vmem:[%s2588_s15 + $0xdf0] sm:$0xff] }
 0x35f   : > { %v1598_v63 = vadd.f32 %v1597_v61, %v574_v60  ;;  %v606_v60 = vld [vmem:[%s2588_s15 + $0xdf8] sm:$0xff] }
 0x361   : > { %v1599_v1 = vadd.f32 %v1598_v63, %v575_v62  ;;  %v607_v62 = vld [vmem:[%s2588_s15 + $0xe00] sm:$0xff] }
 0x363   : > { %v1600_v3 = vadd.f32 %v1599_v1, %v576_v0  ;;  %v608_v0 = vld [vmem:[%s2588_s15 + $0xe08] sm:$0xff] }
 0x365   : > { %v1601_v5 = vadd.f32 %v1600_v3, %v577_v2  ;;  %v609_v2 = vld [vmem:[%s2588_s15 + $0xe10] sm:$0xff] }
 0x367   : > { %v1602_v7 = vadd.f32 %v1601_v5, %v578_v4  ;;  %v610_v4 = vld [vmem:[%s2588_s15 + $0xe18] sm:$0xff] }
 0x369   : > { %v1603_v9 = vadd.f32 %v1602_v7, %v579_v6  ;;  %v611_v6 = vld [vmem:[%s2588_s15 + $0xe20] sm:$0xff] }
 0x36b   : > { %v1604_v11 = vadd.f32 %v1603_v9, %v580_v8  ;;  %v612_v8 = vld [vmem:[%s2588_s15 + $0xe28] sm:$0xff] }
 0x36d   : > { %v1605_v13 = vadd.f32 %v1604_v11, %v581_v10  ;;  %v613_v10 = vld [vmem:[%s2588_s15 + $0xe30] sm:$0xff] }
 0x36f   : > { %v1606_v15 = vadd.f32 %v1605_v13, %v582_v12  ;;  %v614_v12 = vld [vmem:[%s2588_s15 + $0xe38] sm:$0xff] }
 0x371   : > { %v1607_v17 = vadd.f32 %v1606_v15, %v583_v14  ;;  %v615_v14 = vld [vmem:[%s2588_s15 + $0xe40] sm:$0xff] }
 0x373   : > { %v1608_v19 = vadd.f32 %v1607_v17, %v584_v16  ;;  %v616_v16 = vld [vmem:[%s2588_s15 + $0xe48] sm:$0xff] }
 0x375   : > { %v1609_v21 = vadd.f32 %v1608_v19, %v585_v18  ;;  %v617_v18 = vld [vmem:[%s2588_s15 + $0xe50] sm:$0xff] }
 0x377   : > { %v1610_v23 = vadd.f32 %v1609_v21, %v586_v20  ;;  %v618_v20 = vld [vmem:[%s2588_s15 + $0xe58] sm:$0xff] }
 0x379   : > { %v1611_v25 = vadd.f32 %v1610_v23, %v587_v22  ;;  %v619_v22 = vld [vmem:[%s2588_s15 + $0xe60] sm:$0xff] }
 0x37b   : > { %v1612_v27 = vadd.f32 %v1611_v25, %v588_v24  ;;  %v620_v24 = vld [vmem:[%s2588_s15 + $0xe68] sm:$0xff] }
 0x37d   : > { %v1613_v29 = vadd.f32 %v1612_v27, %v589_v26  ;;  %v621_v26 = vld [vmem:[%s2588_s15 + $0xe70] sm:$0xff] }
 0x37f   : > { %v1614_v31 = vadd.f32 %v1613_v29, %v590_v28  ;;  %v622_v28 = vld [vmem:[%s2588_s15 + $0xe78] sm:$0xff] }
 0x381   : > { %v1615_v33 = vadd.f32 %v1614_v31, %v591_v30  ;;  %v623_v30 = vld [vmem:[%s2588_s15 + $0xe80] sm:$0xff] }
 0x383   : > { %v1616_v35 = vadd.f32 %v1615_v33, %v592_v32  ;;  %v624_v32 = vld [vmem:[%s2588_s15 + $0xe88] sm:$0xff] }
 0x385   : > { %v1617_v37 = vadd.f32 %v1616_v35, %v593_v34  ;;  %v625_v34 = vld [vmem:[%s2588_s15 + $0xe90] sm:$0xff] }
 0x387   : > { %v1618_v39 = vadd.f32 %v1617_v37, %v594_v36  ;;  %v626_v36 = vld [vmem:[%s2588_s15 + $0xe98] sm:$0xff] }
 0x389   : > { %v1619_v41 = vadd.f32 %v1618_v39, %v595_v38  ;;  %v627_v38 = vld [vmem:[%s2588_s15 + $0xea0] sm:$0xff] }
 0x38b   : > { %v1620_v43 = vadd.f32 %v1619_v41, %v596_v40  ;;  %v628_v40 = vld [vmem:[%s2588_s15 + $0xea8] sm:$0xff] }
 0x38d   : > { %v1621_v45 = vadd.f32 %v1620_v43, %v597_v42  ;;  %v629_v42 = vld [vmem:[%s2588_s15 + $0xeb0] sm:$0xff] }
 0x38f   : > { %v1622_v47 = vadd.f32 %v1621_v45, %v598_v44  ;;  %v630_v44 = vld [vmem:[%s2588_s15 + $0xeb8] sm:$0xff] }
 0x391   : > { %v1623_v49 = vadd.f32 %v1622_v47, %v599_v46  ;;  %v631_v46 = vld [vmem:[%s2588_s15 + $0xec0] sm:$0xff] }
 0x393   : > { %v1624_v51 = vadd.f32 %v1623_v49, %v600_v48  ;;  %v632_v48 = vld [vmem:[%s2588_s15 + $0xec8] sm:$0xff] }
 0x395   : > { %v1625_v53 = vadd.f32 %v1624_v51, %v601_v50  ;;  %v633_v50 = vld [vmem:[%s2588_s15 + $0xed0] sm:$0xff] }
 0x397   : > { %v1626_v55 = vadd.f32 %v1625_v53, %v602_v52  ;;  %v634_v52 = vld [vmem:[%s2588_s15 + $0xed8] sm:$0xff] }
 0x399   : > { %v1627_v57 = vadd.f32 %v1626_v55, %v603_v54  ;;  %v635_v54 = vld [vmem:[%s2588_s15 + $0xee0] sm:$0xff] }
 0x39b   : > { %v1628_v59 = vadd.f32 %v1627_v57, %v604_v56  ;;  %v636_v56 = vld [vmem:[%s2588_s15 + $0xee8] sm:$0xff] }
 0x39d   : > { %v1629_v61 = vadd.f32 %v1628_v59, %v605_v58  ;;  %v637_v58 = vld [vmem:[%s2588_s15 + $0xef0] sm:$0xff] }
 0x39f   : > { %v1630_v63 = vadd.f32 %v1629_v61, %v606_v60  ;;  %v638_v60 = vld [vmem:[%s2588_s15 + $0xef8] sm:$0xff] }
 0x3a1   : > { %v1631_v1 = vadd.f32 %v1630_v63, %v607_v62  ;;  %v639_v62 = vld [vmem:[%s2588_s15 + $0xf00] sm:$0xff] }
 0x3a3   : > { %v1632_v3 = vadd.f32 %v1631_v1, %v608_v0  ;;  %v640_v0 = vld [vmem:[%s2588_s15 + $0xf08] sm:$0xff] }
 0x3a5   : > { %v1633_v5 = vadd.f32 %v1632_v3, %v609_v2  ;;  %v641_v2 = vld [vmem:[%s2588_s15 + $0xf10] sm:$0xff] }
 0x3a7   : > { %v1634_v7 = vadd.f32 %v1633_v5, %v610_v4  ;;  %v642_v4 = vld [vmem:[%s2588_s15 + $0xf18] sm:$0xff] }
 0x3a9   : > { %v1635_v9 = vadd.f32 %v1634_v7, %v611_v6  ;;  %v643_v6 = vld [vmem:[%s2588_s15 + $0xf20] sm:$0xff] }
 0x3ab   : > { %v1636_v11 = vadd.f32 %v1635_v9, %v612_v8  ;;  %v644_v8 = vld [vmem:[%s2588_s15 + $0xf28] sm:$0xff] }
 0x3ad   : > { %v1637_v13 = vadd.f32 %v1636_v11, %v613_v10  ;;  %v645_v10 = vld [vmem:[%s2588_s15 + $0xf30] sm:$0xff] }
 0x3af   : > { %v1638_v15 = vadd.f32 %v1637_v13, %v614_v12  ;;  %v646_v12 = vld [vmem:[%s2588_s15 + $0xf38] sm:$0xff] }
 0x3b1   : > { %v1639_v17 = vadd.f32 %v1638_v15, %v615_v14  ;;  %v647_v14 = vld [vmem:[%s2588_s15 + $0xf40] sm:$0xff] }
 0x3b3   : > { %v1640_v19 = vadd.f32 %v1639_v17, %v616_v16  ;;  %v648_v16 = vld [vmem:[%s2588_s15 + $0xf48] sm:$0xff] }
 0x3b5   : > { %v1641_v21 = vadd.f32 %v1640_v19, %v617_v18  ;;  %v649_v18 = vld [vmem:[%s2588_s15 + $0xf50] sm:$0xff] }
 0x3b7   : > { %v1642_v23 = vadd.f32 %v1641_v21, %v618_v20  ;;  %v650_v20 = vld [vmem:[%s2588_s15 + $0xf58] sm:$0xff] }
 0x3b9   : > { %v1643_v25 = vadd.f32 %v1642_v23, %v619_v22  ;;  %v651_v22 = vld [vmem:[%s2588_s15 + $0xf60] sm:$0xff] }
 0x3bb   : > { %v1644_v27 = vadd.f32 %v1643_v25, %v620_v24  ;;  %v652_v24 = vld [vmem:[%s2588_s15 + $0xf68] sm:$0xff] }
 0x3bd   : > { %v1645_v29 = vadd.f32 %v1644_v27, %v621_v26  ;;  %v653_v26 = vld [vmem:[%s2588_s15 + $0xf70] sm:$0xff] }
 0x3bf   : > { %v1646_v31 = vadd.f32 %v1645_v29, %v622_v28  ;;  %v654_v28 = vld [vmem:[%s2588_s15 + $0xf78] sm:$0xff] }
 0x3c1   : > { %v1647_v33 = vadd.f32 %v1646_v31, %v623_v30  ;;  %v655_v30 = vld [vmem:[%s2588_s15 + $0xf80] sm:$0xff] }
 0x3c3   : > { %v1648_v35 = vadd.f32 %v1647_v33, %v624_v32  ;;  %v656_v32 = vld [vmem:[%s2588_s15 + $0xf88] sm:$0xff] }
 0x3c5   : > { %v1649_v37 = vadd.f32 %v1648_v35, %v625_v34  ;;  %v657_v34 = vld [vmem:[%s2588_s15 + $0xf90] sm:$0xff] }
 0x3c7   : > { %v1650_v39 = vadd.f32 %v1649_v37, %v626_v36  ;;  %v658_v36 = vld [vmem:[%s2588_s15 + $0xf98] sm:$0xff] }
 0x3c9   : > { %v1651_v41 = vadd.f32 %v1650_v39, %v627_v38  ;;  %v659_v38 = vld [vmem:[%s2588_s15 + $0xfa0] sm:$0xff] }
 0x3cb   : > { %v1652_v43 = vadd.f32 %v1651_v41, %v628_v40  ;;  %v660_v40 = vld [vmem:[%s2588_s15 + $0xfa8] sm:$0xff] }
 0x3cd   : > { %v1653_v45 = vadd.f32 %v1652_v43, %v629_v42  ;;  %v661_v42 = vld [vmem:[%s2588_s15 + $0xfb0] sm:$0xff] }
 0x3cf   : > { %v1654_v47 = vadd.f32 %v1653_v45, %v630_v44  ;;  %v662_v44 = vld [vmem:[%s2588_s15 + $0xfb8] sm:$0xff] }
 0x3d1   : > { %v1655_v49 = vadd.f32 %v1654_v47, %v631_v46  ;;  %v663_v46 = vld [vmem:[%s2588_s15 + $0xfc0] sm:$0xff] }
 0x3d3   : > { %v1656_v51 = vadd.f32 %v1655_v49, %v632_v48  ;;  %v664_v48 = vld [vmem:[%s2588_s15 + $0xfc8] sm:$0xff] }
 0x3d5   : > { %v1657_v53 = vadd.f32 %v1656_v51, %v633_v50  ;;  %v665_v50 = vld [vmem:[%s2588_s15 + $0xfd0] sm:$0xff] }
 0x3d7   : > { %v1658_v55 = vadd.f32 %v1657_v53, %v634_v52  ;;  %v666_v52 = vld [vmem:[%s2588_s15 + $0xfd8] sm:$0xff] }
 0x3d9   : > { %v1659_v57 = vadd.f32 %v1658_v55, %v635_v54  ;;  %v667_v54 = vld [vmem:[%s2588_s15 + $0xfe0] sm:$0xff] }
 0x3db   : > { %v1660_v59 = vadd.f32 %v1659_v57, %v636_v56  ;;  %v668_v56 = vld [vmem:[%s2588_s15 + $0xfe8] sm:$0xff] }
 0x3dd   : > { %v1661_v61 = vadd.f32 %v1660_v59, %v637_v58  ;;  %v669_v58 = vld [vmem:[%s2588_s15 + $0xff0] sm:$0xff] }
 0x3df   : > { %v1662_v63 = vadd.f32 %v1661_v61, %v638_v60  ;;  %v670_v60 = vld [vmem:[%s2588_s15 + $0xff8] sm:$0xff] }
 0x3e1   : > { %v1663_v1 = vadd.f32 %v1662_v63, %v639_v62  ;;  %v671_v62 = vld [vmem:[%s2588_s15 + $0x1000] sm:$0xff] }
 0x3e3   : > { %v1664_v3 = vadd.f32 %v1663_v1, %v640_v0  ;;  %v672_v0 = vld [vmem:[%s2588_s15 + $0x1008] sm:$0xff] }
 0x3e5   : > { %v1665_v5 = vadd.f32 %v1664_v3, %v641_v2  ;;  %v673_v2 = vld [vmem:[%s2588_s15 + $0x1010] sm:$0xff] }
 0x3e7   : > { %v1666_v7 = vadd.f32 %v1665_v5, %v642_v4  ;;  %v674_v4 = vld [vmem:[%s2588_s15 + $0x1018] sm:$0xff] }
 0x3e9   : > { %v1667_v9 = vadd.f32 %v1666_v7, %v643_v6  ;;  %v675_v6 = vld [vmem:[%s2588_s15 + $0x1020] sm:$0xff] }
 0x3eb   : > { %v1668_v11 = vadd.f32 %v1667_v9, %v644_v8  ;;  %v676_v8 = vld [vmem:[%s2588_s15 + $0x1028] sm:$0xff] }
 0x3ed   : > { %v1669_v13 = vadd.f32 %v1668_v11, %v645_v10  ;;  %v677_v10 = vld [vmem:[%s2588_s15 + $0x1030] sm:$0xff] }
 0x3ef   : > { %v1670_v15 = vadd.f32 %v1669_v13, %v646_v12  ;;  %v678_v12 = vld [vmem:[%s2588_s15 + $0x1038] sm:$0xff] }
 0x3f1   : > { %v1671_v17 = vadd.f32 %v1670_v15, %v647_v14  ;;  %v679_v14 = vld [vmem:[%s2588_s15 + $0x1040] sm:$0xff] }
 0x3f3   : > { %v1672_v19 = vadd.f32 %v1671_v17, %v648_v16  ;;  %v680_v16 = vld [vmem:[%s2588_s15 + $0x1048] sm:$0xff] }
 0x3f5   : > { %v1673_v21 = vadd.f32 %v1672_v19, %v649_v18  ;;  %v681_v18 = vld [vmem:[%s2588_s15 + $0x1050] sm:$0xff] }
 0x3f7   : > { %v1674_v23 = vadd.f32 %v1673_v21, %v650_v20  ;;  %v682_v20 = vld [vmem:[%s2588_s15 + $0x1058] sm:$0xff] }
 0x3f9   : > { %v1675_v25 = vadd.f32 %v1674_v23, %v651_v22  ;;  %v683_v22 = vld [vmem:[%s2588_s15 + $0x1060] sm:$0xff] }
 0x3fb   : > { %v1676_v27 = vadd.f32 %v1675_v25, %v652_v24  ;;  %v684_v24 = vld [vmem:[%s2588_s15 + $0x1068] sm:$0xff] }
 0x3fd   : > { %v1677_v29 = vadd.f32 %v1676_v27, %v653_v26  ;;  %v685_v26 = vld [vmem:[%s2588_s15 + $0x1070] sm:$0xff] }
 0x3ff   : > { %v1678_v31 = vadd.f32 %v1677_v29, %v654_v28  ;;  %v686_v28 = vld [vmem:[%s2588_s15 + $0x1078] sm:$0xff] }
 0x401   : > { %v1679_v33 = vadd.f32 %v1678_v31, %v655_v30  ;;  %v687_v30 = vld [vmem:[%s2588_s15 + $0x1080] sm:$0xff] }
 0x403   : > { %v1680_v35 = vadd.f32 %v1679_v33, %v656_v32  ;;  %v688_v32 = vld [vmem:[%s2588_s15 + $0x1088] sm:$0xff] }
 0x405   : > { %v1681_v37 = vadd.f32 %v1680_v35, %v657_v34  ;;  %v689_v34 = vld [vmem:[%s2588_s15 + $0x1090] sm:$0xff] }
 0x407   : > { %v1682_v39 = vadd.f32 %v1681_v37, %v658_v36  ;;  %v690_v36 = vld [vmem:[%s2588_s15 + $0x1098] sm:$0xff] }
 0x409   : > { %v1683_v41 = vadd.f32 %v1682_v39, %v659_v38  ;;  %v691_v38 = vld [vmem:[%s2588_s15 + $0x10a0] sm:$0xff] }
 0x40b   : > { %v1684_v43 = vadd.f32 %v1683_v41, %v660_v40  ;;  %v692_v40 = vld [vmem:[%s2588_s15 + $0x10a8] sm:$0xff] }
 0x40d   : > { %v1685_v45 = vadd.f32 %v1684_v43, %v661_v42  ;;  %v693_v42 = vld [vmem:[%s2588_s15 + $0x10b0] sm:$0xff] }
 0x40f   : > { %v1686_v47 = vadd.f32 %v1685_v45, %v662_v44  ;;  %v694_v44 = vld [vmem:[%s2588_s15 + $0x10b8] sm:$0xff] }
 0x411   : > { %v1687_v49 = vadd.f32 %v1686_v47, %v663_v46  ;;  %v695_v46 = vld [vmem:[%s2588_s15 + $0x10c0] sm:$0xff] }
 0x413   : > { %v1688_v51 = vadd.f32 %v1687_v49, %v664_v48  ;;  %v696_v48 = vld [vmem:[%s2588_s15 + $0x10c8] sm:$0xff] }
 0x415   : > { %v1689_v53 = vadd.f32 %v1688_v51, %v665_v50  ;;  %v697_v50 = vld [vmem:[%s2588_s15 + $0x10d0] sm:$0xff] }
 0x417   : > { %v1690_v55 = vadd.f32 %v1689_v53, %v666_v52  ;;  %v698_v52 = vld [vmem:[%s2588_s15 + $0x10d8] sm:$0xff] }
 0x419   : > { %v1691_v57 = vadd.f32 %v1690_v55, %v667_v54  ;;  %v699_v54 = vld [vmem:[%s2588_s15 + $0x10e0] sm:$0xff] }
 0x41b   : > { %v1692_v59 = vadd.f32 %v1691_v57, %v668_v56  ;;  %v700_v56 = vld [vmem:[%s2588_s15 + $0x10e8] sm:$0xff] }
 0x41d   : > { %v1693_v61 = vadd.f32 %v1692_v59, %v669_v58  ;;  %v701_v58 = vld [vmem:[%s2588_s15 + $0x10f0] sm:$0xff] }
 0x41f   : > { %v1694_v63 = vadd.f32 %v1693_v61, %v670_v60  ;;  %v702_v60 = vld [vmem:[%s2588_s15 + $0x10f8] sm:$0xff] }
 0x421   : > { %v1695_v1 = vadd.f32 %v1694_v63, %v671_v62  ;;  %v703_v62 = vld [vmem:[%s2588_s15 + $0x1100] sm:$0xff] }
 0x423   : > { %v1696_v3 = vadd.f32 %v1695_v1, %v672_v0  ;;  %v704_v0 = vld [vmem:[%s2588_s15 + $0x1108] sm:$0xff] }
 0x425   : > { %v1697_v5 = vadd.f32 %v1696_v3, %v673_v2  ;;  %v705_v2 = vld [vmem:[%s2588_s15 + $0x1110] sm:$0xff] }
 0x427   : > { %v1698_v7 = vadd.f32 %v1697_v5, %v674_v4  ;;  %v706_v4 = vld [vmem:[%s2588_s15 + $0x1118] sm:$0xff] }
 0x429   : > { %v1699_v9 = vadd.f32 %v1698_v7, %v675_v6  ;;  %v707_v6 = vld [vmem:[%s2588_s15 + $0x1120] sm:$0xff] }
 0x42b   : > { %v1700_v11 = vadd.f32 %v1699_v9, %v676_v8  ;;  %v708_v8 = vld [vmem:[%s2588_s15 + $0x1128] sm:$0xff] }
 0x42d   : > { %v1701_v13 = vadd.f32 %v1700_v11, %v677_v10  ;;  %v709_v10 = vld [vmem:[%s2588_s15 + $0x1130] sm:$0xff] }
 0x42f   : > { %v1702_v15 = vadd.f32 %v1701_v13, %v678_v12  ;;  %v710_v12 = vld [vmem:[%s2588_s15 + $0x1138] sm:$0xff] }
 0x431   : > { %v1703_v17 = vadd.f32 %v1702_v15, %v679_v14  ;;  %v711_v14 = vld [vmem:[%s2588_s15 + $0x1140] sm:$0xff] }
 0x433   : > { %v1704_v19 = vadd.f32 %v1703_v17, %v680_v16  ;;  %v712_v16 = vld [vmem:[%s2588_s15 + $0x1148] sm:$0xff] }
 0x435   : > { %v1705_v21 = vadd.f32 %v1704_v19, %v681_v18  ;;  %v713_v18 = vld [vmem:[%s2588_s15 + $0x1150] sm:$0xff] }
 0x437   : > { %v1706_v23 = vadd.f32 %v1705_v21, %v682_v20  ;;  %v714_v20 = vld [vmem:[%s2588_s15 + $0x1158] sm:$0xff] }
 0x439   : > { %v1707_v25 = vadd.f32 %v1706_v23, %v683_v22  ;;  %v715_v22 = vld [vmem:[%s2588_s15 + $0x1160] sm:$0xff] }
 0x43b   : > { %v1708_v27 = vadd.f32 %v1707_v25, %v684_v24  ;;  %v716_v24 = vld [vmem:[%s2588_s15 + $0x1168] sm:$0xff] }
 0x43d   : > { %v1709_v29 = vadd.f32 %v1708_v27, %v685_v26  ;;  %v717_v26 = vld [vmem:[%s2588_s15 + $0x1170] sm:$0xff] }
 0x43f   : > { %v1710_v31 = vadd.f32 %v1709_v29, %v686_v28  ;;  %v718_v28 = vld [vmem:[%s2588_s15 + $0x1178] sm:$0xff] }
 0x441   : > { %v1711_v33 = vadd.f32 %v1710_v31, %v687_v30  ;;  %v719_v30 = vld [vmem:[%s2588_s15 + $0x1180] sm:$0xff] }
 0x443   : > { %v1712_v35 = vadd.f32 %v1711_v33, %v688_v32  ;;  %v720_v32 = vld [vmem:[%s2588_s15 + $0x1188] sm:$0xff] }
 0x445   : > { %v1713_v37 = vadd.f32 %v1712_v35, %v689_v34  ;;  %v721_v34 = vld [vmem:[%s2588_s15 + $0x1190] sm:$0xff] }
 0x447   : > { %v1714_v39 = vadd.f32 %v1713_v37, %v690_v36  ;;  %v722_v36 = vld [vmem:[%s2588_s15 + $0x1198] sm:$0xff] }
 0x449   : > { %v1715_v41 = vadd.f32 %v1714_v39, %v691_v38  ;;  %v723_v38 = vld [vmem:[%s2588_s15 + $0x11a0] sm:$0xff] }
 0x44b   : > { %v1716_v43 = vadd.f32 %v1715_v41, %v692_v40  ;;  %v724_v40 = vld [vmem:[%s2588_s15 + $0x11a8] sm:$0xff] }
 0x44d   : > { %v1717_v45 = vadd.f32 %v1716_v43, %v693_v42  ;;  %v725_v42 = vld [vmem:[%s2588_s15 + $0x11b0] sm:$0xff] }
 0x44f   : > { %v1718_v47 = vadd.f32 %v1717_v45, %v694_v44  ;;  %v726_v44 = vld [vmem:[%s2588_s15 + $0x11b8] sm:$0xff] }
 0x451   : > { %v1719_v49 = vadd.f32 %v1718_v47, %v695_v46  ;;  %v727_v46 = vld [vmem:[%s2588_s15 + $0x11c0] sm:$0xff] }
 0x453   : > { %v1720_v51 = vadd.f32 %v1719_v49, %v696_v48  ;;  %v728_v48 = vld [vmem:[%s2588_s15 + $0x11c8] sm:$0xff] }
 0x455   : > { %v1721_v53 = vadd.f32 %v1720_v51, %v697_v50  ;;  %v729_v50 = vld [vmem:[%s2588_s15 + $0x11d0] sm:$0xff] }
 0x457   : > { %v1722_v55 = vadd.f32 %v1721_v53, %v698_v52  ;;  %v730_v52 = vld [vmem:[%s2588_s15 + $0x11d8] sm:$0xff] }
 0x459   : > { %v1723_v57 = vadd.f32 %v1722_v55, %v699_v54  ;;  %v731_v54 = vld [vmem:[%s2588_s15 + $0x11e0] sm:$0xff] }
 0x45b   : > { %v1724_v59 = vadd.f32 %v1723_v57, %v700_v56  ;;  %v732_v56 = vld [vmem:[%s2588_s15 + $0x11e8] sm:$0xff] }
 0x45d   : > { %v1725_v61 = vadd.f32 %v1724_v59, %v701_v58  ;;  %v733_v58 = vld [vmem:[%s2588_s15 + $0x11f0] sm:$0xff] }
 0x45f   : > { %v1726_v63 = vadd.f32 %v1725_v61, %v702_v60  ;;  %v734_v60 = vld [vmem:[%s2588_s15 + $0x11f8] sm:$0xff] }
 0x461   : > { %v1727_v1 = vadd.f32 %v1726_v63, %v703_v62  ;;  %v735_v62 = vld [vmem:[%s2588_s15 + $0x1200] sm:$0xff] }
 0x463   : > { %v1728_v3 = vadd.f32 %v1727_v1, %v704_v0  ;;  %v736_v0 = vld [vmem:[%s2588_s15 + $0x1208] sm:$0xff] }
 0x465   : > { %v1729_v5 = vadd.f32 %v1728_v3, %v705_v2  ;;  %v737_v2 = vld [vmem:[%s2588_s15 + $0x1210] sm:$0xff] }
 0x467   : > { %v1730_v7 = vadd.f32 %v1729_v5, %v706_v4  ;;  %v738_v4 = vld [vmem:[%s2588_s15 + $0x1218] sm:$0xff] }
 0x469   : > { %v1731_v9 = vadd.f32 %v1730_v7, %v707_v6  ;;  %v739_v6 = vld [vmem:[%s2588_s15 + $0x1220] sm:$0xff] }
 0x46b   : > { %v1732_v11 = vadd.f32 %v1731_v9, %v708_v8  ;;  %v740_v8 = vld [vmem:[%s2588_s15 + $0x1228] sm:$0xff] }
 0x46d   : > { %v1733_v13 = vadd.f32 %v1732_v11, %v709_v10  ;;  %v741_v10 = vld [vmem:[%s2588_s15 + $0x1230] sm:$0xff] }
 0x46f   : > { %v1734_v15 = vadd.f32 %v1733_v13, %v710_v12  ;;  %v742_v12 = vld [vmem:[%s2588_s15 + $0x1238] sm:$0xff] }
 0x471   : > { %v1735_v17 = vadd.f32 %v1734_v15, %v711_v14  ;;  %v743_v14 = vld [vmem:[%s2588_s15 + $0x1240] sm:$0xff] }
 0x473   : > { %v1736_v19 = vadd.f32 %v1735_v17, %v712_v16  ;;  %v744_v16 = vld [vmem:[%s2588_s15 + $0x1248] sm:$0xff] }
 0x475   : > { %v1737_v21 = vadd.f32 %v1736_v19, %v713_v18  ;;  %v745_v18 = vld [vmem:[%s2588_s15 + $0x1250] sm:$0xff] }
 0x477   : > { %v1738_v23 = vadd.f32 %v1737_v21, %v714_v20  ;;  %v746_v20 = vld [vmem:[%s2588_s15 + $0x1258] sm:$0xff] }
 0x479   : > { %v1739_v25 = vadd.f32 %v1738_v23, %v715_v22  ;;  %v747_v22 = vld [vmem:[%s2588_s15 + $0x1260] sm:$0xff] }
 0x47b   : > { %v1740_v27 = vadd.f32 %v1739_v25, %v716_v24  ;;  %v748_v24 = vld [vmem:[%s2588_s15 + $0x1268] sm:$0xff] }
 0x47d   : > { %v1741_v29 = vadd.f32 %v1740_v27, %v717_v26  ;;  %v749_v26 = vld [vmem:[%s2588_s15 + $0x1270] sm:$0xff] }
 0x47f   : > { %v1742_v31 = vadd.f32 %v1741_v29, %v718_v28  ;;  %v750_v28 = vld [vmem:[%s2588_s15 + $0x1278] sm:$0xff] }
 0x481   : > { %v1743_v33 = vadd.f32 %v1742_v31, %v719_v30  ;;  %v751_v30 = vld [vmem:[%s2588_s15 + $0x1280] sm:$0xff] }
 0x483   : > { %v1744_v35 = vadd.f32 %v1743_v33, %v720_v32  ;;  %v752_v32 = vld [vmem:[%s2588_s15 + $0x1288] sm:$0xff] }
 0x485   : > { %v1745_v37 = vadd.f32 %v1744_v35, %v721_v34  ;;  %v753_v34 = vld [vmem:[%s2588_s15 + $0x1290] sm:$0xff] }
 0x487   : > { %v1746_v39 = vadd.f32 %v1745_v37, %v722_v36  ;;  %v754_v36 = vld [vmem:[%s2588_s15 + $0x1298] sm:$0xff] }
 0x489   : > { %v1747_v41 = vadd.f32 %v1746_v39, %v723_v38  ;;  %v755_v38 = vld [vmem:[%s2588_s15 + $0x12a0] sm:$0xff] }
 0x48b   : > { %v1748_v43 = vadd.f32 %v1747_v41, %v724_v40  ;;  %v756_v40 = vld [vmem:[%s2588_s15 + $0x12a8] sm:$0xff] }
 0x48d   : > { %v1749_v45 = vadd.f32 %v1748_v43, %v725_v42  ;;  %v757_v42 = vld [vmem:[%s2588_s15 + $0x12b0] sm:$0xff] }
 0x48f   : > { %v1750_v47 = vadd.f32 %v1749_v45, %v726_v44  ;;  %v758_v44 = vld [vmem:[%s2588_s15 + $0x12b8] sm:$0xff] }
 0x491   : > { %v1751_v49 = vadd.f32 %v1750_v47, %v727_v46  ;;  %v759_v46 = vld [vmem:[%s2588_s15 + $0x12c0] sm:$0xff] }
 0x493   : > { %v1752_v51 = vadd.f32 %v1751_v49, %v728_v48  ;;  %v760_v48 = vld [vmem:[%s2588_s15 + $0x12c8] sm:$0xff] }
 0x495   : > { %v1753_v53 = vadd.f32 %v1752_v51, %v729_v50  ;;  %v761_v50 = vld [vmem:[%s2588_s15 + $0x12d0] sm:$0xff] }
 0x497   : > { %v1754_v55 = vadd.f32 %v1753_v53, %v730_v52  ;;  %v762_v52 = vld [vmem:[%s2588_s15 + $0x12d8] sm:$0xff] }
 0x499   : > { %v1755_v57 = vadd.f32 %v1754_v55, %v731_v54  ;;  %v763_v54 = vld [vmem:[%s2588_s15 + $0x12e0] sm:$0xff] }
 0x49b   : > { %v1756_v59 = vadd.f32 %v1755_v57, %v732_v56  ;;  %v764_v56 = vld [vmem:[%s2588_s15 + $0x12e8] sm:$0xff] }
 0x49d   : > { %v1757_v61 = vadd.f32 %v1756_v59, %v733_v58  ;;  %v765_v58 = vld [vmem:[%s2588_s15 + $0x12f0] sm:$0xff] }
 0x49f   : > { %v1758_v63 = vadd.f32 %v1757_v61, %v734_v60  ;;  %v766_v60 = vld [vmem:[%s2588_s15 + $0x12f8] sm:$0xff] }
 0x4a1   : > { %v1759_v1 = vadd.f32 %v1758_v63, %v735_v62  ;;  %v767_v62 = vld [vmem:[%s2588_s15 + $0x1300] sm:$0xff] }
 0x4a3   : > { %v1760_v3 = vadd.f32 %v1759_v1, %v736_v0  ;;  %v768_v0 = vld [vmem:[%s2588_s15 + $0x1308] sm:$0xff] }
 0x4a5   : > { %v1761_v5 = vadd.f32 %v1760_v3, %v737_v2  ;;  %v769_v2 = vld [vmem:[%s2588_s15 + $0x1310] sm:$0xff] }
 0x4a7   : > { %v1762_v7 = vadd.f32 %v1761_v5, %v738_v4  ;;  %v770_v4 = vld [vmem:[%s2588_s15 + $0x1318] sm:$0xff] }
 0x4a9   : > { %v1763_v9 = vadd.f32 %v1762_v7, %v739_v6  ;;  %v771_v6 = vld [vmem:[%s2588_s15 + $0x1320] sm:$0xff] }
 0x4ab   : > { %v1764_v11 = vadd.f32 %v1763_v9, %v740_v8  ;;  %v772_v8 = vld [vmem:[%s2588_s15 + $0x1328] sm:$0xff] }
 0x4ad   : > { %v1765_v13 = vadd.f32 %v1764_v11, %v741_v10  ;;  %v773_v10 = vld [vmem:[%s2588_s15 + $0x1330] sm:$0xff] }
 0x4af   : > { %v1766_v15 = vadd.f32 %v1765_v13, %v742_v12  ;;  %v774_v12 = vld [vmem:[%s2588_s15 + $0x1338] sm:$0xff] }
 0x4b1   : > { %v1767_v17 = vadd.f32 %v1766_v15, %v743_v14  ;;  %v775_v14 = vld [vmem:[%s2588_s15 + $0x1340] sm:$0xff] }
 0x4b3   : > { %v1768_v19 = vadd.f32 %v1767_v17, %v744_v16  ;;  %v776_v16 = vld [vmem:[%s2588_s15 + $0x1348] sm:$0xff] }
 0x4b5   : > { %v1769_v21 = vadd.f32 %v1768_v19, %v745_v18  ;;  %v777_v18 = vld [vmem:[%s2588_s15 + $0x1350] sm:$0xff] }
 0x4b7   : > { %v1770_v23 = vadd.f32 %v1769_v21, %v746_v20  ;;  %v778_v20 = vld [vmem:[%s2588_s15 + $0x1358] sm:$0xff] }
 0x4b9   : > { %v1771_v25 = vadd.f32 %v1770_v23, %v747_v22  ;;  %v779_v22 = vld [vmem:[%s2588_s15 + $0x1360] sm:$0xff] }
 0x4bb   : > { %v1772_v27 = vadd.f32 %v1771_v25, %v748_v24  ;;  %v780_v24 = vld [vmem:[%s2588_s15 + $0x1368] sm:$0xff] }
 0x4bd   : > { %v1773_v29 = vadd.f32 %v1772_v27, %v749_v26  ;;  %v781_v26 = vld [vmem:[%s2588_s15 + $0x1370] sm:$0xff] }
 0x4bf   : > { %v1774_v31 = vadd.f32 %v1773_v29, %v750_v28  ;;  %v782_v28 = vld [vmem:[%s2588_s15 + $0x1378] sm:$0xff] }
 0x4c1   : > { %v1775_v33 = vadd.f32 %v1774_v31, %v751_v30  ;;  %v783_v30 = vld [vmem:[%s2588_s15 + $0x1380] sm:$0xff] }
 0x4c3   : > { %v1776_v35 = vadd.f32 %v1775_v33, %v752_v32  ;;  %v784_v32 = vld [vmem:[%s2588_s15 + $0x1388] sm:$0xff] }
 0x4c5   : > { %v1777_v37 = vadd.f32 %v1776_v35, %v753_v34  ;;  %v785_v34 = vld [vmem:[%s2588_s15 + $0x1390] sm:$0xff] }
 0x4c7   : > { %v1778_v39 = vadd.f32 %v1777_v37, %v754_v36  ;;  %v786_v36 = vld [vmem:[%s2588_s15 + $0x1398] sm:$0xff] }
 0x4c9   : > { %v1779_v41 = vadd.f32 %v1778_v39, %v755_v38  ;;  %v787_v38 = vld [vmem:[%s2588_s15 + $0x13a0] sm:$0xff] }
 0x4cb   : > { %v1780_v43 = vadd.f32 %v1779_v41, %v756_v40  ;;  %v788_v40 = vld [vmem:[%s2588_s15 + $0x13a8] sm:$0xff] }
 0x4cd   : > { %v1781_v45 = vadd.f32 %v1780_v43, %v757_v42  ;;  %v789_v42 = vld [vmem:[%s2588_s15 + $0x13b0] sm:$0xff] }
 0x4cf   : > { %v1782_v47 = vadd.f32 %v1781_v45, %v758_v44  ;;  %v790_v44 = vld [vmem:[%s2588_s15 + $0x13b8] sm:$0xff] }
 0x4d1   : > { %v1783_v49 = vadd.f32 %v1782_v47, %v759_v46  ;;  %v791_v46 = vld [vmem:[%s2588_s15 + $0x13c0] sm:$0xff] }
 0x4d3   : > { %v1784_v51 = vadd.f32 %v1783_v49, %v760_v48  ;;  %v792_v48 = vld [vmem:[%s2588_s15 + $0x13c8] sm:$0xff] }
 0x4d5   : > { %v1785_v53 = vadd.f32 %v1784_v51, %v761_v50  ;;  %v793_v50 = vld [vmem:[%s2588_s15 + $0x13d0] sm:$0xff] }
 0x4d7   : > { %v1786_v55 = vadd.f32 %v1785_v53, %v762_v52  ;;  %v794_v52 = vld [vmem:[%s2588_s15 + $0x13d8] sm:$0xff] }
 0x4d9   : > { %v1787_v57 = vadd.f32 %v1786_v55, %v763_v54  ;;  %v795_v54 = vld [vmem:[%s2588_s15 + $0x13e0] sm:$0xff] }
 0x4db   : > { %v1788_v59 = vadd.f32 %v1787_v57, %v764_v56  ;;  %v796_v56 = vld [vmem:[%s2588_s15 + $0x13e8] sm:$0xff] }
 0x4dd   : > { %v1789_v61 = vadd.f32 %v1788_v59, %v765_v58  ;;  %v797_v58 = vld [vmem:[%s2588_s15 + $0x13f0] sm:$0xff] }
 0x4df   : > { %v1790_v63 = vadd.f32 %v1789_v61, %v766_v60  ;;  %v798_v60 = vld [vmem:[%s2588_s15 + $0x13f8] sm:$0xff] }
 0x4e1   : > { %v1791_v1 = vadd.f32 %v1790_v63, %v767_v62  ;;  %v799_v62 = vld [vmem:[%s2588_s15 + $0x1400] sm:$0xff] }
 0x4e3   : > { %v1792_v3 = vadd.f32 %v1791_v1, %v768_v0  ;;  %v800_v0 = vld [vmem:[%s2588_s15 + $0x1408] sm:$0xff] }
 0x4e5   : > { %v1793_v5 = vadd.f32 %v1792_v3, %v769_v2  ;;  %v801_v2 = vld [vmem:[%s2588_s15 + $0x1410] sm:$0xff] }
 0x4e7   : > { %v1794_v7 = vadd.f32 %v1793_v5, %v770_v4  ;;  %v802_v4 = vld [vmem:[%s2588_s15 + $0x1418] sm:$0xff] }
 0x4e9   : > { %v1795_v9 = vadd.f32 %v1794_v7, %v771_v6  ;;  %v803_v6 = vld [vmem:[%s2588_s15 + $0x1420] sm:$0xff] }
 0x4eb   : > { %v1796_v11 = vadd.f32 %v1795_v9, %v772_v8  ;;  %v804_v8 = vld [vmem:[%s2588_s15 + $0x1428] sm:$0xff] }
 0x4ed   : > { %v1797_v13 = vadd.f32 %v1796_v11, %v773_v10  ;;  %v805_v10 = vld [vmem:[%s2588_s15 + $0x1430] sm:$0xff] }
 0x4ef   : > { %v1798_v15 = vadd.f32 %v1797_v13, %v774_v12  ;;  %v806_v12 = vld [vmem:[%s2588_s15 + $0x1438] sm:$0xff] }
 0x4f1   : > { %v1799_v17 = vadd.f32 %v1798_v15, %v775_v14  ;;  %v807_v14 = vld [vmem:[%s2588_s15 + $0x1440] sm:$0xff] }
 0x4f3   : > { %v1800_v19 = vadd.f32 %v1799_v17, %v776_v16  ;;  %v808_v16 = vld [vmem:[%s2588_s15 + $0x1448] sm:$0xff] }
 0x4f5   : > { %v1801_v21 = vadd.f32 %v1800_v19, %v777_v18  ;;  %v809_v18 = vld [vmem:[%s2588_s15 + $0x1450] sm:$0xff] }
 0x4f7   : > { %v1802_v23 = vadd.f32 %v1801_v21, %v778_v20  ;;  %v810_v20 = vld [vmem:[%s2588_s15 + $0x1458] sm:$0xff] }
 0x4f9   : > { %v1803_v25 = vadd.f32 %v1802_v23, %v779_v22  ;;  %v811_v22 = vld [vmem:[%s2588_s15 + $0x1460] sm:$0xff] }
 0x4fb   : > { %v1804_v27 = vadd.f32 %v1803_v25, %v780_v24  ;;  %v812_v24 = vld [vmem:[%s2588_s15 + $0x1468] sm:$0xff] }
 0x4fd   : > { %v1805_v29 = vadd.f32 %v1804_v27, %v781_v26  ;;  %v813_v26 = vld [vmem:[%s2588_s15 + $0x1470] sm:$0xff] }
 0x4ff   : > { %v1806_v31 = vadd.f32 %v1805_v29, %v782_v28  ;;  %v814_v28 = vld [vmem:[%s2588_s15 + $0x1478] sm:$0xff] }
 0x501   : > { %v1807_v33 = vadd.f32 %v1806_v31, %v783_v30  ;;  %v815_v30 = vld [vmem:[%s2588_s15 + $0x1480] sm:$0xff] }
 0x503   : > { %v1808_v35 = vadd.f32 %v1807_v33, %v784_v32  ;;  %v816_v32 = vld [vmem:[%s2588_s15 + $0x1488] sm:$0xff] }
 0x505   : > { %v1809_v37 = vadd.f32 %v1808_v35, %v785_v34  ;;  %v817_v34 = vld [vmem:[%s2588_s15 + $0x1490] sm:$0xff] }
 0x507   : > { %v1810_v39 = vadd.f32 %v1809_v37, %v786_v36  ;;  %v818_v36 = vld [vmem:[%s2588_s15 + $0x1498] sm:$0xff] }
 0x509   : > { %v1811_v41 = vadd.f32 %v1810_v39, %v787_v38  ;;  %v819_v38 = vld [vmem:[%s2588_s15 + $0x14a0] sm:$0xff] }
 0x50b   : > { %v1812_v43 = vadd.f32 %v1811_v41, %v788_v40  ;;  %v820_v40 = vld [vmem:[%s2588_s15 + $0x14a8] sm:$0xff] }
 0x50d   : > { %v1813_v45 = vadd.f32 %v1812_v43, %v789_v42  ;;  %v821_v42 = vld [vmem:[%s2588_s15 + $0x14b0] sm:$0xff] }
 0x50f   : > { %v1814_v47 = vadd.f32 %v1813_v45, %v790_v44  ;;  %v822_v44 = vld [vmem:[%s2588_s15 + $0x14b8] sm:$0xff] }
 0x511   : > { %v1815_v49 = vadd.f32 %v1814_v47, %v791_v46  ;;  %v823_v46 = vld [vmem:[%s2588_s15 + $0x14c0] sm:$0xff] }
 0x513   : > { %v1816_v51 = vadd.f32 %v1815_v49, %v792_v48  ;;  %v824_v48 = vld [vmem:[%s2588_s15 + $0x14c8] sm:$0xff] }
 0x515   : > { %v1817_v53 = vadd.f32 %v1816_v51, %v793_v50  ;;  %v825_v50 = vld [vmem:[%s2588_s15 + $0x14d0] sm:$0xff] }
 0x517   : > { %v1818_v55 = vadd.f32 %v1817_v53, %v794_v52  ;;  %v826_v52 = vld [vmem:[%s2588_s15 + $0x14d8] sm:$0xff] }
 0x519   : > { %v1819_v57 = vadd.f32 %v1818_v55, %v795_v54  ;;  %v827_v54 = vld [vmem:[%s2588_s15 + $0x14e0] sm:$0xff] }
 0x51b   : > { %v1820_v59 = vadd.f32 %v1819_v57, %v796_v56  ;;  %v828_v56 = vld [vmem:[%s2588_s15 + $0x14e8] sm:$0xff] }
 0x51d   : > { %v1821_v61 = vadd.f32 %v1820_v59, %v797_v58  ;;  %v829_v58 = vld [vmem:[%s2588_s15 + $0x14f0] sm:$0xff] }
 0x51f   : > { %v1822_v63 = vadd.f32 %v1821_v61, %v798_v60  ;;  %v830_v60 = vld [vmem:[%s2588_s15 + $0x14f8] sm:$0xff] }
 0x521   : > { %v1823_v1 = vadd.f32 %v1822_v63, %v799_v62  ;;  %v831_v62 = vld [vmem:[%s2588_s15 + $0x1500] sm:$0xff] }
 0x523   : > { %v1824_v3 = vadd.f32 %v1823_v1, %v800_v0  ;;  %v832_v0 = vld [vmem:[%s2588_s15 + $0x1508] sm:$0xff] }
 0x525   : > { %v1825_v5 = vadd.f32 %v1824_v3, %v801_v2  ;;  %v833_v2 = vld [vmem:[%s2588_s15 + $0x1510] sm:$0xff] }
 0x527   : > { %v1826_v7 = vadd.f32 %v1825_v5, %v802_v4  ;;  %v834_v4 = vld [vmem:[%s2588_s15 + $0x1518] sm:$0xff] }
 0x529   : > { %v1827_v9 = vadd.f32 %v1826_v7, %v803_v6  ;;  %v835_v6 = vld [vmem:[%s2588_s15 + $0x1520] sm:$0xff] }
 0x52b   : > { %v1828_v11 = vadd.f32 %v1827_v9, %v804_v8  ;;  %v836_v8 = vld [vmem:[%s2588_s15 + $0x1528] sm:$0xff] }
 0x52d   : > { %v1829_v13 = vadd.f32 %v1828_v11, %v805_v10  ;;  %v837_v10 = vld [vmem:[%s2588_s15 + $0x1530] sm:$0xff] }
 0x52f   : > { %v1830_v15 = vadd.f32 %v1829_v13, %v806_v12  ;;  %v838_v12 = vld [vmem:[%s2588_s15 + $0x1538] sm:$0xff] }
 0x531   : > { %v1831_v17 = vadd.f32 %v1830_v15, %v807_v14  ;;  %v839_v14 = vld [vmem:[%s2588_s15 + $0x1540] sm:$0xff] }
 0x533   : > { %v1832_v19 = vadd.f32 %v1831_v17, %v808_v16  ;;  %v840_v16 = vld [vmem:[%s2588_s15 + $0x1548] sm:$0xff] }
 0x535   : > { %v1833_v21 = vadd.f32 %v1832_v19, %v809_v18  ;;  %v841_v18 = vld [vmem:[%s2588_s15 + $0x1550] sm:$0xff] }
 0x537   : > { %v1834_v23 = vadd.f32 %v1833_v21, %v810_v20  ;;  %v842_v20 = vld [vmem:[%s2588_s15 + $0x1558] sm:$0xff] }
 0x539   : > { %v1835_v25 = vadd.f32 %v1834_v23, %v811_v22  ;;  %v843_v22 = vld [vmem:[%s2588_s15 + $0x1560] sm:$0xff] }
 0x53b   : > { %v1836_v27 = vadd.f32 %v1835_v25, %v812_v24  ;;  %v844_v24 = vld [vmem:[%s2588_s15 + $0x1568] sm:$0xff] }
 0x53d   : > { %v1837_v29 = vadd.f32 %v1836_v27, %v813_v26  ;;  %v845_v26 = vld [vmem:[%s2588_s15 + $0x1570] sm:$0xff] }
 0x53f   : > { %v1838_v31 = vadd.f32 %v1837_v29, %v814_v28  ;;  %v846_v28 = vld [vmem:[%s2588_s15 + $0x1578] sm:$0xff] }
 0x541   : > { %v1839_v33 = vadd.f32 %v1838_v31, %v815_v30  ;;  %v847_v30 = vld [vmem:[%s2588_s15 + $0x1580] sm:$0xff] }
 0x543   : > { %v1840_v35 = vadd.f32 %v1839_v33, %v816_v32  ;;  %v848_v32 = vld [vmem:[%s2588_s15 + $0x1588] sm:$0xff] }
 0x545   : > { %v1841_v37 = vadd.f32 %v1840_v35, %v817_v34  ;;  %v849_v34 = vld [vmem:[%s2588_s15 + $0x1590] sm:$0xff] }
 0x547   : > { %v1842_v39 = vadd.f32 %v1841_v37, %v818_v36  ;;  %v850_v36 = vld [vmem:[%s2588_s15 + $0x1598] sm:$0xff] }
 0x549   : > { %v1843_v41 = vadd.f32 %v1842_v39, %v819_v38  ;;  %v851_v38 = vld [vmem:[%s2588_s15 + $0x15a0] sm:$0xff] }
 0x54b   : > { %v1844_v43 = vadd.f32 %v1843_v41, %v820_v40  ;;  %v852_v40 = vld [vmem:[%s2588_s15 + $0x15a8] sm:$0xff] }
 0x54d   : > { %v1845_v45 = vadd.f32 %v1844_v43, %v821_v42  ;;  %v853_v42 = vld [vmem:[%s2588_s15 + $0x15b0] sm:$0xff] }
 0x54f   : > { %v1846_v47 = vadd.f32 %v1845_v45, %v822_v44  ;;  %v854_v44 = vld [vmem:[%s2588_s15 + $0x15b8] sm:$0xff] }
 0x551   : > { %v1847_v49 = vadd.f32 %v1846_v47, %v823_v46  ;;  %v855_v46 = vld [vmem:[%s2588_s15 + $0x15c0] sm:$0xff] }
 0x553   : > { %v1848_v51 = vadd.f32 %v1847_v49, %v824_v48  ;;  %v856_v48 = vld [vmem:[%s2588_s15 + $0x15c8] sm:$0xff] }
 0x555   : > { %v1849_v53 = vadd.f32 %v1848_v51, %v825_v50  ;;  %v857_v50 = vld [vmem:[%s2588_s15 + $0x15d0] sm:$0xff] }
 0x557   : > { %v1850_v55 = vadd.f32 %v1849_v53, %v826_v52  ;;  %v858_v52 = vld [vmem:[%s2588_s15 + $0x15d8] sm:$0xff] }
 0x559   : > { %v1851_v57 = vadd.f32 %v1850_v55, %v827_v54  ;;  %v859_v54 = vld [vmem:[%s2588_s15 + $0x15e0] sm:$0xff] }
 0x55b   : > { %v1852_v59 = vadd.f32 %v1851_v57, %v828_v56  ;;  %v860_v56 = vld [vmem:[%s2588_s15 + $0x15e8] sm:$0xff] }
 0x55d   : > { %v1853_v61 = vadd.f32 %v1852_v59, %v829_v58  ;;  %v861_v58 = vld [vmem:[%s2588_s15 + $0x15f0] sm:$0xff] }
 0x55f   : > { %v1854_v63 = vadd.f32 %v1853_v61, %v830_v60  ;;  %v862_v60 = vld [vmem:[%s2588_s15 + $0x15f8] sm:$0xff] }
 0x561   : > { %v1855_v1 = vadd.f32 %v1854_v63, %v831_v62  ;;  %v863_v62 = vld [vmem:[%s2588_s15 + $0x1600] sm:$0xff] }
 0x563   : > { %v1856_v3 = vadd.f32 %v1855_v1, %v832_v0  ;;  %v864_v0 = vld [vmem:[%s2588_s15 + $0x1608] sm:$0xff] }
 0x565   : > { %v1857_v5 = vadd.f32 %v1856_v3, %v833_v2  ;;  %v865_v2 = vld [vmem:[%s2588_s15 + $0x1610] sm:$0xff] }
 0x567   : > { %v1858_v7 = vadd.f32 %v1857_v5, %v834_v4  ;;  %v866_v4 = vld [vmem:[%s2588_s15 + $0x1618] sm:$0xff] }
 0x569   : > { %v1859_v9 = vadd.f32 %v1858_v7, %v835_v6  ;;  %v867_v6 = vld [vmem:[%s2588_s15 + $0x1620] sm:$0xff] }
 0x56b   : > { %v1860_v11 = vadd.f32 %v1859_v9, %v836_v8  ;;  %v868_v8 = vld [vmem:[%s2588_s15 + $0x1628] sm:$0xff] }
 0x56d   : > { %v1861_v13 = vadd.f32 %v1860_v11, %v837_v10  ;;  %v869_v10 = vld [vmem:[%s2588_s15 + $0x1630] sm:$0xff] }
 0x56f   : > { %v1862_v15 = vadd.f32 %v1861_v13, %v838_v12  ;;  %v870_v12 = vld [vmem:[%s2588_s15 + $0x1638] sm:$0xff] }
 0x571   : > { %v1863_v17 = vadd.f32 %v1862_v15, %v839_v14  ;;  %v871_v14 = vld [vmem:[%s2588_s15 + $0x1640] sm:$0xff] }
 0x573   : > { %v1864_v19 = vadd.f32 %v1863_v17, %v840_v16  ;;  %v872_v16 = vld [vmem:[%s2588_s15 + $0x1648] sm:$0xff] }
 0x575   : > { %v1865_v21 = vadd.f32 %v1864_v19, %v841_v18  ;;  %v873_v18 = vld [vmem:[%s2588_s15 + $0x1650] sm:$0xff] }
 0x577   : > { %v1866_v23 = vadd.f32 %v1865_v21, %v842_v20  ;;  %v874_v20 = vld [vmem:[%s2588_s15 + $0x1658] sm:$0xff] }
 0x579   : > { %v1867_v25 = vadd.f32 %v1866_v23, %v843_v22  ;;  %v875_v22 = vld [vmem:[%s2588_s15 + $0x1660] sm:$0xff] }
 0x57b   : > { %v1868_v27 = vadd.f32 %v1867_v25, %v844_v24  ;;  %v876_v24 = vld [vmem:[%s2588_s15 + $0x1668] sm:$0xff] }
 0x57d   : > { %v1869_v29 = vadd.f32 %v1868_v27, %v845_v26  ;;  %v877_v26 = vld [vmem:[%s2588_s15 + $0x1670] sm:$0xff] }
 0x57f   : > { %v1870_v31 = vadd.f32 %v1869_v29, %v846_v28  ;;  %v878_v28 = vld [vmem:[%s2588_s15 + $0x1678] sm:$0xff] }
 0x581   : > { %v1871_v33 = vadd.f32 %v1870_v31, %v847_v30  ;;  %v879_v30 = vld [vmem:[%s2588_s15 + $0x1680] sm:$0xff] }
 0x583   : > { %v1872_v35 = vadd.f32 %v1871_v33, %v848_v32  ;;  %v880_v32 = vld [vmem:[%s2588_s15 + $0x1688] sm:$0xff] }
 0x585   : > { %v1873_v37 = vadd.f32 %v1872_v35, %v849_v34  ;;  %v881_v34 = vld [vmem:[%s2588_s15 + $0x1690] sm:$0xff] }
 0x587   : > { %v1874_v39 = vadd.f32 %v1873_v37, %v850_v36  ;;  %v882_v36 = vld [vmem:[%s2588_s15 + $0x1698] sm:$0xff] }
 0x589   : > { %v1875_v41 = vadd.f32 %v1874_v39, %v851_v38  ;;  %v883_v38 = vld [vmem:[%s2588_s15 + $0x16a0] sm:$0xff] }
 0x58b   : > { %v1876_v43 = vadd.f32 %v1875_v41, %v852_v40  ;;  %v884_v40 = vld [vmem:[%s2588_s15 + $0x16a8] sm:$0xff] }
 0x58d   : > { %v1877_v45 = vadd.f32 %v1876_v43, %v853_v42  ;;  %v885_v42 = vld [vmem:[%s2588_s15 + $0x16b0] sm:$0xff] }
 0x58f   : > { %v1878_v47 = vadd.f32 %v1877_v45, %v854_v44  ;;  %v886_v44 = vld [vmem:[%s2588_s15 + $0x16b8] sm:$0xff] }
 0x591   : > { %v1879_v49 = vadd.f32 %v1878_v47, %v855_v46  ;;  %v887_v46 = vld [vmem:[%s2588_s15 + $0x16c0] sm:$0xff] }
 0x593   : > { %v1880_v51 = vadd.f32 %v1879_v49, %v856_v48  ;;  %v888_v48 = vld [vmem:[%s2588_s15 + $0x16c8] sm:$0xff] }
 0x595   : > { %v1881_v53 = vadd.f32 %v1880_v51, %v857_v50  ;;  %v889_v50 = vld [vmem:[%s2588_s15 + $0x16d0] sm:$0xff] }
 0x597   : > { %v1882_v55 = vadd.f32 %v1881_v53, %v858_v52  ;;  %v890_v52 = vld [vmem:[%s2588_s15 + $0x16d8] sm:$0xff] }
 0x599   : > { %v1883_v57 = vadd.f32 %v1882_v55, %v859_v54  ;;  %v891_v54 = vld [vmem:[%s2588_s15 + $0x16e0] sm:$0xff] }
 0x59b   : > { %v1884_v59 = vadd.f32 %v1883_v57, %v860_v56  ;;  %v892_v56 = vld [vmem:[%s2588_s15 + $0x16e8] sm:$0xff] }
 0x59d   : > { %v1885_v61 = vadd.f32 %v1884_v59, %v861_v58  ;;  %v893_v58 = vld [vmem:[%s2588_s15 + $0x16f0] sm:$0xff] }
 0x59f   : > { %v1886_v63 = vadd.f32 %v1885_v61, %v862_v60  ;;  %v894_v60 = vld [vmem:[%s2588_s15 + $0x16f8] sm:$0xff] }
 0x5a1   : > { %v1887_v1 = vadd.f32 %v1886_v63, %v863_v62  ;;  %v895_v62 = vld [vmem:[%s2588_s15 + $0x1700] sm:$0xff] }
 0x5a3   : > { %v1888_v3 = vadd.f32 %v1887_v1, %v864_v0  ;;  %v896_v0 = vld [vmem:[%s2588_s15 + $0x1708] sm:$0xff] }
 0x5a5   : > { %v1889_v5 = vadd.f32 %v1888_v3, %v865_v2  ;;  %v897_v2 = vld [vmem:[%s2588_s15 + $0x1710] sm:$0xff] }
 0x5a7   : > { %v1890_v7 = vadd.f32 %v1889_v5, %v866_v4  ;;  %v898_v4 = vld [vmem:[%s2588_s15 + $0x1718] sm:$0xff] }
 0x5a9   : > { %v1891_v9 = vadd.f32 %v1890_v7, %v867_v6  ;;  %v899_v6 = vld [vmem:[%s2588_s15 + $0x1720] sm:$0xff] }
 0x5ab   : > { %v1892_v11 = vadd.f32 %v1891_v9, %v868_v8  ;;  %v900_v8 = vld [vmem:[%s2588_s15 + $0x1728] sm:$0xff] }
 0x5ad   : > { %v1893_v13 = vadd.f32 %v1892_v11, %v869_v10  ;;  %v901_v10 = vld [vmem:[%s2588_s15 + $0x1730] sm:$0xff] }
 0x5af   : > { %v1894_v15 = vadd.f32 %v1893_v13, %v870_v12  ;;  %v902_v12 = vld [vmem:[%s2588_s15 + $0x1738] sm:$0xff] }
 0x5b1   : > { %v1895_v17 = vadd.f32 %v1894_v15, %v871_v14  ;;  %v903_v14 = vld [vmem:[%s2588_s15 + $0x1740] sm:$0xff] }
 0x5b3   : > { %v1896_v19 = vadd.f32 %v1895_v17, %v872_v16  ;;  %v904_v16 = vld [vmem:[%s2588_s15 + $0x1748] sm:$0xff] }
 0x5b5   : > { %v1897_v21 = vadd.f32 %v1896_v19, %v873_v18  ;;  %v905_v18 = vld [vmem:[%s2588_s15 + $0x1750] sm:$0xff] }
 0x5b7   : > { %v1898_v23 = vadd.f32 %v1897_v21, %v874_v20  ;;  %v906_v20 = vld [vmem:[%s2588_s15 + $0x1758] sm:$0xff] }
 0x5b9   : > { %v1899_v25 = vadd.f32 %v1898_v23, %v875_v22  ;;  %v907_v22 = vld [vmem:[%s2588_s15 + $0x1760] sm:$0xff] }
 0x5bb   : > { %v1900_v27 = vadd.f32 %v1899_v25, %v876_v24  ;;  %v908_v24 = vld [vmem:[%s2588_s15 + $0x1768] sm:$0xff] }
 0x5bd   : > { %v1901_v29 = vadd.f32 %v1900_v27, %v877_v26  ;;  %v909_v26 = vld [vmem:[%s2588_s15 + $0x1770] sm:$0xff] }
 0x5bf   : > { %v1902_v31 = vadd.f32 %v1901_v29, %v878_v28  ;;  %v910_v28 = vld [vmem:[%s2588_s15 + $0x1778] sm:$0xff] }
 0x5c1   : > { %v1903_v33 = vadd.f32 %v1902_v31, %v879_v30  ;;  %v911_v30 = vld [vmem:[%s2588_s15 + $0x1780] sm:$0xff] }
 0x5c3   : > { %v1904_v35 = vadd.f32 %v1903_v33, %v880_v32  ;;  %v912_v32 = vld [vmem:[%s2588_s15 + $0x1788] sm:$0xff] }
 0x5c5   : > { %v1905_v37 = vadd.f32 %v1904_v35, %v881_v34  ;;  %v913_v34 = vld [vmem:[%s2588_s15 + $0x1790] sm:$0xff] }
 0x5c7   : > { %v1906_v39 = vadd.f32 %v1905_v37, %v882_v36  ;;  %v914_v36 = vld [vmem:[%s2588_s15 + $0x1798] sm:$0xff] }
 0x5c9   : > { %v1907_v41 = vadd.f32 %v1906_v39, %v883_v38  ;;  %v915_v38 = vld [vmem:[%s2588_s15 + $0x17a0] sm:$0xff] }
 0x5cb   : > { %v1908_v43 = vadd.f32 %v1907_v41, %v884_v40  ;;  %v916_v40 = vld [vmem:[%s2588_s15 + $0x17a8] sm:$0xff] }
 0x5cd   : > { %v1909_v45 = vadd.f32 %v1908_v43, %v885_v42  ;;  %v917_v42 = vld [vmem:[%s2588_s15 + $0x17b0] sm:$0xff] }
 0x5cf   : > { %v1910_v47 = vadd.f32 %v1909_v45, %v886_v44  ;;  %v918_v44 = vld [vmem:[%s2588_s15 + $0x17b8] sm:$0xff] }
 0x5d1   : > { %v1911_v49 = vadd.f32 %v1910_v47, %v887_v46  ;;  %v919_v46 = vld [vmem:[%s2588_s15 + $0x17c0] sm:$0xff] }
 0x5d3   : > { %v1912_v51 = vadd.f32 %v1911_v49, %v888_v48  ;;  %v920_v48 = vld [vmem:[%s2588_s15 + $0x17c8] sm:$0xff] }
 0x5d5   : > { %v1913_v53 = vadd.f32 %v1912_v51, %v889_v50  ;;  %v921_v50 = vld [vmem:[%s2588_s15 + $0x17d0] sm:$0xff] }
 0x5d7   : > { %v1914_v55 = vadd.f32 %v1913_v53, %v890_v52  ;;  %v922_v52 = vld [vmem:[%s2588_s15 + $0x17d8] sm:$0xff] }
 0x5d9   : > { %v1915_v57 = vadd.f32 %v1914_v55, %v891_v54  ;;  %v923_v54 = vld [vmem:[%s2588_s15 + $0x17e0] sm:$0xff] }
 0x5db   : > { %v1916_v59 = vadd.f32 %v1915_v57, %v892_v56  ;;  %v924_v56 = vld [vmem:[%s2588_s15 + $0x17e8] sm:$0xff] }
 0x5dd   : > { %v1917_v61 = vadd.f32 %v1916_v59, %v893_v58  ;;  %v925_v58 = vld [vmem:[%s2588_s15 + $0x17f0] sm:$0xff] }
 0x5df   : > { %v1918_v63 = vadd.f32 %v1917_v61, %v894_v60  ;;  %v926_v60 = vld [vmem:[%s2588_s15 + $0x17f8] sm:$0xff] }
 0x5e1   : > { %v1919_v1 = vadd.f32 %v1918_v63, %v895_v62  ;;  %v927_v62 = vld [vmem:[%s2588_s15 + $0x1800] sm:$0xff] }
 0x5e3   : > { %v1920_v3 = vadd.f32 %v1919_v1, %v896_v0  ;;  %v928_v0 = vld [vmem:[%s2588_s15 + $0x1808] sm:$0xff] }
 0x5e5   : > { %v1921_v5 = vadd.f32 %v1920_v3, %v897_v2  ;;  %v929_v2 = vld [vmem:[%s2588_s15 + $0x1810] sm:$0xff] }
 0x5e7   : > { %v1922_v7 = vadd.f32 %v1921_v5, %v898_v4  ;;  %v930_v4 = vld [vmem:[%s2588_s15 + $0x1818] sm:$0xff] }
 0x5e9   : > { %v1923_v9 = vadd.f32 %v1922_v7, %v899_v6  ;;  %v931_v6 = vld [vmem:[%s2588_s15 + $0x1820] sm:$0xff] }
 0x5eb   : > { %v1924_v11 = vadd.f32 %v1923_v9, %v900_v8  ;;  %v932_v8 = vld [vmem:[%s2588_s15 + $0x1828] sm:$0xff] }
 0x5ed   : > { %v1925_v13 = vadd.f32 %v1924_v11, %v901_v10  ;;  %v933_v10 = vld [vmem:[%s2588_s15 + $0x1830] sm:$0xff] }
 0x5ef   : > { %v1926_v15 = vadd.f32 %v1925_v13, %v902_v12  ;;  %v934_v12 = vld [vmem:[%s2588_s15 + $0x1838] sm:$0xff] }
 0x5f1   : > { %v1927_v17 = vadd.f32 %v1926_v15, %v903_v14  ;;  %v935_v14 = vld [vmem:[%s2588_s15 + $0x1840] sm:$0xff] }
 0x5f3   : > { %v1928_v19 = vadd.f32 %v1927_v17, %v904_v16  ;;  %v936_v16 = vld [vmem:[%s2588_s15 + $0x1848] sm:$0xff] }
 0x5f5   : > { %v1929_v21 = vadd.f32 %v1928_v19, %v905_v18  ;;  %v937_v18 = vld [vmem:[%s2588_s15 + $0x1850] sm:$0xff] }
 0x5f7   : > { %v1930_v23 = vadd.f32 %v1929_v21, %v906_v20  ;;  %v938_v20 = vld [vmem:[%s2588_s15 + $0x1858] sm:$0xff] }
 0x5f9   : > { %v1931_v25 = vadd.f32 %v1930_v23, %v907_v22  ;;  %v939_v22 = vld [vmem:[%s2588_s15 + $0x1860] sm:$0xff] }
 0x5fb   : > { %v1932_v27 = vadd.f32 %v1931_v25, %v908_v24  ;;  %v940_v24 = vld [vmem:[%s2588_s15 + $0x1868] sm:$0xff] }
 0x5fd   : > { %v1933_v29 = vadd.f32 %v1932_v27, %v909_v26  ;;  %v941_v26 = vld [vmem:[%s2588_s15 + $0x1870] sm:$0xff] }
 0x5ff   : > { %v1934_v31 = vadd.f32 %v1933_v29, %v910_v28  ;;  %v942_v28 = vld [vmem:[%s2588_s15 + $0x1878] sm:$0xff] }
 0x601   : > { %v1935_v33 = vadd.f32 %v1934_v31, %v911_v30  ;;  %v943_v30 = vld [vmem:[%s2588_s15 + $0x1880] sm:$0xff] }
 0x603   : > { %v1936_v35 = vadd.f32 %v1935_v33, %v912_v32  ;;  %v944_v32 = vld [vmem:[%s2588_s15 + $0x1888] sm:$0xff] }
 0x605   : > { %v1937_v37 = vadd.f32 %v1936_v35, %v913_v34  ;;  %v945_v34 = vld [vmem:[%s2588_s15 + $0x1890] sm:$0xff] }
 0x607   : > { %v1938_v39 = vadd.f32 %v1937_v37, %v914_v36  ;;  %v946_v36 = vld [vmem:[%s2588_s15 + $0x1898] sm:$0xff] }
 0x609   : > { %v1939_v41 = vadd.f32 %v1938_v39, %v915_v38  ;;  %v947_v38 = vld [vmem:[%s2588_s15 + $0x18a0] sm:$0xff] }
 0x60b   : > { %v1940_v43 = vadd.f32 %v1939_v41, %v916_v40  ;;  %v948_v40 = vld [vmem:[%s2588_s15 + $0x18a8] sm:$0xff] }
 0x60d   : > { %v1941_v45 = vadd.f32 %v1940_v43, %v917_v42  ;;  %v949_v42 = vld [vmem:[%s2588_s15 + $0x18b0] sm:$0xff] }
 0x60f   : > { %v1942_v47 = vadd.f32 %v1941_v45, %v918_v44  ;;  %v950_v44 = vld [vmem:[%s2588_s15 + $0x18b8] sm:$0xff] }
 0x611   : > { %v1943_v49 = vadd.f32 %v1942_v47, %v919_v46  ;;  %v951_v46 = vld [vmem:[%s2588_s15 + $0x18c0] sm:$0xff] }
 0x613   : > { %v1944_v51 = vadd.f32 %v1943_v49, %v920_v48  ;;  %v952_v48 = vld [vmem:[%s2588_s15 + $0x18c8] sm:$0xff] }
 0x615   : > { %v1945_v53 = vadd.f32 %v1944_v51, %v921_v50  ;;  %v953_v50 = vld [vmem:[%s2588_s15 + $0x18d0] sm:$0xff] }
 0x617   : > { %v1946_v55 = vadd.f32 %v1945_v53, %v922_v52  ;;  %v954_v52 = vld [vmem:[%s2588_s15 + $0x18d8] sm:$0xff] }
 0x619   : > { %v1947_v57 = vadd.f32 %v1946_v55, %v923_v54  ;;  %v955_v54 = vld [vmem:[%s2588_s15 + $0x18e0] sm:$0xff] }
 0x61b   : > { %v1948_v59 = vadd.f32 %v1947_v57, %v924_v56  ;;  %v956_v56 = vld [vmem:[%s2588_s15 + $0x18e8] sm:$0xff] }
 0x61d   : > { %v1949_v61 = vadd.f32 %v1948_v59, %v925_v58  ;;  %v957_v58 = vld [vmem:[%s2588_s15 + $0x18f0] sm:$0xff] }
 0x61f   : > { %v1950_v63 = vadd.f32 %v1949_v61, %v926_v60  ;;  %v958_v60 = vld [vmem:[%s2588_s15 + $0x18f8] sm:$0xff] }
 0x621   : > { %v1951_v1 = vadd.f32 %v1950_v63, %v927_v62  ;;  %v959_v62 = vld [vmem:[%s2588_s15 + $0x1900] sm:$0xff] }
 0x623   : > { %v1952_v3 = vadd.f32 %v1951_v1, %v928_v0  ;;  %v960_v0 = vld [vmem:[%s2588_s15 + $0x1908] sm:$0xff] }
 0x625   : > { %v1953_v5 = vadd.f32 %v1952_v3, %v929_v2  ;;  %v961_v2 = vld [vmem:[%s2588_s15 + $0x1910] sm:$0xff] }
 0x627   : > { %v1954_v7 = vadd.f32 %v1953_v5, %v930_v4  ;;  %v962_v4 = vld [vmem:[%s2588_s15 + $0x1918] sm:$0xff] }
 0x629   : > { %v1955_v9 = vadd.f32 %v1954_v7, %v931_v6  ;;  %v963_v6 = vld [vmem:[%s2588_s15 + $0x1920] sm:$0xff] }
 0x62b   : > { %v1956_v11 = vadd.f32 %v1955_v9, %v932_v8  ;;  %v964_v8 = vld [vmem:[%s2588_s15 + $0x1928] sm:$0xff] }
 0x62d   : > { %v1957_v13 = vadd.f32 %v1956_v11, %v933_v10  ;;  %v965_v10 = vld [vmem:[%s2588_s15 + $0x1930] sm:$0xff] }
 0x62f   : > { %v1958_v15 = vadd.f32 %v1957_v13, %v934_v12  ;;  %v966_v12 = vld [vmem:[%s2588_s15 + $0x1938] sm:$0xff] }
 0x631   : > { %v1959_v17 = vadd.f32 %v1958_v15, %v935_v14  ;;  %v967_v14 = vld [vmem:[%s2588_s15 + $0x1940] sm:$0xff] }
 0x633   : > { %v1960_v19 = vadd.f32 %v1959_v17, %v936_v16  ;;  %v968_v16 = vld [vmem:[%s2588_s15 + $0x1948] sm:$0xff] }
 0x635   : > { %v1961_v21 = vadd.f32 %v1960_v19, %v937_v18  ;;  %v969_v18 = vld [vmem:[%s2588_s15 + $0x1950] sm:$0xff] }
 0x637   : > { %v1962_v23 = vadd.f32 %v1961_v21, %v938_v20  ;;  %v970_v20 = vld [vmem:[%s2588_s15 + $0x1958] sm:$0xff] }
 0x639   : > { %v1963_v25 = vadd.f32 %v1962_v23, %v939_v22  ;;  %v971_v22 = vld [vmem:[%s2588_s15 + $0x1960] sm:$0xff] }
 0x63b   : > { %v1964_v27 = vadd.f32 %v1963_v25, %v940_v24  ;;  %v972_v24 = vld [vmem:[%s2588_s15 + $0x1968] sm:$0xff] }
 0x63d   : > { %v1965_v29 = vadd.f32 %v1964_v27, %v941_v26  ;;  %v973_v26 = vld [vmem:[%s2588_s15 + $0x1970] sm:$0xff] }
 0x63f   : > { %v1966_v31 = vadd.f32 %v1965_v29, %v942_v28  ;;  %v974_v28 = vld [vmem:[%s2588_s15 + $0x1978] sm:$0xff] }
 0x641   : > { %v1967_v33 = vadd.f32 %v1966_v31, %v943_v30  ;;  %v975_v30 = vld [vmem:[%s2588_s15 + $0x1980] sm:$0xff] }
 0x643   : > { %v1968_v35 = vadd.f32 %v1967_v33, %v944_v32  ;;  %v976_v32 = vld [vmem:[%s2588_s15 + $0x1988] sm:$0xff] }
 0x645   : > { %v1969_v37 = vadd.f32 %v1968_v35, %v945_v34  ;;  %v977_v34 = vld [vmem:[%s2588_s15 + $0x1990] sm:$0xff] }
 0x647   : > { %v1970_v39 = vadd.f32 %v1969_v37, %v946_v36  ;;  %v978_v36 = vld [vmem:[%s2588_s15 + $0x1998] sm:$0xff] }
 0x649   : > { %v1971_v41 = vadd.f32 %v1970_v39, %v947_v38  ;;  %v979_v38 = vld [vmem:[%s2588_s15 + $0x19a0] sm:$0xff] }
 0x64b   : > { %v1972_v43 = vadd.f32 %v1971_v41, %v948_v40  ;;  %v980_v40 = vld [vmem:[%s2588_s15 + $0x19a8] sm:$0xff] }
 0x64d   : > { %v1973_v45 = vadd.f32 %v1972_v43, %v949_v42  ;;  %v981_v42 = vld [vmem:[%s2588_s15 + $0x19b0] sm:$0xff] }
 0x64f   : > { %v1974_v47 = vadd.f32 %v1973_v45, %v950_v44  ;;  %v982_v44 = vld [vmem:[%s2588_s15 + $0x19b8] sm:$0xff] }
 0x651   : > { %v1975_v49 = vadd.f32 %v1974_v47, %v951_v46  ;;  %v983_v46 = vld [vmem:[%s2588_s15 + $0x19c0] sm:$0xff] }
 0x653   : > { %v1976_v51 = vadd.f32 %v1975_v49, %v952_v48  ;;  %v984_v48 = vld [vmem:[%s2588_s15 + $0x19c8] sm:$0xff] }
 0x655   : > { %v1977_v53 = vadd.f32 %v1976_v51, %v953_v50  ;;  %v985_v50 = vld [vmem:[%s2588_s15 + $0x19d0] sm:$0xff] }
 0x657   : > { %v1978_v55 = vadd.f32 %v1977_v53, %v954_v52  ;;  %v986_v52 = vld [vmem:[%s2588_s15 + $0x19d8] sm:$0xff] }
 0x659   : > { %v1979_v57 = vadd.f32 %v1978_v55, %v955_v54  ;;  %v987_v54 = vld [vmem:[%s2588_s15 + $0x19e0] sm:$0xff] }
 0x65b   : > { %v1980_v59 = vadd.f32 %v1979_v57, %v956_v56  ;;  %v988_v56 = vld [vmem:[%s2588_s15 + $0x19e8] sm:$0xff] }
 0x65d   : > { %v1981_v61 = vadd.f32 %v1980_v59, %v957_v58  ;;  %v989_v58 = vld [vmem:[%s2588_s15 + $0x19f0] sm:$0xff] }
 0x65f   : > { %v1982_v63 = vadd.f32 %v1981_v61, %v958_v60  ;;  %v990_v60 = vld [vmem:[%s2588_s15 + $0x19f8] sm:$0xff] }
 0x661   : > { %v1983_v1 = vadd.f32 %v1982_v63, %v959_v62  ;;  %v991_v62 = vld [vmem:[%s2588_s15 + $0x1a00] sm:$0xff] }
 0x663   : > { %v1984_v3 = vadd.f32 %v1983_v1, %v960_v0  ;;  %v992_v0 = vld [vmem:[%s2588_s15 + $0x1a08] sm:$0xff] }
 0x665   : > { %v1985_v5 = vadd.f32 %v1984_v3, %v961_v2  ;;  %v993_v2 = vld [vmem:[%s2588_s15 + $0x1a10] sm:$0xff] }
 0x667   : > { %v1986_v7 = vadd.f32 %v1985_v5, %v962_v4  ;;  %v994_v4 = vld [vmem:[%s2588_s15 + $0x1a18] sm:$0xff] }
 0x669   : > { %v1987_v9 = vadd.f32 %v1986_v7, %v963_v6  ;;  %v995_v6 = vld [vmem:[%s2588_s15 + $0x1a20] sm:$0xff] }
 0x66b   : > { %v1988_v11 = vadd.f32 %v1987_v9, %v964_v8  ;;  %v996_v8 = vld [vmem:[%s2588_s15 + $0x1a28] sm:$0xff] }
 0x66d   : > { %v1989_v13 = vadd.f32 %v1988_v11, %v965_v10  ;;  %v997_v10 = vld [vmem:[%s2588_s15 + $0x1a30] sm:$0xff] }
 0x66f   : > { %v1990_v15 = vadd.f32 %v1989_v13, %v966_v12  ;;  %v998_v12 = vld [vmem:[%s2588_s15 + $0x1a38] sm:$0xff] }
 0x671   : > { %v1991_v17 = vadd.f32 %v1990_v15, %v967_v14  ;;  %v999_v14 = vld [vmem:[%s2588_s15 + $0x1a40] sm:$0xff] }
 0x673   : > { %v1992_v19 = vadd.f32 %v1991_v17, %v968_v16  ;;  %v1000_v16 = vld [vmem:[%s2588_s15 + $0x1a48] sm:$0xff] }
 0x675   : > { %v1993_v21 = vadd.f32 %v1992_v19, %v969_v18  ;;  %v1001_v18 = vld [vmem:[%s2588_s15 + $0x1a50] sm:$0xff] }
 0x677   : > { %v1994_v23 = vadd.f32 %v1993_v21, %v970_v20  ;;  %v1002_v20 = vld [vmem:[%s2588_s15 + $0x1a58] sm:$0xff] }
 0x679   : > { %v1995_v25 = vadd.f32 %v1994_v23, %v971_v22  ;;  %v1003_v22 = vld [vmem:[%s2588_s15 + $0x1a60] sm:$0xff] }
 0x67b   : > { %v1996_v27 = vadd.f32 %v1995_v25, %v972_v24  ;;  %v1004_v24 = vld [vmem:[%s2588_s15 + $0x1a68] sm:$0xff] }
 0x67d   : > { %v1997_v29 = vadd.f32 %v1996_v27, %v973_v26  ;;  %v1005_v26 = vld [vmem:[%s2588_s15 + $0x1a70] sm:$0xff] }
 0x67f   : > { %v1998_v31 = vadd.f32 %v1997_v29, %v974_v28  ;;  %v1006_v28 = vld [vmem:[%s2588_s15 + $0x1a78] sm:$0xff] }
 0x681   : > { %v1999_v33 = vadd.f32 %v1998_v31, %v975_v30  ;;  %v1007_v30 = vld [vmem:[%s2588_s15 + $0x1a80] sm:$0xff] }
 0x683   : > { %v2000_v35 = vadd.f32 %v1999_v33, %v976_v32  ;;  %v1008_v32 = vld [vmem:[%s2588_s15 + $0x1a88] sm:$0xff] }
 0x685   : > { %v2001_v37 = vadd.f32 %v2000_v35, %v977_v34  ;;  %v1009_v34 = vld [vmem:[%s2588_s15 + $0x1a90] sm:$0xff] }
 0x687   : > { %v2002_v39 = vadd.f32 %v2001_v37, %v978_v36  ;;  %v1010_v36 = vld [vmem:[%s2588_s15 + $0x1a98] sm:$0xff] }
 0x689   : > { %v2003_v41 = vadd.f32 %v2002_v39, %v979_v38  ;;  %v1011_v38 = vld [vmem:[%s2588_s15 + $0x1aa0] sm:$0xff] }
 0x68b   : > { %v2004_v43 = vadd.f32 %v2003_v41, %v980_v40  ;;  %v1012_v40 = vld [vmem:[%s2588_s15 + $0x1aa8] sm:$0xff] }
 0x68d   : > { %v2005_v45 = vadd.f32 %v2004_v43, %v981_v42  ;;  %v1013_v42 = vld [vmem:[%s2588_s15 + $0x1ab0] sm:$0xff] }
 0x68f   : > { %v2006_v47 = vadd.f32 %v2005_v45, %v982_v44  ;;  %v1014_v44 = vld [vmem:[%s2588_s15 + $0x1ab8] sm:$0xff] }
 0x691   : > { %v2007_v49 = vadd.f32 %v2006_v47, %v983_v46  ;;  %v1015_v46 = vld [vmem:[%s2588_s15 + $0x1ac0] sm:$0xff] }
 0x693   : > { %v2008_v51 = vadd.f32 %v2007_v49, %v984_v48  ;;  %v1016_v48 = vld [vmem:[%s2588_s15 + $0x1ac8] sm:$0xff] }
 0x695   : > { %v2009_v53 = vadd.f32 %v2008_v51, %v985_v50  ;;  %v1017_v50 = vld [vmem:[%s2588_s15 + $0x1ad0] sm:$0xff] }
 0x697   : > { %v2010_v55 = vadd.f32 %v2009_v53, %v986_v52  ;;  %v1018_v52 = vld [vmem:[%s2588_s15 + $0x1ad8] sm:$0xff] }
 0x699   : > { %v2011_v57 = vadd.f32 %v2010_v55, %v987_v54  ;;  %v1019_v54 = vld [vmem:[%s2588_s15 + $0x1ae0] sm:$0xff] }
 0x69b   : > { %v2012_v59 = vadd.f32 %v2011_v57, %v988_v56  ;;  %v1020_v56 = vld [vmem:[%s2588_s15 + $0x1ae8] sm:$0xff] }
 0x69d   : > { %v2013_v61 = vadd.f32 %v2012_v59, %v989_v58  ;;  %v1021_v58 = vld [vmem:[%s2588_s15 + $0x1af0] sm:$0xff] }
 0x69f   : > { %v2014_v63 = vadd.f32 %v2013_v61, %v990_v60  ;;  %v1022_v60 = vld [vmem:[%s2588_s15 + $0x1af8] sm:$0xff] }
 0x6a1   : > { %v2015_v1 = vadd.f32 %v2014_v63, %v991_v62  ;;  %v1023_v62 = vld [vmem:[%s2588_s15 + $0x1b00] sm:$0xff] }
 0x6a3   : > { %v2016_v3 = vadd.f32 %v2015_v1, %v992_v0  ;;  %v1024_v0 = vld [vmem:[%s2588_s15 + $0x1b08] sm:$0xff] }
 0x6a5   : > { %v2017_v5 = vadd.f32 %v2016_v3, %v993_v2  ;;  %v1025_v2 = vld [vmem:[%s2588_s15 + $0x1b10] sm:$0xff] }
 0x6a7   : > { %v2018_v7 = vadd.f32 %v2017_v5, %v994_v4  ;;  %v1026_v4 = vld [vmem:[%s2588_s15 + $0x1b18] sm:$0xff] }
 0x6a9   : > { %v2019_v9 = vadd.f32 %v2018_v7, %v995_v6  ;;  %v1027_v6 = vld [vmem:[%s2588_s15 + $0x1b20] sm:$0xff] }
 0x6ab   : > { %v2020_v11 = vadd.f32 %v2019_v9, %v996_v8  ;;  %v1028_v8 = vld [vmem:[%s2588_s15 + $0x1b28] sm:$0xff] }
 0x6ad   : > { %v2021_v13 = vadd.f32 %v2020_v11, %v997_v10  ;;  %v1029_v10 = vld [vmem:[%s2588_s15 + $0x1b30] sm:$0xff] }
 0x6af   : > { %v2022_v15 = vadd.f32 %v2021_v13, %v998_v12  ;;  %v1030_v12 = vld [vmem:[%s2588_s15 + $0x1b38] sm:$0xff] }
 0x6b1   : > { %v2023_v17 = vadd.f32 %v2022_v15, %v999_v14  ;;  %v1031_v14 = vld [vmem:[%s2588_s15 + $0x1b40] sm:$0xff] }
 0x6b3   : > { %v2024_v19 = vadd.f32 %v2023_v17, %v1000_v16  ;;  %v1032_v16 = vld [vmem:[%s2588_s15 + $0x1b48] sm:$0xff] }
 0x6b5   : > { %v2025_v21 = vadd.f32 %v2024_v19, %v1001_v18  ;;  %v1033_v18 = vld [vmem:[%s2588_s15 + $0x1b50] sm:$0xff] }
 0x6b7   : > { %v2026_v23 = vadd.f32 %v2025_v21, %v1002_v20  ;;  %v1034_v20 = vld [vmem:[%s2588_s15 + $0x1b58] sm:$0xff] }
 0x6b9   : > { %v2027_v25 = vadd.f32 %v2026_v23, %v1003_v22  ;;  %v1035_v22 = vld [vmem:[%s2588_s15 + $0x1b60] sm:$0xff] }
 0x6bb   : > { %v2028_v27 = vadd.f32 %v2027_v25, %v1004_v24  ;;  %v1036_v24 = vld [vmem:[%s2588_s15 + $0x1b68] sm:$0xff] }
 0x6bd   : > { %v2029_v29 = vadd.f32 %v2028_v27, %v1005_v26  ;;  %v1037_v26 = vld [vmem:[%s2588_s15 + $0x1b70] sm:$0xff] }
 0x6bf   : > { %v2030_v31 = vadd.f32 %v2029_v29, %v1006_v28  ;;  %v1038_v28 = vld [vmem:[%s2588_s15 + $0x1b78] sm:$0xff] }
 0x6c1   : > { %v2031_v33 = vadd.f32 %v2030_v31, %v1007_v30  ;;  %v1039_v30 = vld [vmem:[%s2588_s15 + $0x1b80] sm:$0xff] }
 0x6c3   : > { %v2032_v35 = vadd.f32 %v2031_v33, %v1008_v32  ;;  %v1040_v32 = vld [vmem:[%s2588_s15 + $0x1b88] sm:$0xff] }
 0x6c5   : > { %v2033_v37 = vadd.f32 %v2032_v35, %v1009_v34  ;;  %v1041_v34 = vld [vmem:[%s2588_s15 + $0x1b90] sm:$0xff] }
 0x6c7   : > { %v2034_v39 = vadd.f32 %v2033_v37, %v1010_v36  ;;  %v1042_v36 = vld [vmem:[%s2588_s15 + $0x1b98] sm:$0xff] }
 0x6c9   : > { %v2035_v41 = vadd.f32 %v2034_v39, %v1011_v38  ;;  %v1043_v38 = vld [vmem:[%s2588_s15 + $0x1ba0] sm:$0xff] }
 0x6cb   : > { %v2036_v43 = vadd.f32 %v2035_v41, %v1012_v40  ;;  %v1044_v40 = vld [vmem:[%s2588_s15 + $0x1ba8] sm:$0xff] }
 0x6cd   : > { %v2037_v45 = vadd.f32 %v2036_v43, %v1013_v42  ;;  %v1045_v42 = vld [vmem:[%s2588_s15 + $0x1bb0] sm:$0xff] }
 0x6cf   : > { %v2038_v47 = vadd.f32 %v2037_v45, %v1014_v44  ;;  %v1046_v44 = vld [vmem:[%s2588_s15 + $0x1bb8] sm:$0xff] }
 0x6d1   : > { %v2039_v49 = vadd.f32 %v2038_v47, %v1015_v46  ;;  %v1047_v46 = vld [vmem:[%s2588_s15 + $0x1bc0] sm:$0xff] }
 0x6d3   : > { %v2040_v51 = vadd.f32 %v2039_v49, %v1016_v48  ;;  %v1048_v48 = vld [vmem:[%s2588_s15 + $0x1bc8] sm:$0xff] }
 0x6d5   : > { %v2041_v53 = vadd.f32 %v2040_v51, %v1017_v50  ;;  %v1049_v50 = vld [vmem:[%s2588_s15 + $0x1bd0] sm:$0xff] }
 0x6d7   : > { %v2042_v55 = vadd.f32 %v2041_v53, %v1018_v52  ;;  %v1050_v52 = vld [vmem:[%s2588_s15 + $0x1bd8] sm:$0xff] }
 0x6d9   : > { %v2043_v57 = vadd.f32 %v2042_v55, %v1019_v54  ;;  %v1051_v54 = vld [vmem:[%s2588_s15 + $0x1be0] sm:$0xff] }
 0x6db   : > { %v2044_v59 = vadd.f32 %v2043_v57, %v1020_v56  ;;  %v1052_v56 = vld [vmem:[%s2588_s15 + $0x1be8] sm:$0xff] }
 0x6dd   : > { %v2045_v61 = vadd.f32 %v2044_v59, %v1021_v58  ;;  %v1053_v58 = vld [vmem:[%s2588_s15 + $0x1bf0] sm:$0xff] }
 0x6df   : > { %v2046_v63 = vadd.f32 %v2045_v61, %v1022_v60  ;;  %v1054_v60 = vld [vmem:[%s2588_s15 + $0x1bf8] sm:$0xff] }
 0x6e1   : > { %v2047_v1 = vadd.f32 %v2046_v63, %v1023_v62  ;;  %v1055_v62 = vld [vmem:[%s2588_s15 + $0x1c00] sm:$0xff] }
 0x6e3   : > { %v2048_v3 = vadd.f32 %v2047_v1, %v1024_v0  ;;  %v1056_v0 = vld [vmem:[%s2588_s15 + $0x1c08] sm:$0xff] }
 0x6e5   : > { %v2049_v5 = vadd.f32 %v2048_v3, %v1025_v2  ;;  %v1057_v2 = vld [vmem:[%s2588_s15 + $0x1c10] sm:$0xff] }
 0x6e7   : > { %v2050_v7 = vadd.f32 %v2049_v5, %v1026_v4  ;;  %v1058_v4 = vld [vmem:[%s2588_s15 + $0x1c18] sm:$0xff] }
 0x6e9   : > { %v2051_v9 = vadd.f32 %v2050_v7, %v1027_v6  ;;  %v1059_v6 = vld [vmem:[%s2588_s15 + $0x1c20] sm:$0xff] }
 0x6eb   : > { %v2052_v11 = vadd.f32 %v2051_v9, %v1028_v8  ;;  %v1060_v8 = vld [vmem:[%s2588_s15 + $0x1c28] sm:$0xff] }
 0x6ed   : > { %v2053_v13 = vadd.f32 %v2052_v11, %v1029_v10  ;;  %v1061_v10 = vld [vmem:[%s2588_s15 + $0x1c30] sm:$0xff] }
 0x6ef   : > { %v2054_v15 = vadd.f32 %v2053_v13, %v1030_v12  ;;  %v1062_v12 = vld [vmem:[%s2588_s15 + $0x1c38] sm:$0xff] }
 0x6f1   : > { %v2055_v17 = vadd.f32 %v2054_v15, %v1031_v14  ;;  %v1063_v14 = vld [vmem:[%s2588_s15 + $0x1c40] sm:$0xff] }
 0x6f3   : > { %v2056_v19 = vadd.f32 %v2055_v17, %v1032_v16  ;;  %v1064_v16 = vld [vmem:[%s2588_s15 + $0x1c48] sm:$0xff] }
 0x6f5   : > { %v2057_v21 = vadd.f32 %v2056_v19, %v1033_v18  ;;  %v1065_v18 = vld [vmem:[%s2588_s15 + $0x1c50] sm:$0xff] }
 0x6f7   : > { %v2058_v23 = vadd.f32 %v2057_v21, %v1034_v20  ;;  %v1066_v20 = vld [vmem:[%s2588_s15 + $0x1c58] sm:$0xff] }
 0x6f9   : > { %v2059_v25 = vadd.f32 %v2058_v23, %v1035_v22  ;;  %v1067_v22 = vld [vmem:[%s2588_s15 + $0x1c60] sm:$0xff] }
 0x6fb   : > { %v2060_v27 = vadd.f32 %v2059_v25, %v1036_v24  ;;  %v1068_v24 = vld [vmem:[%s2588_s15 + $0x1c68] sm:$0xff] }
 0x6fd   : > { %v2061_v29 = vadd.f32 %v2060_v27, %v1037_v26  ;;  %v1069_v26 = vld [vmem:[%s2588_s15 + $0x1c70] sm:$0xff] }
 0x6ff   : > { %v2062_v31 = vadd.f32 %v2061_v29, %v1038_v28  ;;  %v1070_v28 = vld [vmem:[%s2588_s15 + $0x1c78] sm:$0xff] }
 0x701   : > { %v2063_v33 = vadd.f32 %v2062_v31, %v1039_v30  ;;  %v1071_v30 = vld [vmem:[%s2588_s15 + $0x1c80] sm:$0xff] }
 0x703   : > { %v2064_v35 = vadd.f32 %v2063_v33, %v1040_v32  ;;  %v1072_v32 = vld [vmem:[%s2588_s15 + $0x1c88] sm:$0xff] }
 0x705   : > { %v2065_v37 = vadd.f32 %v2064_v35, %v1041_v34  ;;  %v1073_v34 = vld [vmem:[%s2588_s15 + $0x1c90] sm:$0xff] }
 0x707   : > { %v2066_v39 = vadd.f32 %v2065_v37, %v1042_v36  ;;  %v1074_v36 = vld [vmem:[%s2588_s15 + $0x1c98] sm:$0xff] }
 0x709   : > { %v2067_v41 = vadd.f32 %v2066_v39, %v1043_v38  ;;  %v1075_v38 = vld [vmem:[%s2588_s15 + $0x1ca0] sm:$0xff] }
 0x70b   : > { %v2068_v43 = vadd.f32 %v2067_v41, %v1044_v40  ;;  %v1076_v40 = vld [vmem:[%s2588_s15 + $0x1ca8] sm:$0xff] }
 0x70d   : > { %v2069_v45 = vadd.f32 %v2068_v43, %v1045_v42  ;;  %v1077_v42 = vld [vmem:[%s2588_s15 + $0x1cb0] sm:$0xff] }
 0x70f   : > { %v2070_v47 = vadd.f32 %v2069_v45, %v1046_v44  ;;  %v1078_v44 = vld [vmem:[%s2588_s15 + $0x1cb8] sm:$0xff] }
 0x711   : > { %v2071_v49 = vadd.f32 %v2070_v47, %v1047_v46  ;;  %v1079_v46 = vld [vmem:[%s2588_s15 + $0x1cc0] sm:$0xff] }
 0x713   : > { %v2072_v51 = vadd.f32 %v2071_v49, %v1048_v48  ;;  %v1080_v48 = vld [vmem:[%s2588_s15 + $0x1cc8] sm:$0xff] }
 0x715   : > { %v2073_v53 = vadd.f32 %v2072_v51, %v1049_v50  ;;  %v1081_v50 = vld [vmem:[%s2588_s15 + $0x1cd0] sm:$0xff] }
 0x717   : > { %v2074_v55 = vadd.f32 %v2073_v53, %v1050_v52  ;;  %v1082_v52 = vld [vmem:[%s2588_s15 + $0x1cd8] sm:$0xff] }
 0x719   : > { %v2075_v57 = vadd.f32 %v2074_v55, %v1051_v54  ;;  %v1083_v54 = vld [vmem:[%s2588_s15 + $0x1ce0] sm:$0xff] }
 0x71b   : > { %v2076_v59 = vadd.f32 %v2075_v57, %v1052_v56  ;;  %v1084_v56 = vld [vmem:[%s2588_s15 + $0x1ce8] sm:$0xff] }
 0x71d   : > { %v2077_v61 = vadd.f32 %v2076_v59, %v1053_v58  ;;  %v1085_v58 = vld [vmem:[%s2588_s15 + $0x1cf0] sm:$0xff] }
 0x71f   : > { %v2078_v63 = vadd.f32 %v2077_v61, %v1054_v60  ;;  %v1086_v60 = vld [vmem:[%s2588_s15 + $0x1cf8] sm:$0xff] }
 0x721   : > { %v2079_v1 = vadd.f32 %v2078_v63, %v1055_v62  ;;  %v1087_v62 = vld [vmem:[%s2588_s15 + $0x1d00] sm:$0xff] }
 0x723   : > { %v2080_v3 = vadd.f32 %v2079_v1, %v1056_v0  ;;  %v1088_v0 = vld [vmem:[%s2588_s15 + $0x1d08] sm:$0xff] }
 0x725   : > { %v2081_v5 = vadd.f32 %v2080_v3, %v1057_v2  ;;  %v1089_v2 = vld [vmem:[%s2588_s15 + $0x1d10] sm:$0xff] }
 0x727   : > { %v2082_v7 = vadd.f32 %v2081_v5, %v1058_v4  ;;  %v1090_v4 = vld [vmem:[%s2588_s15 + $0x1d18] sm:$0xff] }
 0x729   : > { %v2083_v9 = vadd.f32 %v2082_v7, %v1059_v6  ;;  %v1091_v6 = vld [vmem:[%s2588_s15 + $0x1d20] sm:$0xff] }
 0x72b   : > { %v2084_v11 = vadd.f32 %v2083_v9, %v1060_v8  ;;  %v1092_v8 = vld [vmem:[%s2588_s15 + $0x1d28] sm:$0xff] }
 0x72d   : > { %v2085_v13 = vadd.f32 %v2084_v11, %v1061_v10  ;;  %v1093_v10 = vld [vmem:[%s2588_s15 + $0x1d30] sm:$0xff] }
 0x72f   : > { %v2086_v15 = vadd.f32 %v2085_v13, %v1062_v12  ;;  %v1094_v12 = vld [vmem:[%s2588_s15 + $0x1d38] sm:$0xff] }
 0x731   : > { %v2087_v17 = vadd.f32 %v2086_v15, %v1063_v14  ;;  %v1095_v14 = vld [vmem:[%s2588_s15 + $0x1d40] sm:$0xff] }
 0x733   : > { %v2088_v19 = vadd.f32 %v2087_v17, %v1064_v16  ;;  %v1096_v16 = vld [vmem:[%s2588_s15 + $0x1d48] sm:$0xff] }
 0x735   : > { %v2089_v21 = vadd.f32 %v2088_v19, %v1065_v18  ;;  %v1097_v18 = vld [vmem:[%s2588_s15 + $0x1d50] sm:$0xff] }
 0x737   : > { %v2090_v23 = vadd.f32 %v2089_v21, %v1066_v20  ;;  %v1098_v20 = vld [vmem:[%s2588_s15 + $0x1d58] sm:$0xff] }
 0x739   : > { %v2091_v25 = vadd.f32 %v2090_v23, %v1067_v22  ;;  %v1099_v22 = vld [vmem:[%s2588_s15 + $0x1d60] sm:$0xff] }
 0x73b   : > { %v2092_v27 = vadd.f32 %v2091_v25, %v1068_v24  ;;  %v1100_v24 = vld [vmem:[%s2588_s15 + $0x1d68] sm:$0xff] }
 0x73d   : > { %v2093_v29 = vadd.f32 %v2092_v27, %v1069_v26  ;;  %v1101_v26 = vld [vmem:[%s2588_s15 + $0x1d70] sm:$0xff] }
 0x73f   : > { %v2094_v31 = vadd.f32 %v2093_v29, %v1070_v28  ;;  %v1102_v28 = vld [vmem:[%s2588_s15 + $0x1d78] sm:$0xff] }
 0x741   : > { %v2095_v33 = vadd.f32 %v2094_v31, %v1071_v30  ;;  %v1103_v30 = vld [vmem:[%s2588_s15 + $0x1d80] sm:$0xff] }
 0x743   : > { %v2096_v35 = vadd.f32 %v2095_v33, %v1072_v32  ;;  %v1104_v32 = vld [vmem:[%s2588_s15 + $0x1d88] sm:$0xff] }
 0x745   : > { %v2097_v37 = vadd.f32 %v2096_v35, %v1073_v34  ;;  %v1105_v34 = vld [vmem:[%s2588_s15 + $0x1d90] sm:$0xff] }
 0x747   : > { %v2098_v39 = vadd.f32 %v2097_v37, %v1074_v36  ;;  %v1106_v36 = vld [vmem:[%s2588_s15 + $0x1d98] sm:$0xff] }
 0x749   : > { %v2099_v41 = vadd.f32 %v2098_v39, %v1075_v38  ;;  %v1107_v38 = vld [vmem:[%s2588_s15 + $0x1da0] sm:$0xff] }
 0x74b   : > { %v2100_v43 = vadd.f32 %v2099_v41, %v1076_v40  ;;  %v1108_v40 = vld [vmem:[%s2588_s15 + $0x1da8] sm:$0xff] }
 0x74d   : > { %v2101_v45 = vadd.f32 %v2100_v43, %v1077_v42  ;;  %v1109_v42 = vld [vmem:[%s2588_s15 + $0x1db0] sm:$0xff] }
 0x74f   : > { %v2102_v47 = vadd.f32 %v2101_v45, %v1078_v44  ;;  %v1110_v44 = vld [vmem:[%s2588_s15 + $0x1db8] sm:$0xff] }
 0x751   : > { %v2103_v49 = vadd.f32 %v2102_v47, %v1079_v46  ;;  %v1111_v46 = vld [vmem:[%s2588_s15 + $0x1dc0] sm:$0xff] }
 0x753   : > { %v2104_v51 = vadd.f32 %v2103_v49, %v1080_v48  ;;  %v1112_v48 = vld [vmem:[%s2588_s15 + $0x1dc8] sm:$0xff] }
 0x755   : > { %v2105_v53 = vadd.f32 %v2104_v51, %v1081_v50  ;;  %v1113_v50 = vld [vmem:[%s2588_s15 + $0x1dd0] sm:$0xff] }
 0x757   : > { %v2106_v55 = vadd.f32 %v2105_v53, %v1082_v52  ;;  %v1114_v52 = vld [vmem:[%s2588_s15 + $0x1dd8] sm:$0xff] }
 0x759   : > { %v2107_v57 = vadd.f32 %v2106_v55, %v1083_v54  ;;  %v1115_v54 = vld [vmem:[%s2588_s15 + $0x1de0] sm:$0xff] }
 0x75b   : > { %v2108_v59 = vadd.f32 %v2107_v57, %v1084_v56  ;;  %v1116_v56 = vld [vmem:[%s2588_s15 + $0x1de8] sm:$0xff] }
 0x75d   : > { %v2109_v61 = vadd.f32 %v2108_v59, %v1085_v58  ;;  %v1117_v58 = vld [vmem:[%s2588_s15 + $0x1df0] sm:$0xff] }
 0x75f   : > { %v2110_v63 = vadd.f32 %v2109_v61, %v1086_v60  ;;  %v1118_v60 = vld [vmem:[%s2588_s15 + $0x1df8] sm:$0xff] }
 0x761   : > { %v2111_v1 = vadd.f32 %v2110_v63, %v1087_v62  ;;  %v1119_v62 = vld [vmem:[%s2588_s15 + $0x1e00] sm:$0xff] }
 0x763   : > { %v2112_v3 = vadd.f32 %v2111_v1, %v1088_v0  ;;  %v1120_v0 = vld [vmem:[%s2588_s15 + $0x1e08] sm:$0xff] }
 0x765   : > { %v2113_v5 = vadd.f32 %v2112_v3, %v1089_v2  ;;  %v1121_v2 = vld [vmem:[%s2588_s15 + $0x1e10] sm:$0xff] }
 0x767   : > { %v2114_v7 = vadd.f32 %v2113_v5, %v1090_v4  ;;  %v1122_v4 = vld [vmem:[%s2588_s15 + $0x1e18] sm:$0xff] }
 0x769   : > { %v2115_v9 = vadd.f32 %v2114_v7, %v1091_v6  ;;  %v1123_v6 = vld [vmem:[%s2588_s15 + $0x1e20] sm:$0xff] }
 0x76b   : > { %v2116_v11 = vadd.f32 %v2115_v9, %v1092_v8  ;;  %v1124_v8 = vld [vmem:[%s2588_s15 + $0x1e28] sm:$0xff] }
 0x76d   : > { %v2117_v13 = vadd.f32 %v2116_v11, %v1093_v10  ;;  %v1125_v10 = vld [vmem:[%s2588_s15 + $0x1e30] sm:$0xff] }
 0x76f   : > { %v2118_v15 = vadd.f32 %v2117_v13, %v1094_v12  ;;  %v1126_v12 = vld [vmem:[%s2588_s15 + $0x1e38] sm:$0xff] }
 0x771   : > { %v2119_v17 = vadd.f32 %v2118_v15, %v1095_v14  ;;  %v1127_v14 = vld [vmem:[%s2588_s15 + $0x1e40] sm:$0xff] }
 0x773   : > { %v2120_v19 = vadd.f32 %v2119_v17, %v1096_v16  ;;  %v1128_v16 = vld [vmem:[%s2588_s15 + $0x1e48] sm:$0xff] }
 0x775   : > { %v2121_v21 = vadd.f32 %v2120_v19, %v1097_v18  ;;  %v1129_v18 = vld [vmem:[%s2588_s15 + $0x1e50] sm:$0xff] }
 0x777   : > { %v2122_v23 = vadd.f32 %v2121_v21, %v1098_v20  ;;  %v1130_v20 = vld [vmem:[%s2588_s15 + $0x1e58] sm:$0xff] }
 0x779   : > { %v2123_v25 = vadd.f32 %v2122_v23, %v1099_v22  ;;  %v1131_v22 = vld [vmem:[%s2588_s15 + $0x1e60] sm:$0xff] }
 0x77b   : > { %v2124_v27 = vadd.f32 %v2123_v25, %v1100_v24  ;;  %v1132_v24 = vld [vmem:[%s2588_s15 + $0x1e68] sm:$0xff] }
 0x77d   : > { %v2125_v29 = vadd.f32 %v2124_v27, %v1101_v26  ;;  %v1133_v26 = vld [vmem:[%s2588_s15 + $0x1e70] sm:$0xff] }
 0x77f   : > { %v2126_v31 = vadd.f32 %v2125_v29, %v1102_v28  ;;  %v1134_v28 = vld [vmem:[%s2588_s15 + $0x1e78] sm:$0xff] }
 0x781   : > { %v2127_v33 = vadd.f32 %v2126_v31, %v1103_v30  ;;  %v1135_v30 = vld [vmem:[%s2588_s15 + $0x1e80] sm:$0xff] }
 0x783   : > { %v2128_v35 = vadd.f32 %v2127_v33, %v1104_v32  ;;  %v1136_v32 = vld [vmem:[%s2588_s15 + $0x1e88] sm:$0xff] }
 0x785   : > { %v2129_v37 = vadd.f32 %v2128_v35, %v1105_v34  ;;  %v1137_v34 = vld [vmem:[%s2588_s15 + $0x1e90] sm:$0xff] }
 0x787   : > { %v2130_v39 = vadd.f32 %v2129_v37, %v1106_v36  ;;  %v1138_v36 = vld [vmem:[%s2588_s15 + $0x1e98] sm:$0xff] }
 0x789   : > { %v2131_v41 = vadd.f32 %v2130_v39, %v1107_v38  ;;  %v1139_v38 = vld [vmem:[%s2588_s15 + $0x1ea0] sm:$0xff] }
 0x78b   : > { %v2132_v43 = vadd.f32 %v2131_v41, %v1108_v40  ;;  %v1140_v40 = vld [vmem:[%s2588_s15 + $0x1ea8] sm:$0xff] }
 0x78d   : > { %v2133_v45 = vadd.f32 %v2132_v43, %v1109_v42  ;;  %v1141_v42 = vld [vmem:[%s2588_s15 + $0x1eb0] sm:$0xff] }
 0x78f   : > { %v2134_v47 = vadd.f32 %v2133_v45, %v1110_v44  ;;  %v1142_v44 = vld [vmem:[%s2588_s15 + $0x1eb8] sm:$0xff] }
 0x791   : > { %v2135_v49 = vadd.f32 %v2134_v47, %v1111_v46  ;;  %v1143_v46 = vld [vmem:[%s2588_s15 + $0x1ec0] sm:$0xff] }
 0x793   : > { %v2136_v51 = vadd.f32 %v2135_v49, %v1112_v48  ;;  %v1144_v48 = vld [vmem:[%s2588_s15 + $0x1ec8] sm:$0xff] }
 0x795   : > { %v2137_v53 = vadd.f32 %v2136_v51, %v1113_v50  ;;  %v1145_v50 = vld [vmem:[%s2588_s15 + $0x1ed0] sm:$0xff] }
 0x797   : > { %v2138_v55 = vadd.f32 %v2137_v53, %v1114_v52  ;;  %v1146_v52 = vld [vmem:[%s2588_s15 + $0x1ed8] sm:$0xff] }
 0x799   : > { %v2139_v57 = vadd.f32 %v2138_v55, %v1115_v54  ;;  %v1147_v54 = vld [vmem:[%s2588_s15 + $0x1ee0] sm:$0xff] }
 0x79b   : > { %v2140_v59 = vadd.f32 %v2139_v57, %v1116_v56  ;;  %v1148_v56 = vld [vmem:[%s2588_s15 + $0x1ee8] sm:$0xff] }
 0x79d   : > { %v2141_v61 = vadd.f32 %v2140_v59, %v1117_v58  ;;  %v1149_v58 = vld [vmem:[%s2588_s15 + $0x1ef0] sm:$0xff] }
 0x79f   : > { %v2142_v63 = vadd.f32 %v2141_v61, %v1118_v60  ;;  %v1150_v60 = vld [vmem:[%s2588_s15 + $0x1ef8] sm:$0xff] }
 0x7a1   : > { %v2143_v1 = vadd.f32 %v2142_v63, %v1119_v62  ;;  %v1151_v62 = vld [vmem:[%s2588_s15 + $0x1f00] sm:$0xff] }
 0x7a3   : > { %v2144_v3 = vadd.f32 %v2143_v1, %v1120_v0  ;;  %v1152_v0 = vld [vmem:[%s2588_s15 + $0x1f08] sm:$0xff] }
 0x7a5   : > { %v2145_v5 = vadd.f32 %v2144_v3, %v1121_v2  ;;  %v1153_v2 = vld [vmem:[%s2588_s15 + $0x1f10] sm:$0xff] }
 0x7a7   : > { %v2146_v7 = vadd.f32 %v2145_v5, %v1122_v4  ;;  %v1154_v4 = vld [vmem:[%s2588_s15 + $0x1f18] sm:$0xff] }
 0x7a9   : > { %v2147_v9 = vadd.f32 %v2146_v7, %v1123_v6  ;;  %v1155_v6 = vld [vmem:[%s2588_s15 + $0x1f20] sm:$0xff] }
 0x7ab   : > { %v2148_v11 = vadd.f32 %v2147_v9, %v1124_v8  ;;  %v1156_v8 = vld [vmem:[%s2588_s15 + $0x1f28] sm:$0xff] }
 0x7ad   : > { %v2149_v13 = vadd.f32 %v2148_v11, %v1125_v10  ;;  %v1157_v10 = vld [vmem:[%s2588_s15 + $0x1f30] sm:$0xff] }
 0x7af   : > { %v2150_v15 = vadd.f32 %v2149_v13, %v1126_v12  ;;  %v1158_v12 = vld [vmem:[%s2588_s15 + $0x1f38] sm:$0xff] }
 0x7b1   : > { %v2151_v17 = vadd.f32 %v2150_v15, %v1127_v14  ;;  %v1159_v14 = vld [vmem:[%s2588_s15 + $0x1f40] sm:$0xff] }
 0x7b3   : > { %v2152_v19 = vadd.f32 %v2151_v17, %v1128_v16  ;;  %v1160_v16 = vld [vmem:[%s2588_s15 + $0x1f48] sm:$0xff] }
 0x7b5   : > { %v2153_v21 = vadd.f32 %v2152_v19, %v1129_v18  ;;  %v1161_v18 = vld [vmem:[%s2588_s15 + $0x1f50] sm:$0xff] }
 0x7b7   : > { %v2154_v23 = vadd.f32 %v2153_v21, %v1130_v20  ;;  %v1162_v20 = vld [vmem:[%s2588_s15 + $0x1f58] sm:$0xff] }
 0x7b9   : > { %v2155_v25 = vadd.f32 %v2154_v23, %v1131_v22  ;;  %v1163_v22 = vld [vmem:[%s2588_s15 + $0x1f60] sm:$0xff] }
 0x7bb   : > { %v2156_v27 = vadd.f32 %v2155_v25, %v1132_v24  ;;  %v1164_v24 = vld [vmem:[%s2588_s15 + $0x1f68] sm:$0xff] }
 0x7bd   : > { %v2157_v29 = vadd.f32 %v2156_v27, %v1133_v26  ;;  %v1165_v26 = vld [vmem:[%s2588_s15 + $0x1f70] sm:$0xff] }
 0x7bf   : > { %v2158_v31 = vadd.f32 %v2157_v29, %v1134_v28  ;;  %v1166_v28 = vld [vmem:[%s2588_s15 + $0x1f78] sm:$0xff] }
 0x7c1   : > { %v2159_v33 = vadd.f32 %v2158_v31, %v1135_v30  ;;  %v1167_v30 = vld [vmem:[%s2588_s15 + $0x1f80] sm:$0xff] }
 0x7c3   : > { %v2160_v35 = vadd.f32 %v2159_v33, %v1136_v32  ;;  %v1168_v32 = vld [vmem:[%s2588_s15 + $0x1f88] sm:$0xff] }
 0x7c5   : > { %v2161_v37 = vadd.f32 %v2160_v35, %v1137_v34  ;;  %v1169_v34 = vld [vmem:[%s2588_s15 + $0x1f90] sm:$0xff] }
 0x7c7   : > { %v2162_v39 = vadd.f32 %v2161_v37, %v1138_v36  ;;  %v1170_v36 = vld [vmem:[%s2588_s15 + $0x1f98] sm:$0xff] }
 0x7c9   : > { %v2163_v41 = vadd.f32 %v2162_v39, %v1139_v38  ;;  %v1171_v38 = vld [vmem:[%s2588_s15 + $0x1fa0] sm:$0xff] }
 0x7cb   : > { %v2164_v43 = vadd.f32 %v2163_v41, %v1140_v40  ;;  %v1172_v40 = vld [vmem:[%s2588_s15 + $0x1fa8] sm:$0xff] }
 0x7cd   : > { %v2165_v45 = vadd.f32 %v2164_v43, %v1141_v42  ;;  %v1173_v42 = vld [vmem:[%s2588_s15 + $0x1fb0] sm:$0xff] }
 0x7cf   : > { %v2166_v47 = vadd.f32 %v2165_v45, %v1142_v44  ;;  %v1174_v44 = vld [vmem:[%s2588_s15 + $0x1fb8] sm:$0xff] }
 0x7d1   : > { %v2167_v49 = vadd.f32 %v2166_v47, %v1143_v46  ;;  %v1175_v46 = vld [vmem:[%s2588_s15 + $0x1fc0] sm:$0xff] }
 0x7d3   : > { %v2168_v51 = vadd.f32 %v2167_v49, %v1144_v48  ;;  %v1176_v48 = vld [vmem:[%s2588_s15 + $0x1fc8] sm:$0xff] }
 0x7d5   : > { %v2169_v53 = vadd.f32 %v2168_v51, %v1145_v50  ;;  %v1177_v50 = vld [vmem:[%s2588_s15 + $0x1fd0] sm:$0xff] }
 0x7d7   : > { %v2170_v55 = vadd.f32 %v2169_v53, %v1146_v52  ;;  %v1178_v52 = vld [vmem:[%s2588_s15 + $0x1fd8] sm:$0xff] }
 0x7d9   : > { %v2171_v57 = vadd.f32 %v2170_v55, %v1147_v54  ;;  %v1179_v54 = vld [vmem:[%s2588_s15 + $0x1fe0] sm:$0xff] }
 0x7db   : > { %v2172_v59 = vadd.f32 %v2171_v57, %v1148_v56  ;;  %v1180_v56 = vld [vmem:[%s2588_s15 + $0x1fe8] sm:$0xff] }
 0x7dd   : > { %v2173_v61 = vadd.f32 %v2172_v59, %v1149_v58  ;;  %v1181_v58 = vld [vmem:[%s2588_s15 + $0x1ff0] sm:$0xff] }
 0x7df   : > { %v2174_v63 = vadd.f32 %v2173_v61, %v1150_v60  ;;  %v1182_v60 = vld [vmem:[%s2588_s15 + $0x1ff8] sm:$0xff] }
 0x7e1   : > { %v2175_v1 = vadd.f32 %v2174_v63, %v1151_v62 }
 0x7e3   : > { %v2176_v3 = vadd.f32 %v2175_v1, %v1152_v0 }
 0x7e5   : > { %v2177_v5 = vadd.f32 %v2176_v3, %v1153_v2 }
 0x7e7   : > { %v2178_v7 = vadd.f32 %v2177_v5, %v1154_v4 }
 0x7e9   : > { %v2179_v9 = vadd.f32 %v2178_v7, %v1155_v6 }
 0x7eb   : > { %v2180_v11 = vadd.f32 %v2179_v9, %v1156_v8 }
 0x7ed   : > { %v2181_v13 = vadd.f32 %v2180_v11, %v1157_v10 }
 0x7ef   : > { %v2182_v15 = vadd.f32 %v2181_v13, %v1158_v12 }
 0x7f1   : > { %v2183_v17 = vadd.f32 %v2182_v15, %v1159_v14 }
 0x7f3   : > { %v2184_v19 = vadd.f32 %v2183_v17, %v1160_v16 }
 0x7f5   : > { %v2185_v21 = vadd.f32 %v2184_v19, %v1161_v18 }
 0x7f7   : > { %v2186_v23 = vadd.f32 %v2185_v21, %v1162_v20 }
 0x7f9   : > { %v2187_v25 = vadd.f32 %v2186_v23, %v1163_v22 }
 0x7fb   : > { %v2188_v27 = vadd.f32 %v2187_v25, %v1164_v24 }
 0x7fd   : > { %v2189_v29 = vadd.f32 %v2188_v27, %v1165_v26 }
 0x7ff   : > { %v2190_v31 = vadd.f32 %v2189_v29, %v1166_v28 }
 0x801   : > { %v2191_v33 = vadd.f32 %v2190_v31, %v1167_v30 }
 0x803   : > { %v2192_v35 = vadd.f32 %v2191_v33, %v1168_v32 }
 0x805   : > { %v2193_v37 = vadd.f32 %v2192_v35, %v1169_v34 }
 0x807   : > { %v2194_v39 = vadd.f32 %v2193_v37, %v1170_v36 }
 0x809   : > { %v2195_v41 = vadd.f32 %v2194_v39, %v1171_v38 }
 0x80b   : > { %v2196_v43 = vadd.f32 %v2195_v41, %v1172_v40 }
 0x80d   : > { %v2197_v45 = vadd.f32 %v2196_v43, %v1173_v42 }
 0x80f   : > { %v2198_v47 = vadd.f32 %v2197_v45, %v1174_v44 }
 0x811   : > { %v2199_v49 = vadd.f32 %v2198_v47, %v1175_v46 }
 0x813   : > { %v2200_v51 = vadd.f32 %v2199_v49, %v1176_v48 }
 0x815   : > { %v2201_v53 = vadd.f32 %v2200_v51, %v1177_v50 }
 0x817   : > { %v2202_v55 = vadd.f32 %v2201_v53, %v1178_v52 }
 0x819   : > { %v2203_v57 = vadd.f32 %v2202_v55, %v1179_v54 }
 0x81b   : > { %v2204_v59 = vadd.f32 %v2203_v57, %v1180_v56 }
 0x81d   : > { %v2205_v61 = vadd.f32 %v2204_v59, %v1181_v58 }
 0x81f   : > { %v2206_v62 = vadd.f32 %v2205_v61, %v1182_v60 }
 0x821   : > { %2208 = vst [vmem:[%s151_s24] sm:$0xff] %v2206_v62 }
 0x822   : > { %2441 = shalt.err (!%p2438_p13)
}
 0x823   : > { %2321 = dma.vmem_to_hbm [thread:$0]  (%p2561_p9), %s2223_s25, 128, %s2225_s26, %s2210_s27  }
 0x824 PF: > { %s2236_s5 = sand.u32 1, %s2476_s6   ;;  %p2328_p0 = pnand %p2307_p12, %p2568_p11 }
 0x825   : > { %s2237_s12 = scalar_lea.sflag [#allocation4], %s2236_s5 }
 0x826   : > { %p2329_p1 = pneg %p2328_p0 }
 0x828   : > { %2471 = dma.done.wait (%p2329_p1), %s2237_s12, 128  }
 0x829   : > { %2473 = vsyncadd (%p2329_p1), %s2237_s12, 4294967168  ;;  %s17_s11 = sadd.s32 1, %s2496_s11   ;;  %s3663_s6 = smov %s2480_s7 }
 0x82a   : > { %p14_p2 = scmp.ge.s32.totalorder %s17_s11, 4   ;;  %s3664_s7 = smov %s2484_s8 }
 0x82b   : > { %s3665_s8 = smov %s2566_s20  ;;  %s3666_s9 = smov %s2492_s10 }
 0x82c   : > { %s3667_s10 = smov %s3669_s14  ;;  %16 = sbr.rel (!%p14_p2) target bundleno = 6 (0x6), region = 73 }
 0x831   :  { %2243 = vsyncpa [#allocation3], 1 }
 0x832   :  { %2245 = vsyncpa [#allocation3 + $0x1], 1 }
 0x833   :  { %2246 = vsyncpa [#allocation4], 1 }
 0x834   :  { %2248 = vsyncpa [#allocation4 + $0x1], 1 }

</bundles_post_ra>
